<compile_context>
chip_gen: v7x
topology: tpu7x:2x2x1
jax: 0.10.0
libtpu: 0.0.40
codegen_flags: <defaults>
</compile_context>

<pallas_src>
import numpy as np
import jax
import jax.numpy as jnp
from jax import lax
from jax.experimental import pallas as pl
from jax.experimental.pallas import tpu as pltpu

_K1D = (0.05, 0.25, 0.4, 0.25, 0.05)   # torch: k = [[0.05, 0.25, 0.4, 0.25, 0.05]]
_EPS = 1e-3                            # CharbonnierLoss eps
_EPS2 = _EPS * _EPS


def _banded_h_matrix(w):
    """(W, W) matrix M s.t. (v @ M)[:, j] = 5-tap horizontal gaussian of v at column j,
    with replicate clamping at the borders (== F.pad(..., mode='replicate'))."""
    m = np.zeros((w, w), np.float32)
    for j in range(w):
        for d, kd in enumerate(_K1D):
            src = min(max(j + d - 2, 0), w - 1)
            m[src, j] += kd
    return m


def _vconv5_replicate(a, kv):
    """Vertical (sublane) 5-tap conv with replicate boundary. a: (H, W) f32."""
    h = a.shape[0]
    ap = jnp.concatenate([a[0:1], a[0:1], a, a[h - 1:h], a[h - 1:h]], axis=0)
    out = kv[0] * ap[0:h]
    for t in range(1, 5):
        out = out + kv[t] * ap[t:t + h]
    return out


def _gauss5x5(a, mh, kv):
    """Separable 5x5 gaussian with replicate padding.
    Vertical taps on the VPU; horizontal pass as an MXU matmul (banded matrix)."""
    v = _vconv5_replicate(a, kv)
    return jnp.dot(v, mh, preferred_element_type=jnp.float32,
                   precision=lax.Precision.HIGHEST)


def _edge_loss_kernel(x_ref, y_ref, mh_ref, out_ref):
    tbc, h, w = x_ref.shape
    mh = mh_ref[...]

    # Even-(row, col) mask, built once per tile (hoisted out of the conv math).
    rows = lax.broadcasted_iota(jnp.int32, (h, w), 0)
    cols = lax.broadcasted_iota(jnp.int32, (h, w), 1)
    even_mask = ((rows & 1) == 0) & ((cols & 1) == 0)

    kv1 = tuple(4.0 * k for k in _K1D)   # fold the "* 4" of the upsample step
    kv2 = _K1D
    zero = jnp.float32(0.0)

    def laplacian(img):
        f1 = _gauss5x5(img, mh, kv1)           # first gauss conv (x4 folded in)
        nf = jnp.where(even_mask, f1, zero)    # ::2 downsample + zero upsample
        f2 = _gauss5x5(nf, mh, kv2)            # second gauss conv on the masked
                                               # image (replicate pad done in-kernel)
        return img - f2

    acc = zero
    for c in range(tbc):                       # tbc <= 8, statically unrolled
        d = laplacian(x_ref[c]) - laplacian(y_ref[c])
        acc = acc + jnp.sum(jnp.sqrt(d * d + jnp.float32(_EPS2)))
    out_ref[0, 0] = acc                        # per-tile Charbonnier partial sum


def _pick_tbc(bc, h, w, vmem_budget_bytes=8 << 20, max_unroll=8):
    """Largest divisor of bc keeping double-buffered x/y tiles inside a conservative
    VMEM budget (safe on v7x's 64 MiB) and bounding the in-kernel unroll."""
    per_channel = 2 * 2 * h * w * 4            # 2 inputs x 2 pipeline buffers, f32
    cap = max(1, min(max_unroll, vmem_budget_bytes // per_channel))
    tbc = 1
    for d in range(1, bc + 1):
        if bc % d == 0 and d <= cap:
            tbc = d
    return tbc


@jax.jit
def edge_loss(x, y):
    """x, y: (B, C, H, W) float32 NCHW. Same depthwise 5x5 gaussian per channel."""
    b, c, h, w = x.shape
    bc = b * c
    xr = x.reshape(bc, h, w).astype(jnp.float32)
    yr = y.reshape(bc, h, w).astype(jnp.float32)
    mh = jnp.asarray(_banded_h_matrix(w))

    tbc = _pick_tbc(bc, h, w)
    n_tiles = bc // tbc

    partials = pl.pallas_call(
        _edge_loss_kernel,
        out_shape=jax.ShapeDtypeStruct((n_tiles, 1), jnp.float32),
        grid=(n_tiles,),
        in_specs=[
            pl.BlockSpec((tbc, h, w), lambda i: (i, 0, 0)),
            pl.BlockSpec((tbc, h, w), lambda i: (i, 0, 0)),
            pl.BlockSpec((w, w), lambda i: (0, 0)),   # constant block index ->
                                                      # fetched once, stays in VMEM
        ],
        out_specs=pl.BlockSpec((1, 1), lambda i: (i, 0),
                               memory_space=pltpu.MemorySpace.SMEM),
        compiler_params=pltpu.CompilerParams(
            dimension_semantics=("parallel",),        # v7x: shard B*C over 2 TCs
            vmem_limit_bytes=32 * 1024 * 1024,
        ),
    )(xr, yr, mh)

    return jnp.sum(partials) / jnp.float32(bc * h * w)


def _edge_loss_reference(x, y):
    """Pure-JAX/XLA reference mirroring the PyTorch EdgeLoss (for a sanity check)."""
    k1 = jnp.asarray(_K1D, jnp.float32)
    kk = jnp.outer(k1, k1)

    def conv_gauss(img):                       # img: (N, H, W)
        h, w = img.shape[1], img.shape[2]
        p = jnp.pad(img, ((0, 0), (2, 2), (2, 2)), mode='edge')
        acc = jnp.zeros_like(img)
        for i in range(5):
            for j in range(5):
                acc = acc + kk[i, j] * p[:, i:i + h, j:j + w]
        return acc

    def laplacian(img):
        h, w = img.shape[1], img.shape[2]
        f = conv_gauss(img)
        m = ((jnp.arange(h) % 2 == 0)[:, None]
             & (jnp.arange(w) % 2 == 0)[None, :])
        nf = jnp.where(m[None], f * 4.0, 0.0)
        return img - conv_gauss(nf)

    b, c, h, w = x.shape
    xr = x.reshape(b * c, h, w).astype(jnp.float32)
    yr = y.reshape(b * c, h, w).astype(jnp.float32)
    d = laplacian(xr) - laplacian(yr)
    return jnp.mean(jnp.sqrt(d * d + jnp.float32(_EPS2)))


if __name__ == "__main__":
    key = jax.random.PRNGKey(0)
    kx, ky = jax.random.split(key)
    # EdgeLoss builds its gaussian for 3 channels (groups=3) -> C=3.
    x = jax.random.uniform(kx, (2, 3, 16, 16), dtype=jnp.float32)
    y = jax.random.uniform(ky, (2, 3, 16, 16), dtype=jnp.float32)

    loss = edge_loss(x, y)
    jax.block_until_ready(loss)

    ref = _edge_loss_reference(x, y)
    # Generous tolerance only to absorb MXU f32 emulation differences.
    if not bool(jnp.allclose(loss, ref, rtol=1e-3, atol=1e-5)):
        raise AssertionError(
            f"Pallas/XLA mismatch: pallas={float(loss):.8f} ref={float(ref):.8f}")
    print("KERNEL_OK")
</pallas_src>

<mosaic_0001>
module attributes {stable_mosaic.version = 11 : i64} {
  func.func @_edge_loss_kernel(%arg0: i32, %arg1: memref<6x16x16xf32, #tpu.memory_space<vmem>>, %arg2: memref<6x16x16xf32, #tpu.memory_space<vmem>>, %arg3: memref<16x16xf32, #tpu.memory_space<vmem>>, %arg4: memref<1x1xf32, #tpu.memory_space<smem>>) attributes {dimension_semantics = [#tpu.dimension_semantics<parallel>], iteration_bounds = array<i64: 1>, scalar_prefetch = 0 : i64, scratch_operands = 0 : i64, tpu.core_type = #tpu.core_type<tc>, window_params = [{transform_indices = @transform_0, window_bounds = array<i64: 6, 16, 16>}, {transform_indices = @transform_1, window_bounds = array<i64: 6, 16, 16>}, {pipeline_mode = #tpu.pipeline_mode<synchronous>, transform_indices = @transform_2, window_bounds = array<i64: 16, 16>}, {transform_indices = @transform_3, window_bounds = array<i64: 1, 1>}]} {
    %c0 = arith.constant 0 : index
    %c0_0 = arith.constant 0 : index
    %0 = vector.load %arg3[%c0, %c0_0] : memref<16x16xf32, #tpu.memory_space<vmem>>, vector<16x16xf32>
    %1 = tpu.iota {dimensions = array<i32: 0>} : vector<16x16xi32>
    %2 = tpu.iota {dimensions = array<i32: 1>} : vector<16x16xi32>
    %c1_i32 = arith.constant 1 : i32
    %3 = vector.broadcast %c1_i32 : i32 to vector<16x16xi32>
    %4 = arith.andi %1, %3 : vector<16x16xi32>
    %c0_i32 = arith.constant 0 : i32
    %5 = vector.broadcast %c0_i32 : i32 to vector<16x16xi32>
    %6 = arith.cmpi eq, %4, %5 : vector<16x16xi32>
    %c1_i32_1 = arith.constant 1 : i32
    %7 = vector.broadcast %c1_i32_1 : i32 to vector<16x16xi32>
    %8 = arith.andi %2, %7 : vector<16x16xi32>
    %c0_i32_2 = arith.constant 0 : i32
    %9 = vector.broadcast %c0_i32_2 : i32 to vector<16x16xi32>
    %10 = arith.cmpi eq, %8, %9 : vector<16x16xi32>
    %11 = arith.andi %6, %10 : vector<16x16xi1>
    %c0_3 = arith.constant 0 : index
    %c0_4 = arith.constant 0 : index
    %c0_5 = arith.constant 0 : index
    %12 = vector.load %arg1[%c0_3, %c0_4, %c0_5] : memref<6x16x16xf32, #tpu.memory_space<vmem>>, vector<1x16x16xf32>
    %13 = vector.shape_cast %12 : vector<1x16x16xf32> to vector<16x16xf32>
    %14 = vector.extract_strided_slice %13 {offsets = [0, 0], sizes = [1, 16], strides = [1, 1]} : vector<16x16xf32> to vector<1x16xf32>
    %15 = vector.extract_strided_slice %13 {offsets = [0, 0], sizes = [1, 16], strides = [1, 1]} : vector<16x16xf32> to vector<1x16xf32>
    %16 = vector.extract_strided_slice %13 {offsets = [15, 0], sizes = [1, 16], strides = [1, 1]} : vector<16x16xf32> to vector<1x16xf32>
    %17 = vector.extract_strided_slice %13 {offsets = [15, 0], sizes = [1, 16], strides = [1, 1]} : vector<16x16xf32> to vector<1x16xf32>
    %18 = tpu.concatenate %14, %15, %13, %16, %17 in 0 : vector<1x16xf32>, vector<1x16xf32>, vector<16x16xf32>, vector<1x16xf32>, vector<1x16xf32> -> vector<20x16xf32>
    %19 = vector.extract_strided_slice %18 {offsets = [0, 0], sizes = [16, 16], strides = [1, 1]} : vector<20x16xf32> to vector<16x16xf32>
    %cst = arith.constant 2.000000e-01 : f32
    %20 = vector.broadcast %cst : f32 to vector<16x16xf32>
    %21 = arith.mulf %20, %19 : vector<16x16xf32>
    %22 = vector.extract_strided_slice %18 {offsets = [1, 0], sizes = [16, 16], strides = [1, 1]} : vector<20x16xf32> to vector<16x16xf32>
    %cst_6 = arith.constant 1.000000e+00 : f32
    %23 = vector.broadcast %cst_6 : f32 to vector<16x16xf32>
    %24 = arith.mulf %23, %22 : vector<16x16xf32>
    %25 = arith.addf %21, %24 : vector<16x16xf32>
    %26 = vector.extract_strided_slice %18 {offsets = [2, 0], sizes = [16, 16], strides = [1, 1]} : vector<20x16xf32> to vector<16x16xf32>
    %cst_7 = arith.constant 1.600000e+00 : f32
    %27 = vector.broadcast %cst_7 : f32 to vector<16x16xf32>
    %28 = arith.mulf %27, %26 : vector<16x16xf32>
    %29 = arith.addf %25, %28 : vector<16x16xf32>
    %30 = vector.extract_strided_slice %18 {offsets = [3, 0], sizes = [16, 16], strides = [1, 1]} : vector<20x16xf32> to vector<16x16xf32>
    %cst_8 = arith.constant 1.000000e+00 : f32
    %31 = vector.broadcast %cst_8 : f32 to vector<16x16xf32>
    %32 = arith.mulf %31, %30 : vector<16x16xf32>
    %33 = arith.addf %29, %32 : vector<16x16xf32>
    %34 = vector.extract_strided_slice %18 {offsets = [4, 0], sizes = [16, 16], strides = [1, 1]} : vector<20x16xf32> to vector<16x16xf32>
    %cst_9 = arith.constant 2.000000e-01 : f32
    %35 = vector.broadcast %cst_9 : f32 to vector<16x16xf32>
    %36 = arith.mulf %35, %34 : vector<16x16xf32>
    %37 = arith.addf %33, %36 : vector<16x16xf32>
    %cst_10 = arith.constant dense<0.000000e+00> : vector<16x16xf32>
    %38 = tpu.matmul %37, %0, %cst_10 {dimension_numbers = #tpu.dot_dimension_numbers<[1], [0], [0], [1], [0, 0, 1, 1], [], []>, precision = #tpu.contract_precision<fp32>} : vector<16x16xf32>, vector<16x16xf32>, vector<16x16xf32> -> vector<16x16xf32>
    %cst_11 = arith.constant 0.000000e+00 : f32
    %39 = vector.broadcast %cst_11 : f32 to vector<16x16xf32>
    %40 = arith.select %11, %38, %39 : vector<16x16xi1>, vector<16x16xf32>
    %41 = vector.extract_strided_slice %40 {offsets = [0, 0], sizes = [1, 16], strides = [1, 1]} : vector<16x16xf32> to vector<1x16xf32>
    %42 = vector.extract_strided_slice %40 {offsets = [0, 0], sizes = [1, 16], strides = [1, 1]} : vector<16x16xf32> to vector<1x16xf32>
    %43 = vector.extract_strided_slice %40 {offsets = [15, 0], sizes = [1, 16], strides = [1, 1]} : vector<16x16xf32> to vector<1x16xf32>
    %44 = vector.extract_strided_slice %40 {offsets = [15, 0], sizes = [1, 16], strides = [1, 1]} : vector<16x16xf32> to vector<1x16xf32>
    %45 = tpu.concatenate %41, %42, %40, %43, %44 in 0 : vector<1x16xf32>, vector<1x16xf32>, vector<16x16xf32>, vector<1x16xf32>, vector<1x16xf32> -> vector<20x16xf32>
    %46 = vector.extract_strided_slice %45 {offsets = [0, 0], sizes = [16, 16], strides = [1, 1]} : vector<20x16xf32> to vector<16x16xf32>
    %cst_12 = arith.constant 5.000000e-02 : f32
    %47 = vector.broadcast %cst_12 : f32 to vector<16x16xf32>
    %48 = arith.mulf %47, %46 : vector<16x16xf32>
    %49 = vector.extract_strided_slice %45 {offsets = [1, 0], sizes = [16, 16], strides = [1, 1]} : vector<20x16xf32> to vector<16x16xf32>
    %cst_13 = arith.constant 2.500000e-01 : f32
    %50 = vector.broadcast %cst_13 : f32 to vector<16x16xf32>
    %51 = arith.mulf %50, %49 : vector<16x16xf32>
    %52 = arith.addf %48, %51 : vector<16x16xf32>
    %53 = vector.extract_strided_slice %45 {offsets = [2, 0], sizes = [16, 16], strides = [1, 1]} : vector<20x16xf32> to vector<16x16xf32>
    %cst_14 = arith.constant 4.000000e-01 : f32
    %54 = vector.broadcast %cst_14 : f32 to vector<16x16xf32>
    %55 = arith.mulf %54, %53 : vector<16x16xf32>
    %56 = arith.addf %52, %55 : vector<16x16xf32>
    %57 = vector.extract_strided_slice %45 {offsets = [3, 0], sizes = [16, 16], strides = [1, 1]} : vector<20x16xf32> to vector<16x16xf32>
    %cst_15 = arith.constant 2.500000e-01 : f32
    %58 = vector.broadcast %cst_15 : f32 to vector<16x16xf32>
    %59 = arith.mulf %58, %57 : vector<16x16xf32>
    %60 = arith.addf %56, %59 : vector<16x16xf32>
    %61 = vector.extract_strided_slice %45 {offsets = [4, 0], sizes = [16, 16], strides = [1, 1]} : vector<20x16xf32> to vector<16x16xf32>
    %cst_16 = arith.constant 5.000000e-02 : f32
    %62 = vector.broadcast %cst_16 : f32 to vector<16x16xf32>
    %63 = arith.mulf %62, %61 : vector<16x16xf32>
    %64 = arith.addf %60, %63 : vector<16x16xf32>
    %cst_17 = arith.constant dense<0.000000e+00> : vector<16x16xf32>
    %65 = tpu.matmul %64, %0, %cst_17 {dimension_numbers = #tpu.dot_dimension_numbers<[1], [0], [0], [1], [0, 0, 1, 1], [], []>, precision = #tpu.contract_precision<fp32>} : vector<16x16xf32>, vector<16x16xf32>, vector<16x16xf32> -> vector<16x16xf32>
    %66 = arith.subf %13, %65 : vector<16x16xf32>
    %c0_18 = arith.constant 0 : index
    %c0_19 = arith.constant 0 : index
    %c0_20 = arith.constant 0 : index
    %67 = vector.load %arg2[%c0_18, %c0_19, %c0_20] : memref<6x16x16xf32, #tpu.memory_space<vmem>>, vector<1x16x16xf32>
    %68 = vector.shape_cast %67 : vector<1x16x16xf32> to vector<16x16xf32>
    %69 = vector.extract_strided_slice %68 {offsets = [0, 0], sizes = [1, 16], strides = [1, 1]} : vector<16x16xf32> to vector<1x16xf32>
    %70 = vector.extract_strided_slice %68 {offsets = [0, 0], sizes = [1, 16], strides = [1, 1]} : vector<16x16xf32> to vector<1x16xf32>
    %71 = vector.extract_strided_slice %68 {offsets = [15, 0], sizes = [1, 16], strides = [1, 1]} : vector<16x16xf32> to vector<1x16xf32>
    %72 = vector.extract_strided_slice %68 {offsets = [15, 0], sizes = [1, 16], strides = [1, 1]} : vector<16x16xf32> to vector<1x16xf32>
    %73 = tpu.concatenate %69, %70, %68, %71, %72 in 0 : vector<1x16xf32>, vector<1x16xf32>, vector<16x16xf32>, vector<1x16xf32>, vector<1x16xf32> -> vector<20x16xf32>
    %74 = vector.extract_strided_slice %73 {offsets = [0, 0], sizes = [16, 16], strides = [1, 1]} : vector<20x16xf32> to vector<16x16xf32>
    %cst_21 = arith.constant 2.000000e-01 : f32
    %75 = vector.broadcast %cst_21 : f32 to vector<16x16xf32>
    %76 = arith.mulf %75, %74 : vector<16x16xf32>
    %77 = vector.extract_strided_slice %73 {offsets = [1, 0], sizes = [16, 16], strides = [1, 1]} : vector<20x16xf32> to vector<16x16xf32>
    %cst_22 = arith.constant 1.000000e+00 : f32
    %78 = vector.broadcast %cst_22 : f32 to vector<16x16xf32>
    %79 = arith.mulf %78, %77 : vector<16x16xf32>
    %80 = arith.addf %76, %79 : vector<16x16xf32>
    %81 = vector.extract_strided_slice %73 {offsets = [2, 0], sizes = [16, 16], strides = [1, 1]} : vector<20x16xf32> to vector<16x16xf32>
    %cst_23 = arith.constant 1.600000e+00 : f32
    %82 = vector.broadcast %cst_23 : f32 to vector<16x16xf32>
    %83 = arith.mulf %82, %81 : vector<16x16xf32>
    %84 = arith.addf %80, %83 : vector<16x16xf32>
    %85 = vector.extract_strided_slice %73 {offsets = [3, 0], sizes = [16, 16], strides = [1, 1]} : vector<20x16xf32> to vector<16x16xf32>
    %cst_24 = arith.constant 1.000000e+00 : f32
    %86 = vector.broadcast %cst_24 : f32 to vector<16x16xf32>
    %87 = arith.mulf %86, %85 : vector<16x16xf32>
    %88 = arith.addf %84, %87 : vector<16x16xf32>
    %89 = vector.extract_strided_slice %73 {offsets = [4, 0], sizes = [16, 16], strides = [1, 1]} : vector<20x16xf32> to vector<16x16xf32>
    %cst_25 = arith.constant 2.000000e-01 : f32
    %90 = vector.broadcast %cst_25 : f32 to vector<16x16xf32>
    %91 = arith.mulf %90, %89 : vector<16x16xf32>
    %92 = arith.addf %88, %91 : vector<16x16xf32>
    %cst_26 = arith.constant dense<0.000000e+00> : vector<16x16xf32>
    %93 = tpu.matmul %92, %0, %cst_26 {dimension_numbers = #tpu.dot_dimension_numbers<[1], [0], [0], [1], [0, 0, 1, 1], [], []>, precision = #tpu.contract_precision<fp32>} : vector<16x16xf32>, vector<16x16xf32>, vector<16x16xf32> -> vector<16x16xf32>
    %cst_27 = arith.constant 0.000000e+00 : f32
    %94 = vector.broadcast %cst_27 : f32 to vector<16x16xf32>
    %95 = arith.select %11, %93, %94 : vector<16x16xi1>, vector<16x16xf32>
    %96 = vector.extract_strided_slice %95 {offsets = [0, 0], sizes = [1, 16], strides = [1, 1]} : vector<16x16xf32> to vector<1x16xf32>
    %97 = vector.extract_strided_slice %95 {offsets = [0, 0], sizes = [1, 16], strides = [1, 1]} : vector<16x16xf32> to vector<1x16xf32>
    %98 = vector.extract_strided_slice %95 {offsets = [15, 0], sizes = [1, 16], strides = [1, 1]} : vector<16x16xf32> to vector<1x16xf32>
    %99 = vector.extract_strided_slice %95 {offsets = [15, 0], sizes = [1, 16], strides = [1, 1]} : vector<16x16xf32> to vector<1x16xf32>
    %100 = tpu.concatenate %96, %97, %95, %98, %99 in 0 : vector<1x16xf32>, vector<1x16xf32>, vector<16x16xf32>, vector<1x16xf32>, vector<1x16xf32> -> vector<20x16xf32>
    %101 = vector.extract_strided_slice %100 {offsets = [0, 0], sizes = [16, 16], strides = [1, 1]} : vector<20x16xf32> to vector<16x16xf32>
    %cst_28 = arith.constant 5.000000e-02 : f32
    %102 = vector.broadcast %cst_28 : f32 to vector<16x16xf32>
    %103 = arith.mulf %102, %101 : vector<16x16xf32>
    %104 = vector.extract_strided_slice %100 {offsets = [1, 0], sizes = [16, 16], strides = [1, 1]} : vector<20x16xf32> to vector<16x16xf32>
    %cst_29 = arith.constant 2.500000e-01 : f32
    %105 = vector.broadcast %cst_29 : f32 to vector<16x16xf32>
    %106 = arith.mulf %105, %104 : vector<16x16xf32>
    %107 = arith.addf %103, %106 : vector<16x16xf32>
    %108 = vector.extract_strided_slice %100 {offsets = [2, 0], sizes = [16, 16], strides = [1, 1]} : vector<20x16xf32> to vector<16x16xf32>
    %cst_30 = arith.constant 4.000000e-01 : f32
    %109 = vector.broadcast %cst_30 : f32 to vector<16x16xf32>
    %110 = arith.mulf %109, %108 : vector<16x16xf32>
    %111 = arith.addf %107, %110 : vector<16x16xf32>
    %112 = vector.extract_strided_slice %100 {offsets = [3, 0], sizes = [16, 16], strides = [1, 1]} : vector<20x16xf32> to vector<16x16xf32>
    %cst_31 = arith.constant 2.500000e-01 : f32
    %113 = vector.broadcast %cst_31 : f32 to vector<16x16xf32>
    %114 = arith.mulf %113, %112 : vector<16x16xf32>
    %115 = arith.addf %111, %114 : vector<16x16xf32>
    %116 = vector.extract_strided_slice %100 {offsets = [4, 0], sizes = [16, 16], strides = [1, 1]} : vector<20x16xf32> to vector<16x16xf32>
    %cst_32 = arith.constant 5.000000e-02 : f32
    %117 = vector.broadcast %cst_32 : f32 to vector<16x16xf32>
    %118 = arith.mulf %117, %116 : vector<16x16xf32>
    %119 = arith.addf %115, %118 : vector<16x16xf32>
    %cst_33 = arith.constant dense<0.000000e+00> : vector<16x16xf32>
    %120 = tpu.matmul %119, %0, %cst_33 {dimension_numbers = #tpu.dot_dimension_numbers<[1], [0], [0], [1], [0, 0, 1, 1], [], []>, precision = #tpu.contract_precision<fp32>} : vector<16x16xf32>, vector<16x16xf32>, vector<16x16xf32> -> vector<16x16xf32>
    %121 = arith.subf %68, %120 : vector<16x16xf32>
    %122 = arith.subf %66, %121 : vector<16x16xf32>
    %123 = arith.mulf %122, %122 : vector<16x16xf32>
    %cst_34 = arith.constant 9.99999997E-7 : f32
    %124 = vector.broadcast %cst_34 : f32 to vector<16x16xf32>
    %125 = arith.addf %123, %124 : vector<16x16xf32>
    %126 = math.sqrt %125 : vector<16x16xf32>
    %127 = vector.shape_cast %126 : vector<16x16xf32> to vector<1x16x16xf32>
    %cst_35 = arith.constant dense<0.000000e+00> : vector<1xf32>
    %128 = vector.multi_reduction <add>, %127, %cst_35 [1, 2] : vector<1x16x16xf32> to vector<1xf32>
    %129 = vector.shape_cast %128 : vector<1xf32> to vector<1x1x1xf32>
    %130 = vector.extract %129[0, 0, 0] : f32 from vector<1x1x1xf32>
    %cst_36 = arith.constant 0.000000e+00 : f32
    %131 = arith.addf %cst_36, %130 : f32
    %c1 = arith.constant 1 : index
    %c0_37 = arith.constant 0 : index
    %c0_38 = arith.constant 0 : index
    %132 = vector.load %arg1[%c1, %c0_37, %c0_38] : memref<6x16x16xf32, #tpu.memory_space<vmem>>, vector<1x16x16xf32>
    %133 = vector.shape_cast %132 : vector<1x16x16xf32> to vector<16x16xf32>
    %134 = vector.extract_strided_slice %133 {offsets = [0, 0], sizes = [1, 16], strides = [1, 1]} : vector<16x16xf32> to vector<1x16xf32>
    %135 = vector.extract_strided_slice %133 {offsets = [0, 0], sizes = [1, 16], strides = [1, 1]} : vector<16x16xf32> to vector<1x16xf32>
    %136 = vector.extract_strided_slice %133 {offsets = [15, 0], sizes = [1, 16], strides = [1, 1]} : vector<16x16xf32> to vector<1x16xf32>
    %137 = vector.extract_strided_slice %133 {offsets = [15, 0], sizes = [1, 16], strides = [1, 1]} : vector<16x16xf32> to vector<1x16xf32>
    %138 = tpu.concatenate %134, %135, %133, %136, %137 in 0 : vector<1x16xf32>, vector<1x16xf32>, vector<16x16xf32>, vector<1x16xf32>, vector<1x16xf32> -> vector<20x16xf32>
    %139 = vector.extract_strided_slice %138 {offsets = [0, 0], sizes = [16, 16], strides = [1, 1]} : vector<20x16xf32> to vector<16x16xf32>
    %cst_39 = arith.constant 2.000000e-01 : f32
    %140 = vector.broadcast %cst_39 : f32 to vector<16x16xf32>
    %141 = arith.mulf %140, %139 : vector<16x16xf32>
    %142 = vector.extract_strided_slice %138 {offsets = [1, 0], sizes = [16, 16], strides = [1, 1]} : vector<20x16xf32> to vector<16x16xf32>
    %cst_40 = arith.constant 1.000000e+00 : f32
    %143 = vector.broadcast %cst_40 : f32 to vector<16x16xf32>
    %144 = arith.mulf %143, %142 : vector<16x16xf32>
    %145 = arith.addf %141, %144 : vector<16x16xf32>
    %146 = vector.extract_strided_slice %138 {offsets = [2, 0], sizes = [16, 16], strides = [1, 1]} : vector<20x16xf32> to vector<16x16xf32>
    %cst_41 = arith.constant 1.600000e+00 : f32
    %147 = vector.broadcast %cst_41 : f32 to vector<16x16xf32>
    %148 = arith.mulf %147, %146 : vector<16x16xf32>
    %149 = arith.addf %145, %148 : vector<16x16xf32>
    %150 = vector.extract_strided_slice %138 {offsets = [3, 0], sizes = [16, 16], strides = [1, 1]} : vector<20x16xf32> to vector<16x16xf32>
    %cst_42 = arith.constant 1.000000e+00 : f32
    %151 = vector.broadcast %cst_42 : f32 to vector<16x16xf32>
    %152 = arith.mulf %151, %150 : vector<16x16xf32>
    %153 = arith.addf %149, %152 : vector<16x16xf32>
    %154 = vector.extract_strided_slice %138 {offsets = [4, 0], sizes = [16, 16], strides = [1, 1]} : vector<20x16xf32> to vector<16x16xf32>
    %cst_43 = arith.constant 2.000000e-01 : f32
    %155 = vector.broadcast %cst_43 : f32 to vector<16x16xf32>
    %156 = arith.mulf %155, %154 : vector<16x16xf32>
    %157 = arith.addf %153, %156 : vector<16x16xf32>
    %cst_44 = arith.constant dense<0.000000e+00> : vector<16x16xf32>
    %158 = tpu.matmul %157, %0, %cst_44 {dimension_numbers = #tpu.dot_dimension_numbers<[1], [0], [0], [1], [0, 0, 1, 1], [], []>, precision = #tpu.contract_precision<fp32>} : vector<16x16xf32>, vector<16x16xf32>, vector<16x16xf32> -> vector<16x16xf32>
    %cst_45 = arith.constant 0.000000e+00 : f32
    %159 = vector.broadcast %cst_45 : f32 to vector<16x16xf32>
    %160 = arith.select %11, %158, %159 : vector<16x16xi1>, vector<16x16xf32>
    %161 = vector.extract_strided_slice %160 {offsets = [0, 0], sizes = [1, 16], strides = [1, 1]} : vector<16x16xf32> to vector<1x16xf32>
    %162 = vector.extract_strided_slice %160 {offsets = [0, 0], sizes = [1, 16], strides = [1, 1]} : vector<16x16xf32> to vector<1x16xf32>
    %163 = vector.extract_strided_slice %160 {offsets = [15, 0], sizes = [1, 16], strides = [1, 1]} : vector<16x16xf32> to vector<1x16xf32>
    %164 = vector.extract_strided_slice %160 {offsets = [15, 0], sizes = [1, 16], strides = [1, 1]} : vector<16x16xf32> to vector<1x16xf32>
    %165 = tpu.concatenate %161, %162, %160, %163, %164 in 0 : vector<1x16xf32>, vector<1x16xf32>, vector<16x16xf32>, vector<1x16xf32>, vector<1x16xf32> -> vector<20x16xf32>
    %166 = vector.extract_strided_slice %165 {offsets = [0, 0], sizes = [16, 16], strides = [1, 1]} : vector<20x16xf32> to vector<16x16xf32>
    %cst_46 = arith.constant 5.000000e-02 : f32
    %167 = vector.broadcast %cst_46 : f32 to vector<16x16xf32>
    %168 = arith.mulf %167, %166 : vector<16x16xf32>
    %169 = vector.extract_strided_slice %165 {offsets = [1, 0], sizes = [16, 16], strides = [1, 1]} : vector<20x16xf32> to vector<16x16xf32>
    %cst_47 = arith.constant 2.500000e-01 : f32
    %170 = vector.broadcast %cst_47 : f32 to vector<16x16xf32>
    %171 = arith.mulf %170, %169 : vector<16x16xf32>
    %172 = arith.addf %168, %171 : vector<16x16xf32>
    %173 = vector.extract_strided_slice %165 {offsets = [2, 0], sizes = [16, 16], strides = [1, 1]} : vector<20x16xf32> to vector<16x16xf32>
    %cst_48 = arith.constant 4.000000e-01 : f32
    %174 = vector.broadcast %cst_48 : f32 to vector<16x16xf32>
    %175 = arith.mulf %174, %173 : vector<16x16xf32>
    %176 = arith.addf %172, %175 : vector<16x16xf32>
    %177 = vector.extract_strided_slice %165 {offsets = [3, 0], sizes = [16, 16], strides = [1, 1]} : vector<20x16xf32> to vector<16x16xf32>
    %cst_49 = arith.constant 2.500000e-01 : f32
    %178 = vector.broadcast %cst_49 : f32 to vector<16x16xf32>
    %179 = arith.mulf %178, %177 : vector<16x16xf32>
    %180 = arith.addf %176, %179 : vector<16x16xf32>
    %181 = vector.extract_strided_slice %165 {offsets = [4, 0], sizes = [16, 16], strides = [1, 1]} : vector<20x16xf32> to vector<16x16xf32>
    %cst_50 = arith.constant 5.000000e-02 : f32
    %182 = vector.broadcast %cst_50 : f32 to vector<16x16xf32>
    %183 = arith.mulf %182, %181 : vector<16x16xf32>
    %184 = arith.addf %180, %183 : vector<16x16xf32>
    %cst_51 = arith.constant dense<0.000000e+00> : vector<16x16xf32>
    %185 = tpu.matmul %184, %0, %cst_51 {dimension_numbers = #tpu.dot_dimension_numbers<[1], [0], [0], [1], [0, 0, 1, 1], [], []>, precision = #tpu.contract_precision<fp32>} : vector<16x16xf32>, vector<16x16xf32>, vector<16x16xf32> -> vector<16x16xf32>
    %186 = arith.subf %133, %185 : vector<16x16xf32>
    %c1_52 = arith.constant 1 : index
    %c0_53 = arith.constant 0 : index
    %c0_54 = arith.constant 0 : index
    %187 = vector.load %arg2[%c1_52, %c0_53, %c0_54] : memref<6x16x16xf32, #tpu.memory_space<vmem>>, vector<1x16x16xf32>
    %188 = vector.shape_cast %187 : vector<1x16x16xf32> to vector<16x16xf32>
    %189 = vector.extract_strided_slice %188 {offsets = [0, 0], sizes = [1, 16], strides = [1, 1]} : vector<16x16xf32> to vector<1x16xf32>
    %190 = vector.extract_strided_slice %188 {offsets = [0, 0], sizes = [1, 16], strides = [1, 1]} : vector<16x16xf32> to vector<1x16xf32>
    %191 = vector.extract_strided_slice %188 {offsets = [15, 0], sizes = [1, 16], strides = [1, 1]} : vector<16x16xf32> to vector<1x16xf32>
    %192 = vector.extract_strided_slice %188 {offsets = [15, 0], sizes = [1, 16], strides = [1, 1]} : vector<16x16xf32> to vector<1x16xf32>
    %193 = tpu.concatenate %189, %190, %188, %191, %192 in 0 : vector<1x16xf32>, vector<1x16xf32>, vector<16x16xf32>, vector<1x16xf32>, vector<1x16xf32> -> vector<20x16xf32>
    %194 = vector.extract_strided_slice %193 {offsets = [0, 0], sizes = [16, 16], strides = [1, 1]} : vector<20x16xf32> to vector<16x16xf32>
    %cst_55 = arith.constant 2.000000e-01 : f32
    %195 = vector.broadcast %cst_55 : f32 to vector<16x16xf32>
    %196 = arith.mulf %195, %194 : vector<16x16xf32>
    %197 = vector.extract_strided_slice %193 {offsets = [1, 0], sizes = [16, 16], strides = [1, 1]} : vector<20x16xf32> to vector<16x16xf32>
    %cst_56 = arith.constant 1.000000e+00 : f32
    %198 = vector.broadcast %cst_56 : f32 to vector<16x16xf32>
    %199 = arith.mulf %198, %197 : vector<16x16xf32>
    %200 = arith.addf %196, %199 : vector<16x16xf32>
    %201 = vector.extract_strided_slice %193 {offsets = [2, 0], sizes = [16, 16], strides = [1, 1]} : vector<20x16xf32> to vector<16x16xf32>
    %cst_57 = arith.constant 1.600000e+00 : f32
    %202 = vector.broadcast %cst_57 : f32 to vector<16x16xf32>
    %203 = arith.mulf %202, %201 : vector<16x16xf32>
    %204 = arith.addf %200, %203 : vector<16x16xf32>
    %205 = vector.extract_strided_slice %193 {offsets = [3, 0], sizes = [16, 16], strides = [1, 1]} : vector<20x16xf32> to vector<16x16xf32>
    %cst_58 = arith.constant 1.000000e+00 : f32
    %206 = vector.broadcast %cst_58 : f32 to vector<16x16xf32>
    %207 = arith.mulf %206, %205 : vector<16x16xf32>
    %208 = arith.addf %204, %207 : vector<16x16xf32>
    %209 = vector.extract_strided_slice %193 {offsets = [4, 0], sizes = [16, 16], strides = [1, 1]} : vector<20x16xf32> to vector<16x16xf32>
    %cst_59 = arith.constant 2.000000e-01 : f32
    %210 = vector.broadcast %cst_59 : f32 to vector<16x16xf32>
    %211 = arith.mulf %210, %209 : vector<16x16xf32>
    %212 = arith.addf %208, %211 : vector<16x16xf32>
    %cst_60 = arith.constant dense<0.000000e+00> : vector<16x16xf32>
    %213 = tpu.matmul %212, %0, %cst_60 {dimension_numbers = #tpu.dot_dimension_numbers<[1], [0], [0], [1], [0, 0, 1, 1], [], []>, precision = #tpu.contract_precision<fp32>} : vector<16x16xf32>, vector<16x16xf32>, vector<16x16xf32> -> vector<16x16xf32>
    %cst_61 = arith.constant 0.000000e+00 : f32
    %214 = vector.broadcast %cst_61 : f32 to vector<16x16xf32>
    %215 = arith.select %11, %213, %214 : vector<16x16xi1>, vector<16x16xf32>
    %216 = vector.extract_strided_slice %215 {offsets = [0, 0], sizes = [1, 16], strides = [1, 1]} : vector<16x16xf32> to vector<1x16xf32>
    %217 = vector.extract_strided_slice %215 {offsets = [0, 0], sizes = [1, 16], strides = [1, 1]} : vector<16x16xf32> to vector<1x16xf32>
    %218 = vector.extract_strided_slice %215 {offsets = [15, 0], sizes = [1, 16], strides = [1, 1]} : vector<16x16xf32> to vector<1x16xf32>
    %219 = vector.extract_strided_slice %215 {offsets = [15, 0], sizes = [1, 16], strides = [1, 1]} : vector<16x16xf32> to vector<1x16xf32>
    %220 = tpu.concatenate %216, %217, %215, %218, %219 in 0 : vector<1x16xf32>, vector<1x16xf32>, vector<16x16xf32>, vector<1x16xf32>, vector<1x16xf32> -> vector<20x16xf32>
    %221 = vector.extract_strided_slice %220 {offsets = [0, 0], sizes = [16, 16], strides = [1, 1]} : vector<20x16xf32> to vector<16x16xf32>
    %cst_62 = arith.constant 5.000000e-02 : f32
    %222 = vector.broadcast %cst_62 : f32 to vector<16x16xf32>
    %223 = arith.mulf %222, %221 : vector<16x16xf32>
    %224 = vector.extract_strided_slice %220 {offsets = [1, 0], sizes = [16, 16], strides = [1, 1]} : vector<20x16xf32> to vector<16x16xf32>
    %cst_63 = arith.constant 2.500000e-01 : f32
    %225 = vector.broadcast %cst_63 : f32 to vector<16x16xf32>
    %226 = arith.mulf %225, %224 : vector<16x16xf32>
    %227 = arith.addf %223, %226 : vector<16x16xf32>
    %228 = vector.extract_strided_slice %220 {offsets = [2, 0], sizes = [16, 16], strides = [1, 1]} : vector<20x16xf32> to vector<16x16xf32>
    %cst_64 = arith.constant 4.000000e-01 : f32
    %229 = vector.broadcast %cst_64 : f32 to vector<16x16xf32>
    %230 = arith.mulf %229, %228 : vector<16x16xf32>
    %231 = arith.addf %227, %230 : vector<16x16xf32>
    %232 = vector.extract_strided_slice %220 {offsets = [3, 0], sizes = [16, 16], strides = [1, 1]} : vector<20x16xf32> to vector<16x16xf32>
    %cst_65 = arith.constant 2.500000e-01 : f32
    %233 = vector.broadcast %cst_65 : f32 to vector<16x16xf32>
    %234 = arith.mulf %233, %232 : vector<16x16xf32>
    %235 = arith.addf %231, %234 : vector<16x16xf32>
    %236 = vector.extract_strided_slice %220 {offsets = [4, 0], sizes = [16, 16], strides = [1, 1]} : vector<20x16xf32> to vector<16x16xf32>
    %cst_66 = arith.constant 5.000000e-02 : f32
    %237 = vector.broadcast %cst_66 : f32 to vector<16x16xf32>
    %238 = arith.mulf %237, %236 : vector<16x16xf32>
    %239 = arith.addf %235, %238 : vector<16x16xf32>
    %cst_67 = arith.constant dense<0.000000e+00> : vector<16x16xf32>
    %240 = tpu.matmul %239, %0, %cst_67 {dimension_numbers = #tpu.dot_dimension_numbers<[1], [0], [0], [1], [0, 0, 1, 1], [], []>, precision = #tpu.contract_precision<fp32>} : vector<16x16xf32>, vector<16x16xf32>, vector<16x16xf32> -> vector<16x16xf32>
    %241 = arith.subf %188, %240 : vector<16x16xf32>
    %242 = arith.subf %186, %241 : vector<16x16xf32>
    %243 = arith.mulf %242, %242 : vector<16x16xf32>
    %cst_68 = arith.constant 9.99999997E-7 : f32
    %244 = vector.broadcast %cst_68 : f32 to vector<16x16xf32>
    %245 = arith.addf %243, %244 : vector<16x16xf32>
    %246 = math.sqrt %245 : vector<16x16xf32>
    %247 = vector.shape_cast %246 : vector<16x16xf32> to vector<1x16x16xf32>
    %cst_69 = arith.constant dense<0.000000e+00> : vector<1xf32>
    %248 = vector.multi_reduction <add>, %247, %cst_69 [1, 2] : vector<1x16x16xf32> to vector<1xf32>
    %249 = vector.shape_cast %248 : vector<1xf32> to vector<1x1x1xf32>
    %250 = vector.extract %249[0, 0, 0] : f32 from vector<1x1x1xf32>
    %251 = arith.addf %131, %250 : f32
    %c2 = arith.constant 2 : index
    %c0_70 = arith.constant 0 : index
    %c0_71 = arith.constant 0 : index
    %252 = vector.load %arg1[%c2, %c0_70, %c0_71] : memref<6x16x16xf32, #tpu.memory_space<vmem>>, vector<1x16x16xf32>
    %253 = vector.shape_cast %252 : vector<1x16x16xf32> to vector<16x16xf32>
    %254 = vector.extract_strided_slice %253 {offsets = [0, 0], sizes = [1, 16], strides = [1, 1]} : vector<16x16xf32> to vector<1x16xf32>
    %255 = vector.extract_strided_slice %253 {offsets = [0, 0], sizes = [1, 16], strides = [1, 1]} : vector<16x16xf32> to vector<1x16xf32>
    %256 = vector.extract_strided_slice %253 {offsets = [15, 0], sizes = [1, 16], strides = [1, 1]} : vector<16x16xf32> to vector<1x16xf32>
    %257 = vector.extract_strided_slice %253 {offsets = [15, 0], sizes = [1, 16], strides = [1, 1]} : vector<16x16xf32> to vector<1x16xf32>
    %258 = tpu.concatenate %254, %255, %253, %256, %257 in 0 : vector<1x16xf32>, vector<1x16xf32>, vector<16x16xf32>, vector<1x16xf32>, vector<1x16xf32> -> vector<20x16xf32>
    %259 = vector.extract_strided_slice %258 {offsets = [0, 0], sizes = [16, 16], strides = [1, 1]} : vector<20x16xf32> to vector<16x16xf32>
    %cst_72 = arith.constant 2.000000e-01 : f32
    %260 = vector.broadcast %cst_72 : f32 to vector<16x16xf32>
    %261 = arith.mulf %260, %259 : vector<16x16xf32>
    %262 = vector.extract_strided_slice %258 {offsets = [1, 0], sizes = [16, 16], strides = [1, 1]} : vector<20x16xf32> to vector<16x16xf32>
    %cst_73 = arith.constant 1.000000e+00 : f32
    %263 = vector.broadcast %cst_73 : f32 to vector<16x16xf32>
    %264 = arith.mulf %263, %262 : vector<16x16xf32>
    %265 = arith.addf %261, %264 : vector<16x16xf32>
    %266 = vector.extract_strided_slice %258 {offsets = [2, 0], sizes = [16, 16], strides = [1, 1]} : vector<20x16xf32> to vector<16x16xf32>
    %cst_74 = arith.constant 1.600000e+00 : f32
    %267 = vector.broadcast %cst_74 : f32 to vector<16x16xf32>
    %268 = arith.mulf %267, %266 : vector<16x16xf32>
    %269 = arith.addf %265, %268 : vector<16x16xf32>
    %270 = vector.extract_strided_slice %258 {offsets = [3, 0], sizes = [16, 16], strides = [1, 1]} : vector<20x16xf32> to vector<16x16xf32>
    %cst_75 = arith.constant 1.000000e+00 : f32
    %271 = vector.broadcast %cst_75 : f32 to vector<16x16xf32>
    %272 = arith.mulf %271, %270 : vector<16x16xf32>
    %273 = arith.addf %269, %272 : vector<16x16xf32>
    %274 = vector.extract_strided_slice %258 {offsets = [4, 0], sizes = [16, 16], strides = [1, 1]} : vector<20x16xf32> to vector<16x16xf32>
    %cst_76 = arith.constant 2.000000e-01 : f32
    %275 = vector.broadcast %cst_76 : f32 to vector<16x16xf32>
    %276 = arith.mulf %275, %274 : vector<16x16xf32>
    %277 = arith.addf %273, %276 : vector<16x16xf32>
    %cst_77 = arith.constant dense<0.000000e+00> : vector<16x16xf32>
    %278 = tpu.matmul %277, %0, %cst_77 {dimension_numbers = #tpu.dot_dimension_numbers<[1], [0], [0], [1], [0, 0, 1, 1], [], []>, precision = #tpu.contract_precision<fp32>} : vector<16x16xf32>, vector<16x16xf32>, vector<16x16xf32> -> vector<16x16xf32>
    %cst_78 = arith.constant 0.000000e+00 : f32
    %279 = vector.broadcast %cst_78 : f32 to vector<16x16xf32>
    %280 = arith.select %11, %278, %279 : vector<16x16xi1>, vector<16x16xf32>
    %281 = vector.extract_strided_slice %280 {offsets = [0, 0], sizes = [1, 16], strides = [1, 1]} : vector<16x16xf32> to vector<1x16xf32>
    %282 = vector.extract_strided_slice %280 {offsets = [0, 0], sizes = [1, 16], strides = [1, 1]} : vector<16x16xf32> to vector<1x16xf32>
    %283 = vector.extract_strided_slice %280 {offsets = [15, 0], sizes = [1, 16], strides = [1, 1]} : vector<16x16xf32> to vector<1x16xf32>
    %284 = vector.extract_strided_slice %280 {offsets = [15, 0], sizes = [1, 16], strides = [1, 1]} : vector<16x16xf32> to vector<1x16xf32>
    %285 = tpu.concatenate %281, %282, %280, %283, %284 in 0 : vector<1x16xf32>, vector<1x16xf32>, vector<16x16xf32>, vector<1x16xf32>, vector<1x16xf32> -> vector<20x16xf32>
    %286 = vector.extract_strided_slice %285 {offsets = [0, 0], sizes = [16, 16], strides = [1, 1]} : vector<20x16xf32> to vector<16x16xf32>
    %cst_79 = arith.constant 5.000000e-02 : f32
    %287 = vector.broadcast %cst_79 : f32 to vector<16x16xf32>
    %288 = arith.mulf %287, %286 : vector<16x16xf32>
    %289 = vector.extract_strided_slice %285 {offsets = [1, 0], sizes = [16, 16], strides = [1, 1]} : vector<20x16xf32> to vector<16x16xf32>
    %cst_80 = arith.constant 2.500000e-01 : f32
    %290 = vector.broadcast %cst_80 : f32 to vector<16x16xf32>
    %291 = arith.mulf %290, %289 : vector<16x16xf32>
    %292 = arith.addf %288, %291 : vector<16x16xf32>
    %293 = vector.extract_strided_slice %285 {offsets = [2, 0], sizes = [16, 16], strides = [1, 1]} : vector<20x16xf32> to vector<16x16xf32>
    %cst_81 = arith.constant 4.000000e-01 : f32
    %294 = vector.broadcast %cst_81 : f32 to vector<16x16xf32>
    %295 = arith.mulf %294, %293 : vector<16x16xf32>
    %296 = arith.addf %292, %295 : vector<16x16xf32>
    %297 = vector.extract_strided_slice %285 {offsets = [3, 0], sizes = [16, 16], strides = [1, 1]} : vector<20x16xf32> to vector<16x16xf32>
    %cst_82 = arith.constant 2.500000e-01 : f32
    %298 = vector.broadcast %cst_82 : f32 to vector<16x16xf32>
    %299 = arith.mulf %298, %297 : vector<16x16xf32>
    %300 = arith.addf %296, %299 : vector<16x16xf32>
    %301 = vector.extract_strided_slice %285 {offsets = [4, 0], sizes = [16, 16], strides = [1, 1]} : vector<20x16xf32> to vector<16x16xf32>
    %cst_83 = arith.constant 5.000000e-02 : f32
    %302 = vector.broadcast %cst_83 : f32 to vector<16x16xf32>
    %303 = arith.mulf %302, %301 : vector<16x16xf32>
    %304 = arith.addf %300, %303 : vector<16x16xf32>
    %cst_84 = arith.constant dense<0.000000e+00> : vector<16x16xf32>
    %305 = tpu.matmul %304, %0, %cst_84 {dimension_numbers = #tpu.dot_dimension_numbers<[1], [0], [0], [1], [0, 0, 1, 1], [], []>, precision = #tpu.contract_precision<fp32>} : vector<16x16xf32>, vector<16x16xf32>, vector<16x16xf32> -> vector<16x16xf32>
    %306 = arith.subf %253, %305 : vector<16x16xf32>
    %c2_85 = arith.constant 2 : index
    %c0_86 = arith.constant 0 : index
    %c0_87 = arith.constant 0 : index
    %307 = vector.load %arg2[%c2_85, %c0_86, %c0_87] : memref<6x16x16xf32, #tpu.memory_space<vmem>>, vector<1x16x16xf32>
    %308 = vector.shape_cast %307 : vector<1x16x16xf32> to vector<16x16xf32>
    %309 = vector.extract_strided_slice %308 {offsets = [0, 0], sizes = [1, 16], strides = [1, 1]} : vector<16x16xf32> to vector<1x16xf32>
    %310 = vector.extract_strided_slice %308 {offsets = [0, 0], sizes = [1, 16], strides = [1, 1]} : vector<16x16xf32> to vector<1x16xf32>
    %311 = vector.extract_strided_slice %308 {offsets = [15, 0], sizes = [1, 16], strides = [1, 1]} : vector<16x16xf32> to vector<1x16xf32>
    %312 = vector.extract_strided_slice %308 {offsets = [15, 0], sizes = [1, 16], strides = [1, 1]} : vector<16x16xf32> to vector<1x16xf32>
    %313 = tpu.concatenate %309, %310, %308, %311, %312 in 0 : vector<1x16xf32>, vector<1x16xf32>, vector<16x16xf32>, vector<1x16xf32>, vector<1x16xf32> -> vector<20x16xf32>
    %314 = vector.extract_strided_slice %313 {offsets = [0, 0], sizes = [16, 16], strides = [1, 1]} : vector<20x16xf32> to vector<16x16xf32>
    %cst_88 = arith.constant 2.000000e-01 : f32
    %315 = vector.broadcast %cst_88 : f32 to vector<16x16xf32>
    %316 = arith.mulf %315, %314 : vector<16x16xf32>
    %317 = vector.extract_strided_slice %313 {offsets = [1, 0], sizes = [16, 16], strides = [1, 1]} : vector<20x16xf32> to vector<16x16xf32>
    %cst_89 = arith.constant 1.000000e+00 : f32
    %318 = vector.broadcast %cst_89 : f32 to vector<16x16xf32>
    %319 = arith.mulf %318, %317 : vector<16x16xf32>
    %320 = arith.addf %316, %319 : vector<16x16xf32>
    %321 = vector.extract_strided_slice %313 {offsets = [2, 0], sizes = [16, 16], strides = [1, 1]} : vector<20x16xf32> to vector<16x16xf32>
    %cst_90 = arith.constant 1.600000e+00 : f32
    %322 = vector.broadcast %cst_90 : f32 to vector<16x16xf32>
    %323 = arith.mulf %322, %321 : vector<16x16xf32>
    %324 = arith.addf %320, %323 : vector<16x16xf32>
    %325 = vector.extract_strided_slice %313 {offsets = [3, 0], sizes = [16, 16], strides = [1, 1]} : vector<20x16xf32> to vector<16x16xf32>
    %cst_91 = arith.constant 1.000000e+00 : f32
    %326 = vector.broadcast %cst_91 : f32 to vector<16x16xf32>
    %327 = arith.mulf %326, %325 : vector<16x16xf32>
    %328 = arith.addf %324, %327 : vector<16x16xf32>
    %329 = vector.extract_strided_slice %313 {offsets = [4, 0], sizes = [16, 16], strides = [1, 1]} : vector<20x16xf32> to vector<16x16xf32>
    %cst_92 = arith.constant 2.000000e-01 : f32
    %330 = vector.broadcast %cst_92 : f32 to vector<16x16xf32>
    %331 = arith.mulf %330, %329 : vector<16x16xf32>
    %332 = arith.addf %328, %331 : vector<16x16xf32>
    %cst_93 = arith.constant dense<0.000000e+00> : vector<16x16xf32>
    %333 = tpu.matmul %332, %0, %cst_93 {dimension_numbers = #tpu.dot_dimension_numbers<[1], [0], [0], [1], [0, 0, 1, 1], [], []>, precision = #tpu.contract_precision<fp32>} : vector<16x16xf32>, vector<16x16xf32>, vector<16x16xf32> -> vector<16x16xf32>
    %cst_94 = arith.constant 0.000000e+00 : f32
    %334 = vector.broadcast %cst_94 : f32 to vector<16x16xf32>
    %335 = arith.select %11, %333, %334 : vector<16x16xi1>, vector<16x16xf32>
    %336 = vector.extract_strided_slice %335 {offsets = [0, 0], sizes = [1, 16], strides = [1, 1]} : vector<16x16xf32> to vector<1x16xf32>
    %337 = vector.extract_strided_slice %335 {offsets = [0, 0], sizes = [1, 16], strides = [1, 1]} : vector<16x16xf32> to vector<1x16xf32>
    %338 = vector.extract_strided_slice %335 {offsets = [15, 0], sizes = [1, 16], strides = [1, 1]} : vector<16x16xf32> to vector<1x16xf32>
    %339 = vector.extract_strided_slice %335 {offsets = [15, 0], sizes = [1, 16], strides = [1, 1]} : vector<16x16xf32> to vector<1x16xf32>
    %340 = tpu.concatenate %336, %337, %335, %338, %339 in 0 : vector<1x16xf32>, vector<1x16xf32>, vector<16x16xf32>, vector<1x16xf32>, vector<1x16xf32> -> vector<20x16xf32>
    %341 = vector.extract_strided_slice %340 {offsets = [0, 0], sizes = [16, 16], strides = [1, 1]} : vector<20x16xf32> to vector<16x16xf32>
    %cst_95 = arith.constant 5.000000e-02 : f32
    %342 = vector.broadcast %cst_95 : f32 to vector<16x16xf32>
    %343 = arith.mulf %342, %341 : vector<16x16xf32>
    %344 = vector.extract_strided_slice %340 {offsets = [1, 0], sizes = [16, 16], strides = [1, 1]} : vector<20x16xf32> to vector<16x16xf32>
    %cst_96 = arith.constant 2.500000e-01 : f32
    %345 = vector.broadcast %cst_96 : f32 to vector<16x16xf32>
    %346 = arith.mulf %345, %344 : vector<16x16xf32>
    %347 = arith.addf %343, %346 : vector<16x16xf32>
    %348 = vector.extract_strided_slice %340 {offsets = [2, 0], sizes = [16, 16], strides = [1, 1]} : vector<20x16xf32> to vector<16x16xf32>
    %cst_97 = arith.constant 4.000000e-01 : f32
    %349 = vector.broadcast %cst_97 : f32 to vector<16x16xf32>
    %350 = arith.mulf %349, %348 : vector<16x16xf32>
    %351 = arith.addf %347, %350 : vector<16x16xf32>
    %352 = vector.extract_strided_slice %340 {offsets = [3, 0], sizes = [16, 16], strides = [1, 1]} : vector<20x16xf32> to vector<16x16xf32>
    %cst_98 = arith.constant 2.500000e-01 : f32
    %353 = vector.broadcast %cst_98 : f32 to vector<16x16xf32>
    %354 = arith.mulf %353, %352 : vector<16x16xf32>
    %355 = arith.addf %351, %354 : vector<16x16xf32>
    %356 = vector.extract_strided_slice %340 {offsets = [4, 0], sizes = [16, 16], strides = [1, 1]} : vector<20x16xf32> to vector<16x16xf32>
    %cst_99 = arith.constant 5.000000e-02 : f32
    %357 = vector.broadcast %cst_99 : f32 to vector<16x16xf32>
    %358 = arith.mulf %357, %356 : vector<16x16xf32>
    %359 = arith.addf %355, %358 : vector<16x16xf32>
    %cst_100 = arith.constant dense<0.000000e+00> : vector<16x16xf32>
    %360 = tpu.matmul %359, %0, %cst_100 {dimension_numbers = #tpu.dot_dimension_numbers<[1], [0], [0], [1], [0, 0, 1, 1], [], []>, precision = #tpu.contract_precision<fp32>} : vector<16x16xf32>, vector<16x16xf32>, vector<16x16xf32> -> vector<16x16xf32>
    %361 = arith.subf %308, %360 : vector<16x16xf32>
    %362 = arith.subf %306, %361 : vector<16x16xf32>
    %363 = arith.mulf %362, %362 : vector<16x16xf32>
    %cst_101 = arith.constant 9.99999997E-7 : f32
    %364 = vector.broadcast %cst_101 : f32 to vector<16x16xf32>
    %365 = arith.addf %363, %364 : vector<16x16xf32>
    %366 = math.sqrt %365 : vector<16x16xf32>
    %367 = vector.shape_cast %366 : vector<16x16xf32> to vector<1x16x16xf32>
    %cst_102 = arith.constant dense<0.000000e+00> : vector<1xf32>
    %368 = vector.multi_reduction <add>, %367, %cst_102 [1, 2] : vector<1x16x16xf32> to vector<1xf32>
    %369 = vector.shape_cast %368 : vector<1xf32> to vector<1x1x1xf32>
    %370 = vector.extract %369[0, 0, 0] : f32 from vector<1x1x1xf32>
    %371 = arith.addf %251, %370 : f32
    %c3 = arith.constant 3 : index
    %c0_103 = arith.constant 0 : index
    %c0_104 = arith.constant 0 : index
    %372 = vector.load %arg1[%c3, %c0_103, %c0_104] : memref<6x16x16xf32, #tpu.memory_space<vmem>>, vector<1x16x16xf32>
    %373 = vector.shape_cast %372 : vector<1x16x16xf32> to vector<16x16xf32>
    %374 = vector.extract_strided_slice %373 {offsets = [0, 0], sizes = [1, 16], strides = [1, 1]} : vector<16x16xf32> to vector<1x16xf32>
    %375 = vector.extract_strided_slice %373 {offsets = [0, 0], sizes = [1, 16], strides = [1, 1]} : vector<16x16xf32> to vector<1x16xf32>
    %376 = vector.extract_strided_slice %373 {offsets = [15, 0], sizes = [1, 16], strides = [1, 1]} : vector<16x16xf32> to vector<1x16xf32>
    %377 = vector.extract_strided_slice %373 {offsets = [15, 0], sizes = [1, 16], strides = [1, 1]} : vector<16x16xf32> to vector<1x16xf32>
    %378 = tpu.concatenate %374, %375, %373, %376, %377 in 0 : vector<1x16xf32>, vector<1x16xf32>, vector<16x16xf32>, vector<1x16xf32>, vector<1x16xf32> -> vector<20x16xf32>
    %379 = vector.extract_strided_slice %378 {offsets = [0, 0], sizes = [16, 16], strides = [1, 1]} : vector<20x16xf32> to vector<16x16xf32>
    %cst_105 = arith.constant 2.000000e-01 : f32
    %380 = vector.broadcast %cst_105 : f32 to vector<16x16xf32>
    %381 = arith.mulf %380, %379 : vector<16x16xf32>
    %382 = vector.extract_strided_slice %378 {offsets = [1, 0], sizes = [16, 16], strides = [1, 1]} : vector<20x16xf32> to vector<16x16xf32>
    %cst_106 = arith.constant 1.000000e+00 : f32
    %383 = vector.broadcast %cst_106 : f32 to vector<16x16xf32>
    %384 = arith.mulf %383, %382 : vector<16x16xf32>
    %385 = arith.addf %381, %384 : vector<16x16xf32>
    %386 = vector.extract_strided_slice %378 {offsets = [2, 0], sizes = [16, 16], strides = [1, 1]} : vector<20x16xf32> to vector<16x16xf32>
    %cst_107 = arith.constant 1.600000e+00 : f32
    %387 = vector.broadcast %cst_107 : f32 to vector<16x16xf32>
    %388 = arith.mulf %387, %386 : vector<16x16xf32>
    %389 = arith.addf %385, %388 : vector<16x16xf32>
    %390 = vector.extract_strided_slice %378 {offsets = [3, 0], sizes = [16, 16], strides = [1, 1]} : vector<20x16xf32> to vector<16x16xf32>
    %cst_108 = arith.constant 1.000000e+00 : f32
    %391 = vector.broadcast %cst_108 : f32 to vector<16x16xf32>
    %392 = arith.mulf %391, %390 : vector<16x16xf32>
    %393 = arith.addf %389, %392 : vector<16x16xf32>
    %394 = vector.extract_strided_slice %378 {offsets = [4, 0], sizes = [16, 16], strides = [1, 1]} : vector<20x16xf32> to vector<16x16xf32>
    %cst_109 = arith.constant 2.000000e-01 : f32
    %395 = vector.broadcast %cst_109 : f32 to vector<16x16xf32>
    %396 = arith.mulf %395, %394 : vector<16x16xf32>
    %397 = arith.addf %393, %396 : vector<16x16xf32>
    %cst_110 = arith.constant dense<0.000000e+00> : vector<16x16xf32>
    %398 = tpu.matmul %397, %0, %cst_110 {dimension_numbers = #tpu.dot_dimension_numbers<[1], [0], [0], [1], [0, 0, 1, 1], [], []>, precision = #tpu.contract_precision<fp32>} : vector<16x16xf32>, vector<16x16xf32>, vector<16x16xf32> -> vector<16x16xf32>
    %cst_111 = arith.constant 0.000000e+00 : f32
    %399 = vector.broadcast %cst_111 : f32 to vector<16x16xf32>
    %400 = arith.select %11, %398, %399 : vector<16x16xi1>, vector<16x16xf32>
    %401 = vector.extract_strided_slice %400 {offsets = [0, 0], sizes = [1, 16], strides = [1, 1]} : vector<16x16xf32> to vector<1x16xf32>
    %402 = vector.extract_strided_slice %400 {offsets = [0, 0], sizes = [1, 16], strides = [1, 1]} : vector<16x16xf32> to vector<1x16xf32>
    %403 = vector.extract_strided_slice %400 {offsets = [15, 0], sizes = [1, 16], strides = [1, 1]} : vector<16x16xf32> to vector<1x16xf32>
    %404 = vector.extract_strided_slice %400 {offsets = [15, 0], sizes = [1, 16], strides = [1, 1]} : vector<16x16xf32> to vector<1x16xf32>
    %405 = tpu.concatenate %401, %402, %400, %403, %404 in 0 : vector<1x16xf32>, vector<1x16xf32>, vector<16x16xf32>, vector<1x16xf32>, vector<1x16xf32> -> vector<20x16xf32>
    %406 = vector.extract_strided_slice %405 {offsets = [0, 0], sizes = [16, 16], strides = [1, 1]} : vector<20x16xf32> to vector<16x16xf32>
    %cst_112 = arith.constant 5.000000e-02 : f32
    %407 = vector.broadcast %cst_112 : f32 to vector<16x16xf32>
    %408 = arith.mulf %407, %406 : vector<16x16xf32>
    %409 = vector.extract_strided_slice %405 {offsets = [1, 0], sizes = [16, 16], strides = [1, 1]} : vector<20x16xf32> to vector<16x16xf32>
    %cst_113 = arith.constant 2.500000e-01 : f32
    %410 = vector.broadcast %cst_113 : f32 to vector<16x16xf32>
    %411 = arith.mulf %410, %409 : vector<16x16xf32>
    %412 = arith.addf %408, %411 : vector<16x16xf32>
    %413 = vector.extract_strided_slice %405 {offsets = [2, 0], sizes = [16, 16], strides = [1, 1]} : vector<20x16xf32> to vector<16x16xf32>
    %cst_114 = arith.constant 4.000000e-01 : f32
    %414 = vector.broadcast %cst_114 : f32 to vector<16x16xf32>
    %415 = arith.mulf %414, %413 : vector<16x16xf32>
    %416 = arith.addf %412, %415 : vector<16x16xf32>
    %417 = vector.extract_strided_slice %405 {offsets = [3, 0], sizes = [16, 16], strides = [1, 1]} : vector<20x16xf32> to vector<16x16xf32>
    %cst_115 = arith.constant 2.500000e-01 : f32
    %418 = vector.broadcast %cst_115 : f32 to vector<16x16xf32>
    %419 = arith.mulf %418, %417 : vector<16x16xf32>
    %420 = arith.addf %416, %419 : vector<16x16xf32>
    %421 = vector.extract_strided_slice %405 {offsets = [4, 0], sizes = [16, 16], strides = [1, 1]} : vector<20x16xf32> to vector<16x16xf32>
    %cst_116 = arith.constant 5.000000e-02 : f32
    %422 = vector.broadcast %cst_116 : f32 to vector<16x16xf32>
    %423 = arith.mulf %422, %421 : vector<16x16xf32>
    %424 = arith.addf %420, %423 : vector<16x16xf32>
    %cst_117 = arith.constant dense<0.000000e+00> : vector<16x16xf32>
    %425 = tpu.matmul %424, %0, %cst_117 {dimension_numbers = #tpu.dot_dimension_numbers<[1], [0], [0], [1], [0, 0, 1, 1], [], []>, precision = #tpu.contract_precision<fp32>} : vector<16x16xf32>, vector<16x16xf32>, vector<16x16xf32> -> vector<16x16xf32>
    %426 = arith.subf %373, %425 : vector<16x16xf32>
    %c3_118 = arith.constant 3 : index
    %c0_119 = arith.constant 0 : index
    %c0_120 = arith.constant 0 : index
    %427 = vector.load %arg2[%c3_118, %c0_119, %c0_120] : memref<6x16x16xf32, #tpu.memory_space<vmem>>, vector<1x16x16xf32>
    %428 = vector.shape_cast %427 : vector<1x16x16xf32> to vector<16x16xf32>
    %429 = vector.extract_strided_slice %428 {offsets = [0, 0], sizes = [1, 16], strides = [1, 1]} : vector<16x16xf32> to vector<1x16xf32>
    %430 = vector.extract_strided_slice %428 {offsets = [0, 0], sizes = [1, 16], strides = [1, 1]} : vector<16x16xf32> to vector<1x16xf32>
    %431 = vector.extract_strided_slice %428 {offsets = [15, 0], sizes = [1, 16], strides = [1, 1]} : vector<16x16xf32> to vector<1x16xf32>
    %432 = vector.extract_strided_slice %428 {offsets = [15, 0], sizes = [1, 16], strides = [1, 1]} : vector<16x16xf32> to vector<1x16xf32>
    %433 = tpu.concatenate %429, %430, %428, %431, %432 in 0 : vector<1x16xf32>, vector<1x16xf32>, vector<16x16xf32>, vector<1x16xf32>, vector<1x16xf32> -> vector<20x16xf32>
    %434 = vector.extract_strided_slice %433 {offsets = [0, 0], sizes = [16, 16], strides = [1, 1]} : vector<20x16xf32> to vector<16x16xf32>
    %cst_121 = arith.constant 2.000000e-01 : f32
    %435 = vector.broadcast %cst_121 : f32 to vector<16x16xf32>
    %436 = arith.mulf %435, %434 : vector<16x16xf32>
    %437 = vector.extract_strided_slice %433 {offsets = [1, 0], sizes = [16, 16], strides = [1, 1]} : vector<20x16xf32> to vector<16x16xf32>
    %cst_122 = arith.constant 1.000000e+00 : f32
    %438 = vector.broadcast %cst_122 : f32 to vector<16x16xf32>
    %439 = arith.mulf %438, %437 : vector<16x16xf32>
    %440 = arith.addf %436, %439 : vector<16x16xf32>
    %441 = vector.extract_strided_slice %433 {offsets = [2, 0], sizes = [16, 16], strides = [1, 1]} : vector<20x16xf32> to vector<16x16xf32>
    %cst_123 = arith.constant 1.600000e+00 : f32
    %442 = vector.broadcast %cst_123 : f32 to vector<16x16xf32>
    %443 = arith.mulf %442, %441 : vector<16x16xf32>
    %444 = arith.addf %440, %443 : vector<16x16xf32>
    %445 = vector.extract_strided_slice %433 {offsets = [3, 0], sizes = [16, 16], strides = [1, 1]} : vector<20x16xf32> to vector<16x16xf32>
    %cst_124 = arith.constant 1.000000e+00 : f32
    %446 = vector.broadcast %cst_124 : f32 to vector<16x16xf32>
    %447 = arith.mulf %446, %445 : vector<16x16xf32>
    %448 = arith.addf %444, %447 : vector<16x16xf32>
    %449 = vector.extract_strided_slice %433 {offsets = [4, 0], sizes = [16, 16], strides = [1, 1]} : vector<20x16xf32> to vector<16x16xf32>
    %cst_125 = arith.constant 2.000000e-01 : f32
    %450 = vector.broadcast %cst_125 : f32 to vector<16x16xf32>
    %451 = arith.mulf %450, %449 : vector<16x16xf32>
    %452 = arith.addf %448, %451 : vector<16x16xf32>
    %cst_126 = arith.constant dense<0.000000e+00> : vector<16x16xf32>
    %453 = tpu.matmul %452, %0, %cst_126 {dimension_numbers = #tpu.dot_dimension_numbers<[1], [0], [0], [1], [0, 0, 1, 1], [], []>, precision = #tpu.contract_precision<fp32>} : vector<16x16xf32>, vector<16x16xf32>, vector<16x16xf32> -> vector<16x16xf32>
    %cst_127 = arith.constant 0.000000e+00 : f32
    %454 = vector.broadcast %cst_127 : f32 to vector<16x16xf32>
    %455 = arith.select %11, %453, %454 : vector<16x16xi1>, vector<16x16xf32>
    %456 = vector.extract_strided_slice %455 {offsets = [0, 0], sizes = [1, 16], strides = [1, 1]} : vector<16x16xf32> to vector<1x16xf32>
    %457 = vector.extract_strided_slice %455 {offsets = [0, 0], sizes = [1, 16], strides = [1, 1]} : vector<16x16xf32> to vector<1x16xf32>
    %458 = vector.extract_strided_slice %455 {offsets = [15, 0], sizes = [1, 16], strides = [1, 1]} : vector<16x16xf32> to vector<1x16xf32>
    %459 = vector.extract_strided_slice %455 {offsets = [15, 0], sizes = [1, 16], strides = [1, 1]} : vector<16x16xf32> to vector<1x16xf32>
    %460 = tpu.concatenate %456, %457, %455, %458, %459 in 0 : vector<1x16xf32>, vector<1x16xf32>, vector<16x16xf32>, vector<1x16xf32>, vector<1x16xf32> -> vector<20x16xf32>
    %461 = vector.extract_strided_slice %460 {offsets = [0, 0], sizes = [16, 16], strides = [1, 1]} : vector<20x16xf32> to vector<16x16xf32>
    %cst_128 = arith.constant 5.000000e-02 : f32
    %462 = vector.broadcast %cst_128 : f32 to vector<16x16xf32>
    %463 = arith.mulf %462, %461 : vector<16x16xf32>
    %464 = vector.extract_strided_slice %460 {offsets = [1, 0], sizes = [16, 16], strides = [1, 1]} : vector<20x16xf32> to vector<16x16xf32>
    %cst_129 = arith.constant 2.500000e-01 : f32
    %465 = vector.broadcast %cst_129 : f32 to vector<16x16xf32>
    %466 = arith.mulf %465, %464 : vector<16x16xf32>
    %467 = arith.addf %463, %466 : vector<16x16xf32>
    %468 = vector.extract_strided_slice %460 {offsets = [2, 0], sizes = [16, 16], strides = [1, 1]} : vector<20x16xf32> to vector<16x16xf32>
    %cst_130 = arith.constant 4.000000e-01 : f32
    %469 = vector.broadcast %cst_130 : f32 to vector<16x16xf32>
    %470 = arith.mulf %469, %468 : vector<16x16xf32>
    %471 = arith.addf %467, %470 : vector<16x16xf32>
    %472 = vector.extract_strided_slice %460 {offsets = [3, 0], sizes = [16, 16], strides = [1, 1]} : vector<20x16xf32> to vector<16x16xf32>
    %cst_131 = arith.constant 2.500000e-01 : f32
    %473 = vector.broadcast %cst_131 : f32 to vector<16x16xf32>
    %474 = arith.mulf %473, %472 : vector<16x16xf32>
    %475 = arith.addf %471, %474 : vector<16x16xf32>
    %476 = vector.extract_strided_slice %460 {offsets = [4, 0], sizes = [16, 16], strides = [1, 1]} : vector<20x16xf32> to vector<16x16xf32>
    %cst_132 = arith.constant 5.000000e-02 : f32
    %477 = vector.broadcast %cst_132 : f32 to vector<16x16xf32>
    %478 = arith.mulf %477, %476 : vector<16x16xf32>
    %479 = arith.addf %475, %478 : vector<16x16xf32>
    %cst_133 = arith.constant dense<0.000000e+00> : vector<16x16xf32>
    %480 = tpu.matmul %479, %0, %cst_133 {dimension_numbers = #tpu.dot_dimension_numbers<[1], [0], [0], [1], [0, 0, 1, 1], [], []>, precision = #tpu.contract_precision<fp32>} : vector<16x16xf32>, vector<16x16xf32>, vector<16x16xf32> -> vector<16x16xf32>
    %481 = arith.subf %428, %480 : vector<16x16xf32>
    %482 = arith.subf %426, %481 : vector<16x16xf32>
    %483 = arith.mulf %482, %482 : vector<16x16xf32>
    %cst_134 = arith.constant 9.99999997E-7 : f32
    %484 = vector.broadcast %cst_134 : f32 to vector<16x16xf32>
    %485 = arith.addf %483, %484 : vector<16x16xf32>
    %486 = math.sqrt %485 : vector<16x16xf32>
    %487 = vector.shape_cast %486 : vector<16x16xf32> to vector<1x16x16xf32>
    %cst_135 = arith.constant dense<0.000000e+00> : vector<1xf32>
    %488 = vector.multi_reduction <add>, %487, %cst_135 [1, 2] : vector<1x16x16xf32> to vector<1xf32>
    %489 = vector.shape_cast %488 : vector<1xf32> to vector<1x1x1xf32>
    %490 = vector.extract %489[0, 0, 0] : f32 from vector<1x1x1xf32>
    %491 = arith.addf %371, %490 : f32
    %c4 = arith.constant 4 : index
    %c0_136 = arith.constant 0 : index
    %c0_137 = arith.constant 0 : index
    %492 = vector.load %arg1[%c4, %c0_136, %c0_137] : memref<6x16x16xf32, #tpu.memory_space<vmem>>, vector<1x16x16xf32>
    %493 = vector.shape_cast %492 : vector<1x16x16xf32> to vector<16x16xf32>
    %494 = vector.extract_strided_slice %493 {offsets = [0, 0], sizes = [1, 16], strides = [1, 1]} : vector<16x16xf32> to vector<1x16xf32>
    %495 = vector.extract_strided_slice %493 {offsets = [0, 0], sizes = [1, 16], strides = [1, 1]} : vector<16x16xf32> to vector<1x16xf32>
    %496 = vector.extract_strided_slice %493 {offsets = [15, 0], sizes = [1, 16], strides = [1, 1]} : vector<16x16xf32> to vector<1x16xf32>
    %497 = vector.extract_strided_slice %493 {offsets = [15, 0], sizes = [1, 16], strides = [1, 1]} : vector<16x16xf32> to vector<1x16xf32>
    %498 = tpu.concatenate %494, %495, %493, %496, %497 in 0 : vector<1x16xf32>, vector<1x16xf32>, vector<16x16xf32>, vector<1x16xf32>, vector<1x16xf32> -> vector<20x16xf32>
    %499 = vector.extract_strided_slice %498 {offsets = [0, 0], sizes = [16, 16], strides = [1, 1]} : vector<20x16xf32> to vector<16x16xf32>
    %cst_138 = arith.constant 2.000000e-01 : f32
    %500 = vector.broadcast %cst_138 : f32 to vector<16x16xf32>
    %501 = arith.mulf %500, %499 : vector<16x16xf32>
    %502 = vector.extract_strided_slice %498 {offsets = [1, 0], sizes = [16, 16], strides = [1, 1]} : vector<20x16xf32> to vector<16x16xf32>
    %cst_139 = arith.constant 1.000000e+00 : f32
    %503 = vector.broadcast %cst_139 : f32 to vector<16x16xf32>
    %504 = arith.mulf %503, %502 : vector<16x16xf32>
    %505 = arith.addf %501, %504 : vector<16x16xf32>
    %506 = vector.extract_strided_slice %498 {offsets = [2, 0], sizes = [16, 16], strides = [1, 1]} : vector<20x16xf32> to vector<16x16xf32>
    %cst_140 = arith.constant 1.600000e+00 : f32
    %507 = vector.broadcast %cst_140 : f32 to vector<16x16xf32>
    %508 = arith.mulf %507, %506 : vector<16x16xf32>
    %509 = arith.addf %505, %508 : vector<16x16xf32>
    %510 = vector.extract_strided_slice %498 {offsets = [3, 0], sizes = [16, 16], strides = [1, 1]} : vector<20x16xf32> to vector<16x16xf32>
    %cst_141 = arith.constant 1.000000e+00 : f32
    %511 = vector.broadcast %cst_141 : f32 to vector<16x16xf32>
    %512 = arith.mulf %511, %510 : vector<16x16xf32>
    %513 = arith.addf %509, %512 : vector<16x16xf32>
    %514 = vector.extract_strided_slice %498 {offsets = [4, 0], sizes = [16, 16], strides = [1, 1]} : vector<20x16xf32> to vector<16x16xf32>
    %cst_142 = arith.constant 2.000000e-01 : f32
    %515 = vector.broadcast %cst_142 : f32 to vector<16x16xf32>
    %516 = arith.mulf %515, %514 : vector<16x16xf32>
    %517 = arith.addf %513, %516 : vector<16x16xf32>
    %cst_143 = arith.constant dense<0.000000e+00> : vector<16x16xf32>
    %518 = tpu.matmul %517, %0, %cst_143 {dimension_numbers = #tpu.dot_dimension_numbers<[1], [0], [0], [1], [0, 0, 1, 1], [], []>, precision = #tpu.contract_precision<fp32>} : vector<16x16xf32>, vector<16x16xf32>, vector<16x16xf32> -> vector<16x16xf32>
    %cst_144 = arith.constant 0.000000e+00 : f32
    %519 = vector.broadcast %cst_144 : f32 to vector<16x16xf32>
    %520 = arith.select %11, %518, %519 : vector<16x16xi1>, vector<16x16xf32>
    %521 = vector.extract_strided_slice %520 {offsets = [0, 0], sizes = [1, 16], strides = [1, 1]} : vector<16x16xf32> to vector<1x16xf32>
    %522 = vector.extract_strided_slice %520 {offsets = [0, 0], sizes = [1, 16], strides = [1, 1]} : vector<16x16xf32> to vector<1x16xf32>
    %523 = vector.extract_strided_slice %520 {offsets = [15, 0], sizes = [1, 16], strides = [1, 1]} : vector<16x16xf32> to vector<1x16xf32>
    %524 = vector.extract_strided_slice %520 {offsets = [15, 0], sizes = [1, 16], strides = [1, 1]} : vector<16x16xf32> to vector<1x16xf32>
    %525 = tpu.concatenate %521, %522, %520, %523, %524 in 0 : vector<1x16xf32>, vector<1x16xf32>, vector<16x16xf32>, vector<1x16xf32>, vector<1x16xf32> -> vector<20x16xf32>
    %526 = vector.extract_strided_slice %525 {offsets = [0, 0], sizes = [16, 16], strides = [1, 1]} : vector<20x16xf32> to vector<16x16xf32>
    %cst_145 = arith.constant 5.000000e-02 : f32
    %527 = vector.broadcast %cst_145 : f32 to vector<16x16xf32>
    %528 = arith.mulf %527, %526 : vector<16x16xf32>
    %529 = vector.extract_strided_slice %525 {offsets = [1, 0], sizes = [16, 16], strides = [1, 1]} : vector<20x16xf32> to vector<16x16xf32>
    %cst_146 = arith.constant 2.500000e-01 : f32
    %530 = vector.broadcast %cst_146 : f32 to vector<16x16xf32>
    %531 = arith.mulf %530, %529 : vector<16x16xf32>
    %532 = arith.addf %528, %531 : vector<16x16xf32>
    %533 = vector.extract_strided_slice %525 {offsets = [2, 0], sizes = [16, 16], strides = [1, 1]} : vector<20x16xf32> to vector<16x16xf32>
    %cst_147 = arith.constant 4.000000e-01 : f32
    %534 = vector.broadcast %cst_147 : f32 to vector<16x16xf32>
    %535 = arith.mulf %534, %533 : vector<16x16xf32>
    %536 = arith.addf %532, %535 : vector<16x16xf32>
    %537 = vector.extract_strided_slice %525 {offsets = [3, 0], sizes = [16, 16], strides = [1, 1]} : vector<20x16xf32> to vector<16x16xf32>
    %cst_148 = arith.constant 2.500000e-01 : f32
    %538 = vector.broadcast %cst_148 : f32 to vector<16x16xf32>
    %539 = arith.mulf %538, %537 : vector<16x16xf32>
    %540 = arith.addf %536, %539 : vector<16x16xf32>
    %541 = vector.extract_strided_slice %525 {offsets = [4, 0], sizes = [16, 16], strides = [1, 1]} : vector<20x16xf32> to vector<16x16xf32>
    %cst_149 = arith.constant 5.000000e-02 : f32
    %542 = vector.broadcast %cst_149 : f32 to vector<16x16xf32>
    %543 = arith.mulf %542, %541 : vector<16x16xf32>
    %544 = arith.addf %540, %543 : vector<16x16xf32>
    %cst_150 = arith.constant dense<0.000000e+00> : vector<16x16xf32>
    %545 = tpu.matmul %544, %0, %cst_150 {dimension_numbers = #tpu.dot_dimension_numbers<[1], [0], [0], [1], [0, 0, 1, 1], [], []>, precision = #tpu.contract_precision<fp32>} : vector<16x16xf32>, vector<16x16xf32>, vector<16x16xf32> -> vector<16x16xf32>
    %546 = arith.subf %493, %545 : vector<16x16xf32>
    %c4_151 = arith.constant 4 : index
    %c0_152 = arith.constant 0 : index
    %c0_153 = arith.constant 0 : index
    %547 = vector.load %arg2[%c4_151, %c0_152, %c0_153] : memref<6x16x16xf32, #tpu.memory_space<vmem>>, vector<1x16x16xf32>
    %548 = vector.shape_cast %547 : vector<1x16x16xf32> to vector<16x16xf32>
    %549 = vector.extract_strided_slice %548 {offsets = [0, 0], sizes = [1, 16], strides = [1, 1]} : vector<16x16xf32> to vector<1x16xf32>
    %550 = vector.extract_strided_slice %548 {offsets = [0, 0], sizes = [1, 16], strides = [1, 1]} : vector<16x16xf32> to vector<1x16xf32>
    %551 = vector.extract_strided_slice %548 {offsets = [15, 0], sizes = [1, 16], strides = [1, 1]} : vector<16x16xf32> to vector<1x16xf32>
    %552 = vector.extract_strided_slice %548 {offsets = [15, 0], sizes = [1, 16], strides = [1, 1]} : vector<16x16xf32> to vector<1x16xf32>
    %553 = tpu.concatenate %549, %550, %548, %551, %552 in 0 : vector<1x16xf32>, vector<1x16xf32>, vector<16x16xf32>, vector<1x16xf32>, vector<1x16xf32> -> vector<20x16xf32>
    %554 = vector.extract_strided_slice %553 {offsets = [0, 0], sizes = [16, 16], strides = [1, 1]} : vector<20x16xf32> to vector<16x16xf32>
    %cst_154 = arith.constant 2.000000e-01 : f32
    %555 = vector.broadcast %cst_154 : f32 to vector<16x16xf32>
    %556 = arith.mulf %555, %554 : vector<16x16xf32>
    %557 = vector.extract_strided_slice %553 {offsets = [1, 0], sizes = [16, 16], strides = [1, 1]} : vector<20x16xf32> to vector<16x16xf32>
    %cst_155 = arith.constant 1.000000e+00 : f32
    %558 = vector.broadcast %cst_155 : f32 to vector<16x16xf32>
    %559 = arith.mulf %558, %557 : vector<16x16xf32>
    %560 = arith.addf %556, %559 : vector<16x16xf32>
    %561 = vector.extract_strided_slice %553 {offsets = [2, 0], sizes = [16, 16], strides = [1, 1]} : vector<20x16xf32> to vector<16x16xf32>
    %cst_156 = arith.constant 1.600000e+00 : f32
    %562 = vector.broadcast %cst_156 : f32 to vector<16x16xf32>
    %563 = arith.mulf %562, %561 : vector<16x16xf32>
    %564 = arith.addf %560, %563 : vector<16x16xf32>
    %565 = vector.extract_strided_slice %553 {offsets = [3, 0], sizes = [16, 16], strides = [1, 1]} : vector<20x16xf32> to vector<16x16xf32>
    %cst_157 = arith.constant 1.000000e+00 : f32
    %566 = vector.broadcast %cst_157 : f32 to vector<16x16xf32>
    %567 = arith.mulf %566, %565 : vector<16x16xf32>
    %568 = arith.addf %564, %567 : vector<16x16xf32>
    %569 = vector.extract_strided_slice %553 {offsets = [4, 0], sizes = [16, 16], strides = [1, 1]} : vector<20x16xf32> to vector<16x16xf32>
    %cst_158 = arith.constant 2.000000e-01 : f32
    %570 = vector.broadcast %cst_158 : f32 to vector<16x16xf32>
    %571 = arith.mulf %570, %569 : vector<16x16xf32>
    %572 = arith.addf %568, %571 : vector<16x16xf32>
    %cst_159 = arith.constant dense<0.000000e+00> : vector<16x16xf32>
    %573 = tpu.matmul %572, %0, %cst_159 {dimension_numbers = #tpu.dot_dimension_numbers<[1], [0], [0], [1], [0, 0, 1, 1], [], []>, precision = #tpu.contract_precision<fp32>} : vector<16x16xf32>, vector<16x16xf32>, vector<16x16xf32> -> vector<16x16xf32>
    %cst_160 = arith.constant 0.000000e+00 : f32
    %574 = vector.broadcast %cst_160 : f32 to vector<16x16xf32>
    %575 = arith.select %11, %573, %574 : vector<16x16xi1>, vector<16x16xf32>
    %576 = vector.extract_strided_slice %575 {offsets = [0, 0], sizes = [1, 16], strides = [1, 1]} : vector<16x16xf32> to vector<1x16xf32>
    %577 = vector.extract_strided_slice %575 {offsets = [0, 0], sizes = [1, 16], strides = [1, 1]} : vector<16x16xf32> to vector<1x16xf32>
    %578 = vector.extract_strided_slice %575 {offsets = [15, 0], sizes = [1, 16], strides = [1, 1]} : vector<16x16xf32> to vector<1x16xf32>
    %579 = vector.extract_strided_slice %575 {offsets = [15, 0], sizes = [1, 16], strides = [1, 1]} : vector<16x16xf32> to vector<1x16xf32>
    %580 = tpu.concatenate %576, %577, %575, %578, %579 in 0 : vector<1x16xf32>, vector<1x16xf32>, vector<16x16xf32>, vector<1x16xf32>, vector<1x16xf32> -> vector<20x16xf32>
    %581 = vector.extract_strided_slice %580 {offsets = [0, 0], sizes = [16, 16], strides = [1, 1]} : vector<20x16xf32> to vector<16x16xf32>
    %cst_161 = arith.constant 5.000000e-02 : f32
    %582 = vector.broadcast %cst_161 : f32 to vector<16x16xf32>
    %583 = arith.mulf %582, %581 : vector<16x16xf32>
    %584 = vector.extract_strided_slice %580 {offsets = [1, 0], sizes = [16, 16], strides = [1, 1]} : vector<20x16xf32> to vector<16x16xf32>
    %cst_162 = arith.constant 2.500000e-01 : f32
    %585 = vector.broadcast %cst_162 : f32 to vector<16x16xf32>
    %586 = arith.mulf %585, %584 : vector<16x16xf32>
    %587 = arith.addf %583, %586 : vector<16x16xf32>
    %588 = vector.extract_strided_slice %580 {offsets = [2, 0], sizes = [16, 16], strides = [1, 1]} : vector<20x16xf32> to vector<16x16xf32>
    %cst_163 = arith.constant 4.000000e-01 : f32
    %589 = vector.broadcast %cst_163 : f32 to vector<16x16xf32>
    %590 = arith.mulf %589, %588 : vector<16x16xf32>
    %591 = arith.addf %587, %590 : vector<16x16xf32>
    %592 = vector.extract_strided_slice %580 {offsets = [3, 0], sizes = [16, 16], strides = [1, 1]} : vector<20x16xf32> to vector<16x16xf32>
    %cst_164 = arith.constant 2.500000e-01 : f32
    %593 = vector.broadcast %cst_164 : f32 to vector<16x16xf32>
    %594 = arith.mulf %593, %592 : vector<16x16xf32>
    %595 = arith.addf %591, %594 : vector<16x16xf32>
    %596 = vector.extract_strided_slice %580 {offsets = [4, 0], sizes = [16, 16], strides = [1, 1]} : vector<20x16xf32> to vector<16x16xf32>
    %cst_165 = arith.constant 5.000000e-02 : f32
    %597 = vector.broadcast %cst_165 : f32 to vector<16x16xf32>
    %598 = arith.mulf %597, %596 : vector<16x16xf32>
    %599 = arith.addf %595, %598 : vector<16x16xf32>
    %cst_166 = arith.constant dense<0.000000e+00> : vector<16x16xf32>
    %600 = tpu.matmul %599, %0, %cst_166 {dimension_numbers = #tpu.dot_dimension_numbers<[1], [0], [0], [1], [0, 0, 1, 1], [], []>, precision = #tpu.contract_precision<fp32>} : vector<16x16xf32>, vector<16x16xf32>, vector<16x16xf32> -> vector<16x16xf32>
    %601 = arith.subf %548, %600 : vector<16x16xf32>
    %602 = arith.subf %546, %601 : vector<16x16xf32>
    %603 = arith.mulf %602, %602 : vector<16x16xf32>
    %cst_167 = arith.constant 9.99999997E-7 : f32
    %604 = vector.broadcast %cst_167 : f32 to vector<16x16xf32>
    %605 = arith.addf %603, %604 : vector<16x16xf32>
    %606 = math.sqrt %605 : vector<16x16xf32>
    %607 = vector.shape_cast %606 : vector<16x16xf32> to vector<1x16x16xf32>
    %cst_168 = arith.constant dense<0.000000e+00> : vector<1xf32>
    %608 = vector.multi_reduction <add>, %607, %cst_168 [1, 2] : vector<1x16x16xf32> to vector<1xf32>
    %609 = vector.shape_cast %608 : vector<1xf32> to vector<1x1x1xf32>
    %610 = vector.extract %609[0, 0, 0] : f32 from vector<1x1x1xf32>
    %611 = arith.addf %491, %610 : f32
    %c5 = arith.constant 5 : index
    %c0_169 = arith.constant 0 : index
    %c0_170 = arith.constant 0 : index
    %612 = vector.load %arg1[%c5, %c0_169, %c0_170] : memref<6x16x16xf32, #tpu.memory_space<vmem>>, vector<1x16x16xf32>
    %613 = vector.shape_cast %612 : vector<1x16x16xf32> to vector<16x16xf32>
    %614 = vector.extract_strided_slice %613 {offsets = [0, 0], sizes = [1, 16], strides = [1, 1]} : vector<16x16xf32> to vector<1x16xf32>
    %615 = vector.extract_strided_slice %613 {offsets = [0, 0], sizes = [1, 16], strides = [1, 1]} : vector<16x16xf32> to vector<1x16xf32>
    %616 = vector.extract_strided_slice %613 {offsets = [15, 0], sizes = [1, 16], strides = [1, 1]} : vector<16x16xf32> to vector<1x16xf32>
    %617 = vector.extract_strided_slice %613 {offsets = [15, 0], sizes = [1, 16], strides = [1, 1]} : vector<16x16xf32> to vector<1x16xf32>
    %618 = tpu.concatenate %614, %615, %613, %616, %617 in 0 : vector<1x16xf32>, vector<1x16xf32>, vector<16x16xf32>, vector<1x16xf32>, vector<1x16xf32> -> vector<20x16xf32>
    %619 = vector.extract_strided_slice %618 {offsets = [0, 0], sizes = [16, 16], strides = [1, 1]} : vector<20x16xf32> to vector<16x16xf32>
    %cst_171 = arith.constant 2.000000e-01 : f32
    %620 = vector.broadcast %cst_171 : f32 to vector<16x16xf32>
    %621 = arith.mulf %620, %619 : vector<16x16xf32>
    %622 = vector.extract_strided_slice %618 {offsets = [1, 0], sizes = [16, 16], strides = [1, 1]} : vector<20x16xf32> to vector<16x16xf32>
    %cst_172 = arith.constant 1.000000e+00 : f32
    %623 = vector.broadcast %cst_172 : f32 to vector<16x16xf32>
    %624 = arith.mulf %623, %622 : vector<16x16xf32>
    %625 = arith.addf %621, %624 : vector<16x16xf32>
    %626 = vector.extract_strided_slice %618 {offsets = [2, 0], sizes = [16, 16], strides = [1, 1]} : vector<20x16xf32> to vector<16x16xf32>
    %cst_173 = arith.constant 1.600000e+00 : f32
    %627 = vector.broadcast %cst_173 : f32 to vector<16x16xf32>
    %628 = arith.mulf %627, %626 : vector<16x16xf32>
    %629 = arith.addf %625, %628 : vector<16x16xf32>
    %630 = vector.extract_strided_slice %618 {offsets = [3, 0], sizes = [16, 16], strides = [1, 1]} : vector<20x16xf32> to vector<16x16xf32>
    %cst_174 = arith.constant 1.000000e+00 : f32
    %631 = vector.broadcast %cst_174 : f32 to vector<16x16xf32>
    %632 = arith.mulf %631, %630 : vector<16x16xf32>
    %633 = arith.addf %629, %632 : vector<16x16xf32>
    %634 = vector.extract_strided_slice %618 {offsets = [4, 0], sizes = [16, 16], strides = [1, 1]} : vector<20x16xf32> to vector<16x16xf32>
    %cst_175 = arith.constant 2.000000e-01 : f32
    %635 = vector.broadcast %cst_175 : f32 to vector<16x16xf32>
    %636 = arith.mulf %635, %634 : vector<16x16xf32>
    %637 = arith.addf %633, %636 : vector<16x16xf32>
    %cst_176 = arith.constant dense<0.000000e+00> : vector<16x16xf32>
    %638 = tpu.matmul %637, %0, %cst_176 {dimension_numbers = #tpu.dot_dimension_numbers<[1], [0], [0], [1], [0, 0, 1, 1], [], []>, precision = #tpu.contract_precision<fp32>} : vector<16x16xf32>, vector<16x16xf32>, vector<16x16xf32> -> vector<16x16xf32>
    %cst_177 = arith.constant 0.000000e+00 : f32
    %639 = vector.broadcast %cst_177 : f32 to vector<16x16xf32>
    %640 = arith.select %11, %638, %639 : vector<16x16xi1>, vector<16x16xf32>
    %641 = vector.extract_strided_slice %640 {offsets = [0, 0], sizes = [1, 16], strides = [1, 1]} : vector<16x16xf32> to vector<1x16xf32>
    %642 = vector.extract_strided_slice %640 {offsets = [0, 0], sizes = [1, 16], strides = [1, 1]} : vector<16x16xf32> to vector<1x16xf32>
    %643 = vector.extract_strided_slice %640 {offsets = [15, 0], sizes = [1, 16], strides = [1, 1]} : vector<16x16xf32> to vector<1x16xf32>
    %644 = vector.extract_strided_slice %640 {offsets = [15, 0], sizes = [1, 16], strides = [1, 1]} : vector<16x16xf32> to vector<1x16xf32>
    %645 = tpu.concatenate %641, %642, %640, %643, %644 in 0 : vector<1x16xf32>, vector<1x16xf32>, vector<16x16xf32>, vector<1x16xf32>, vector<1x16xf32> -> vector<20x16xf32>
    %646 = vector.extract_strided_slice %645 {offsets = [0, 0], sizes = [16, 16], strides = [1, 1]} : vector<20x16xf32> to vector<16x16xf32>
    %cst_178 = arith.constant 5.000000e-02 : f32
    %647 = vector.broadcast %cst_178 : f32 to vector<16x16xf32>
    %648 = arith.mulf %647, %646 : vector<16x16xf32>
    %649 = vector.extract_strided_slice %645 {offsets = [1, 0], sizes = [16, 16], strides = [1, 1]} : vector<20x16xf32> to vector<16x16xf32>
    %cst_179 = arith.constant 2.500000e-01 : f32
    %650 = vector.broadcast %cst_179 : f32 to vector<16x16xf32>
    %651 = arith.mulf %650, %649 : vector<16x16xf32>
    %652 = arith.addf %648, %651 : vector<16x16xf32>
    %653 = vector.extract_strided_slice %645 {offsets = [2, 0], sizes = [16, 16], strides = [1, 1]} : vector<20x16xf32> to vector<16x16xf32>
    %cst_180 = arith.constant 4.000000e-01 : f32
    %654 = vector.broadcast %cst_180 : f32 to vector<16x16xf32>
    %655 = arith.mulf %654, %653 : vector<16x16xf32>
    %656 = arith.addf %652, %655 : vector<16x16xf32>
    %657 = vector.extract_strided_slice %645 {offsets = [3, 0], sizes = [16, 16], strides = [1, 1]} : vector<20x16xf32> to vector<16x16xf32>
    %cst_181 = arith.constant 2.500000e-01 : f32
    %658 = vector.broadcast %cst_181 : f32 to vector<16x16xf32>
    %659 = arith.mulf %658, %657 : vector<16x16xf32>
    %660 = arith.addf %656, %659 : vector<16x16xf32>
    %661 = vector.extract_strided_slice %645 {offsets = [4, 0], sizes = [16, 16], strides = [1, 1]} : vector<20x16xf32> to vector<16x16xf32>
    %cst_182 = arith.constant 5.000000e-02 : f32
    %662 = vector.broadcast %cst_182 : f32 to vector<16x16xf32>
    %663 = arith.mulf %662, %661 : vector<16x16xf32>
    %664 = arith.addf %660, %663 : vector<16x16xf32>
    %cst_183 = arith.constant dense<0.000000e+00> : vector<16x16xf32>
    %665 = tpu.matmul %664, %0, %cst_183 {dimension_numbers = #tpu.dot_dimension_numbers<[1], [0], [0], [1], [0, 0, 1, 1], [], []>, precision = #tpu.contract_precision<fp32>} : vector<16x16xf32>, vector<16x16xf32>, vector<16x16xf32> -> vector<16x16xf32>
    %666 = arith.subf %613, %665 : vector<16x16xf32>
    %c5_184 = arith.constant 5 : index
    %c0_185 = arith.constant 0 : index
    %c0_186 = arith.constant 0 : index
    %667 = vector.load %arg2[%c5_184, %c0_185, %c0_186] : memref<6x16x16xf32, #tpu.memory_space<vmem>>, vector<1x16x16xf32>
    %668 = vector.shape_cast %667 : vector<1x16x16xf32> to vector<16x16xf32>
    %669 = vector.extract_strided_slice %668 {offsets = [0, 0], sizes = [1, 16], strides = [1, 1]} : vector<16x16xf32> to vector<1x16xf32>
    %670 = vector.extract_strided_slice %668 {offsets = [0, 0], sizes = [1, 16], strides = [1, 1]} : vector<16x16xf32> to vector<1x16xf32>
    %671 = vector.extract_strided_slice %668 {offsets = [15, 0], sizes = [1, 16], strides = [1, 1]} : vector<16x16xf32> to vector<1x16xf32>
    %672 = vector.extract_strided_slice %668 {offsets = [15, 0], sizes = [1, 16], strides = [1, 1]} : vector<16x16xf32> to vector<1x16xf32>
    %673 = tpu.concatenate %669, %670, %668, %671, %672 in 0 : vector<1x16xf32>, vector<1x16xf32>, vector<16x16xf32>, vector<1x16xf32>, vector<1x16xf32> -> vector<20x16xf32>
    %674 = vector.extract_strided_slice %673 {offsets = [0, 0], sizes = [16, 16], strides = [1, 1]} : vector<20x16xf32> to vector<16x16xf32>
    %cst_187 = arith.constant 2.000000e-01 : f32
    %675 = vector.broadcast %cst_187 : f32 to vector<16x16xf32>
    %676 = arith.mulf %675, %674 : vector<16x16xf32>
    %677 = vector.extract_strided_slice %673 {offsets = [1, 0], sizes = [16, 16], strides = [1, 1]} : vector<20x16xf32> to vector<16x16xf32>
    %cst_188 = arith.constant 1.000000e+00 : f32
    %678 = vector.broadcast %cst_188 : f32 to vector<16x16xf32>
    %679 = arith.mulf %678, %677 : vector<16x16xf32>
    %680 = arith.addf %676, %679 : vector<16x16xf32>
    %681 = vector.extract_strided_slice %673 {offsets = [2, 0], sizes = [16, 16], strides = [1, 1]} : vector<20x16xf32> to vector<16x16xf32>
    %cst_189 = arith.constant 1.600000e+00 : f32
    %682 = vector.broadcast %cst_189 : f32 to vector<16x16xf32>
    %683 = arith.mulf %682, %681 : vector<16x16xf32>
    %684 = arith.addf %680, %683 : vector<16x16xf32>
    %685 = vector.extract_strided_slice %673 {offsets = [3, 0], sizes = [16, 16], strides = [1, 1]} : vector<20x16xf32> to vector<16x16xf32>
    %cst_190 = arith.constant 1.000000e+00 : f32
    %686 = vector.broadcast %cst_190 : f32 to vector<16x16xf32>
    %687 = arith.mulf %686, %685 : vector<16x16xf32>
    %688 = arith.addf %684, %687 : vector<16x16xf32>
    %689 = vector.extract_strided_slice %673 {offsets = [4, 0], sizes = [16, 16], strides = [1, 1]} : vector<20x16xf32> to vector<16x16xf32>
    %cst_191 = arith.constant 2.000000e-01 : f32
    %690 = vector.broadcast %cst_191 : f32 to vector<16x16xf32>
    %691 = arith.mulf %690, %689 : vector<16x16xf32>
    %692 = arith.addf %688, %691 : vector<16x16xf32>
    %cst_192 = arith.constant dense<0.000000e+00> : vector<16x16xf32>
    %693 = tpu.matmul %692, %0, %cst_192 {dimension_numbers = #tpu.dot_dimension_numbers<[1], [0], [0], [1], [0, 0, 1, 1], [], []>, precision = #tpu.contract_precision<fp32>} : vector<16x16xf32>, vector<16x16xf32>, vector<16x16xf32> -> vector<16x16xf32>
    %cst_193 = arith.constant 0.000000e+00 : f32
    %694 = vector.broadcast %cst_193 : f32 to vector<16x16xf32>
    %695 = arith.select %11, %693, %694 : vector<16x16xi1>, vector<16x16xf32>
    %696 = vector.extract_strided_slice %695 {offsets = [0, 0], sizes = [1, 16], strides = [1, 1]} : vector<16x16xf32> to vector<1x16xf32>
    %697 = vector.extract_strided_slice %695 {offsets = [0, 0], sizes = [1, 16], strides = [1, 1]} : vector<16x16xf32> to vector<1x16xf32>
    %698 = vector.extract_strided_slice %695 {offsets = [15, 0], sizes = [1, 16], strides = [1, 1]} : vector<16x16xf32> to vector<1x16xf32>
    %699 = vector.extract_strided_slice %695 {offsets = [15, 0], sizes = [1, 16], strides = [1, 1]} : vector<16x16xf32> to vector<1x16xf32>
    %700 = tpu.concatenate %696, %697, %695, %698, %699 in 0 : vector<1x16xf32>, vector<1x16xf32>, vector<16x16xf32>, vector<1x16xf32>, vector<1x16xf32> -> vector<20x16xf32>
    %701 = vector.extract_strided_slice %700 {offsets = [0, 0], sizes = [16, 16], strides = [1, 1]} : vector<20x16xf32> to vector<16x16xf32>
    %cst_194 = arith.constant 5.000000e-02 : f32
    %702 = vector.broadcast %cst_194 : f32 to vector<16x16xf32>
    %703 = arith.mulf %702, %701 : vector<16x16xf32>
    %704 = vector.extract_strided_slice %700 {offsets = [1, 0], sizes = [16, 16], strides = [1, 1]} : vector<20x16xf32> to vector<16x16xf32>
    %cst_195 = arith.constant 2.500000e-01 : f32
    %705 = vector.broadcast %cst_195 : f32 to vector<16x16xf32>
    %706 = arith.mulf %705, %704 : vector<16x16xf32>
    %707 = arith.addf %703, %706 : vector<16x16xf32>
    %708 = vector.extract_strided_slice %700 {offsets = [2, 0], sizes = [16, 16], strides = [1, 1]} : vector<20x16xf32> to vector<16x16xf32>
    %cst_196 = arith.constant 4.000000e-01 : f32
    %709 = vector.broadcast %cst_196 : f32 to vector<16x16xf32>
    %710 = arith.mulf %709, %708 : vector<16x16xf32>
    %711 = arith.addf %707, %710 : vector<16x16xf32>
    %712 = vector.extract_strided_slice %700 {offsets = [3, 0], sizes = [16, 16], strides = [1, 1]} : vector<20x16xf32> to vector<16x16xf32>
    %cst_197 = arith.constant 2.500000e-01 : f32
    %713 = vector.broadcast %cst_197 : f32 to vector<16x16xf32>
    %714 = arith.mulf %713, %712 : vector<16x16xf32>
    %715 = arith.addf %711, %714 : vector<16x16xf32>
    %716 = vector.extract_strided_slice %700 {offsets = [4, 0], sizes = [16, 16], strides = [1, 1]} : vector<20x16xf32> to vector<16x16xf32>
    %cst_198 = arith.constant 5.000000e-02 : f32
    %717 = vector.broadcast %cst_198 : f32 to vector<16x16xf32>
    %718 = arith.mulf %717, %716 : vector<16x16xf32>
    %719 = arith.addf %715, %718 : vector<16x16xf32>
    %cst_199 = arith.constant dense<0.000000e+00> : vector<16x16xf32>
    %720 = tpu.matmul %719, %0, %cst_199 {dimension_numbers = #tpu.dot_dimension_numbers<[1], [0], [0], [1], [0, 0, 1, 1], [], []>, precision = #tpu.contract_precision<fp32>} : vector<16x16xf32>, vector<16x16xf32>, vector<16x16xf32> -> vector<16x16xf32>
    %721 = arith.subf %668, %720 : vector<16x16xf32>
    %722 = arith.subf %666, %721 : vector<16x16xf32>
    %723 = arith.mulf %722, %722 : vector<16x16xf32>
    %cst_200 = arith.constant 9.99999997E-7 : f32
    %724 = vector.broadcast %cst_200 : f32 to vector<16x16xf32>
    %725 = arith.addf %723, %724 : vector<16x16xf32>
    %726 = math.sqrt %725 : vector<16x16xf32>
    %727 = vector.shape_cast %726 : vector<16x16xf32> to vector<1x16x16xf32>
    %cst_201 = arith.constant dense<0.000000e+00> : vector<1xf32>
    %728 = vector.multi_reduction <add>, %727, %cst_201 [1, 2] : vector<1x16x16xf32> to vector<1xf32>
    %729 = vector.shape_cast %728 : vector<1xf32> to vector<1x1x1xf32>
    %730 = vector.extract %729[0, 0, 0] : f32 from vector<1x1x1xf32>
    %731 = arith.addf %611, %730 : f32
    %c0_202 = arith.constant 0 : index
    %c0_203 = arith.constant 0 : index
    %732 = memref.load %arg4[%c0_202, %c0_203] : memref<1x1xf32, #tpu.memory_space<smem>>
    memref.store %731, %arg4[%c0_202, %c0_203] : memref<1x1xf32, #tpu.memory_space<smem>>
    return
  }
  func.func @transform_0(%arg0: i32) -> (i32, i32, i32) {
    %c0_i32 = arith.constant 0 : i32
    %c0_i32_0 = arith.constant 0 : i32
    %c0_i32_1 = arith.constant 0 : i32
    return %arg0, %c0_i32, %c0_i32_0 : i32, i32, i32
  }
  func.func @transform_1(%arg0: i32) -> (i32, i32, i32) {
    %c0_i32 = arith.constant 0 : i32
    %c0_i32_0 = arith.constant 0 : i32
    %c0_i32_1 = arith.constant 0 : i32
    return %arg0, %c0_i32, %c0_i32_0 : i32, i32, i32
  }
  func.func @transform_2(%arg0: i32) -> (i32, i32) {
    %c0_i32 = arith.constant 0 : i32
    %c0_i32_0 = arith.constant 0 : i32
    %c0_i32_1 = arith.constant 0 : i32
    return %c0_i32, %c0_i32_0 : i32, i32
  }
  func.func @transform_3(%arg0: i32) -> (i32, i32) {
    %c0_i32 = arith.constant 0 : i32
    %c0_i32_0 = arith.constant 0 : i32
    return %arg0, %c0_i32 : i32, i32
  }
}

</mosaic_0001>

<bundles_post_ra>
// kernel: edge_loss.1
= control target key start
LH: loop header
LB: loop body
LE: loop exit
PB: predicated region body
PF: predicated region fallthrough
CT: control target
= control target key end

     0   :  { %8 = vsyncpa [#allocation3], 0  ;;  %s18396_s0 = inlined_call_operand.hbm [shape: f32[6,16,16], index: 0, kind: input, shape index: {}]   ;;  %s18397_s1 = inlined_call_operand.hbm [shape: f32[6,16,16], index: 1, kind: input, shape index: {}]   ;;  %s18398_s2 = inlined_call_operand.vmem [shape: f32[16,16], index: 2, kind: input, shape index: {}]   ;;  %s18399_s3 = inlined_call_operand.hbm [shape: f32[1,1], index: 3, kind: output, shape index: {}]  }
   0x1   :  { %9 = vsyncpa [#allocation6], 0 }
   0x2   :  { %10 = vsyncpa [#allocation4], 0  ;;  %s16760_s12 = smov [#allocation2]   ;;  %s16700_s16 = scalar_lea.hbm %s18396_s0, 1536 }
   0x3   :  { %s16_s13 = sshll.u32 %s16760_s12, 4  ;;  %p16701_p0 = scmp.ne.s32.totalorder %s18396_s0, %s16700_s16  ;;  %s17_s13 = int_to_ptr.vmem [resolvable:$true] %s16_s13 }
   0x4   :  { %p16704_p1 = scmp.lt.u32.totalorder %s16700_s16, %s18396_s0 }
   0x6   :  { %p16706_p2 = pnand %p16704_p1, %p16701_p0 }
   0x8   :  { %16709 = shalt.err (!%p16706_p2)
}
   0x9   :  { %s16710_s21 = scalar_lea.vmem %s17_s13, 1536  ;;  %p16715_p4 = scmp.lt.s32.totalorder %s17_s13, %s17_s13 }
   0xa   :  { %p16711_p3 = scmp.ne.s32.totalorder %s17_s13, %s16710_s21  ;;  %p16716_p5 = scmp.lt.s32.totalorder %s16710_s21, %s16710_s21 }
   0xc   :  { %p16717_p6 = por %p16716_p5, %p16715_p4 }
   0xe   :  { %p16718_p7 = pnand %p16717_p6, %p16711_p3 }
  0x10   :  { %16721 = shalt.err (!%p16718_p7)
}
  0x11   :  { %s16761_s22 = smov 128   ;;  %s16762_s23 = smov 8  }
  0x12   :  { %22 = dma.hbm_to_vmem [thread:$0]  %s18396_s0, 1536, %s17_s13, [#allocation3], %s16761_s22, %s16761_s22, %s16762_s23  }
  0x13   :  { %s16763_s26 = smov [#allocation5]   ;;  %s16722_s30 = scalar_lea.hbm %s18397_s1, 1536 }
  0x14   :  { %s28_s27 = sshll.u32 %s16763_s26, 4  ;;  %p16723_p8 = scmp.ne.s32.totalorder %s18397_s1, %s16722_s30  ;;  %s29_s27 = int_to_ptr.vmem [resolvable:$true] %s28_s27 }
  0x15   :  { %p16726_p9 = scmp.lt.u32.totalorder %s16722_s30, %s18397_s1 }
  0x17   :  { %p16728_p10 = pnand %p16726_p9, %p16723_p8 }
  0x19   :  { %16731 = shalt.err (!%p16728_p10)
}
  0x1a   :  { %s16732_s8 = scalar_lea.vmem %s29_s27, 1536  ;;  %p16737_p12 = scmp.lt.s32.totalorder %s29_s27, %s29_s27 }
  0x1b   :  { %p16733_p11 = scmp.ne.s32.totalorder %s29_s27, %s16732_s8  ;;  %p16738_p13 = scmp.lt.s32.totalorder %s16732_s8, %s16732_s8 }
  0x1d   :  { %p16739_p0 = por %p16738_p13, %p16737_p12 }
  0x1f   :  { %p16740_p1 = pnand %p16739_p0, %p16733_p11 }
  0x21   :  { %16743 = shalt.err (!%p16740_p1)
}
  0x22   :  { %34 = dma.hbm_to_vmem [thread:$0]  %s18397_s1, 1536, %s29_s27, [#allocation6], %s16761_s22, %s16761_s22, %s16762_s23  }
  0x23   :  { %16754 = dma.done.wait [#allocation3], 1536  }
  0x24   :  { %16755 = vsyncadd [#allocation3], 4294965760 }
  0x25   :  { %16756 = dma.done.wait [#allocation6], 1536  }
  0x26   :  { %16757 = vsyncadd [#allocation6], 4294965760  ;;  %vm64_vm0 = vcmask 1041408   ;;  %v43_v0 = vld [vmem:[%s18398_s2] sm:$0xff]  ;;  %v44_v1 = vld [vmem:[%s18398_s2 + $0x8] sm:$0xff]  ;;  %vm75_vm1 = vcmask 1040384  }
  0x27   :  { %v58_v2 = vld [vmem:[#allocation2] sm:$0xff]  ;;  %vm79_vm2 = vcmask 1042432   ;;  %vm85_vm3 = vcmask 1046528   ;;  %v143_v3 = vand.u32 4294901760, %v43_v0  ;;  %v146_v4 = vand.u32 4294901760, %v44_v1  ;;  %v59_v5 = vld [vmem:[#allocation2 + $0x8] sm:$0xff] }
  0x28   :  { %v61_v6 = vrot.slane %v58_v2, 7  ;;  %v65_v7 = vrot.slane %v58_v2, 6  ;;  %v66_v8 = vrot.slane %v59_v5, 6  ;;  %v71_v9 = vrot.slane %v59_v5, 5  ;;  %v1228_v54 = vld [vmem:[#allocation5] sm:$0xff]  ;;  %v1229_v59 = vld [vmem:[#allocation5 + $0x8] sm:$0xff] }
  0x29   :  { %v73_v10 = vrot.slane %v59_v5, 4  ;;  %vm101_vm4 = vcmask 1045504   ;;  %v16815_v11 = vpack.c.bf16 %v146_v4, %v143_v3  ;;  %vm111_vm5 = vcmask 1044480   ;;  %s16744_s25 = scalar_lea.hbm %s18399_s3, 16 }
  0x2a   :  { %v76_v12 = vsel %vm75_vm1, %v58_v2, %v61_v6  ;;  %v16818_v13 = vsub.f32 %v43_v0, %v143_v3  ;;  %v67_v14 = vsel %vm64_vm0, %v65_v7, %v66_v8  ;;  %v78_v16 = vsel %vm64_vm0, %v66_v8, %v71_v9  ;;  %p16745_p2 = scmp.ne.s32.totalorder %s18399_s3, %s16744_s25  ;;  %p16748_p3 = scmp.lt.u32.totalorder %s16744_s25, %s18399_s3 }
  0x2b   :  { %v77_v15 = vsel %vm64_vm0, %v76_v12, %v65_v7  ;;  %v16823_v17 = vsub.f32 %v44_v1, %v146_v4  ;;  %15820 = vmatprep.subr.bf16.mxu0 %v16815_v11  ;;  %v80_v18 = vsel %vm79_vm2, %v78_v16, %v73_v10  ;;  %v82_v20 = vmul.f32 0.2, %v67_v14  ;;  %15844 = vmatprep.subr.bf16.mxu1 %v16815_v11 }
  0x2c   :  { %v81_v19 = vmul.f32 0.2, %v77_v15  ;;  %v86_v21 = vrot.slane %v77_v15, 1  ;;  %15822 = vmatpush3.bf16.msra.mxu0 %v16815_v11  ;;  %v87_v22 = vrot.slane %v67_v14, 1  ;;  %v89_v23 = vrot.slane %v80_v18, 1  ;;  %15846 = vmatpush3.bf16.msra.mxu1 %v16815_v11  ;;  %p16750_p4 = pnand %p16748_p3, %p16745_p2 }
  0x2d   :  { %v95_v24 = vmul.f32 1.6, %v77_v15  ;;  %v96_v25 = vmul.f32 1.6, %v67_v14  ;;  %v112_v26 = vrot.slane %v77_v15, 3  ;;  %v113_v27 = vrot.slane %v67_v14, 3 }
  0x2e   :  { %v126_v28 = vrot.slane %v81_v19, 4  ;;  %v127_v29 = vrot.slane %v82_v20, 4  ;;  %v88_v30 = vsel %vm85_vm3, %v86_v21, %v87_v22  ;;  %v90_v31 = vsel %vm85_vm3, %v87_v22, %v89_v23 }
  0x2f   :  { %v102_v32 = vrot.slane %v95_v24, 2  ;;  %v103_v33 = vrot.slane %v96_v25, 2  ;;  %v93_v34 = vadd.f32 %v88_v30, %v81_v19  ;;  %v114_v35 = vsel %vm111_vm5, %v112_v26, %v113_v27 }
  0x30   :  { %vm125_vm6 = vcmask 1043456   ;;  %v232_v37 = vand.u32 4294901760, %v16818_v13  ;;  %v239_v38 = vand.u32 4294901760, %v16823_v17  ;;  %v97_v39 = vmul.f32 1.6, %v80_v18 }
  0x31   :  { %v104_v36 = vsel %vm101_vm4, %v102_v32, %v103_v33  ;;  %v94_v40 = vadd.f32 %v90_v31, %v82_v20  ;;  %v115_v42 = vrot.slane %v80_v18, 3  ;;  %v121_v43 = vmul.f32 0.2, %v80_v18 }
  0x32   :  { %v109_v41 = vadd.f32 %v104_v36, %v93_v34  ;;  %v128_v44 = vsel %vm125_vm6, %v126_v28, %v127_v29  ;;  %v233_v45 = vsub.f32 %v16818_v13, %v232_v37  ;;  %v240_v46 = vsub.f32 %v16823_v17, %v239_v38 }
  0x33   :  { %v105_v47 = vrot.slane %v97_v39, 2  ;;  %vm135_vm7 = vcmask 130048   ;;  %v129_v49 = vrot.slane %v121_v43, 4  ;;  %v116_v53 = vsel %vm111_vm5, %v113_v27, %v115_v42 }
  0x34   :  { %v119_v48 = vadd.f32 %v114_v35, %v109_v41  ;;  %v234_v50 = vand.u32 4294901760, %v233_v45  ;;  %v241_v51 = vand.u32 4294901760, %v240_v46  ;;  %v1231_v62 = vrot.slane %v1228_v54, 7 }
  0x35   :  { %v106_v52 = vsel %vm101_vm4, %v103_v33, %v105_v47  ;;  %v130_v58 = vsel %vm125_vm6, %v127_v29, %v129_v49  ;;  %v1234_v1 = vrot.slane %v1228_v54, 6  ;;  %v1235_v2 = vrot.slane %v1229_v59, 6 }
  0x36   :  { %v133_v55 = vadd.f32 %v128_v44, %v119_v48  ;;  %v110_v56 = vadd.f32 %v106_v52, %v94_v40  ;;  %v16845_v57 = vpack.c.bf16 %v241_v51, %v234_v50  ;;  %v1244_v5 = vsel %vm75_vm1, %v1228_v54, %v1231_v62 }
  0x37   :  { %v1240_v6 = vrot.slane %v1229_v59, 5  ;;  %v1236_v9 = vsel %vm64_vm0, %v1234_v1, %v1235_v2  ;;  %v1242_v10 = vrot.slane %v1229_v59, 4  ;;  %v1245_v15 = vsel %vm64_vm0, %v1244_v5, %v1234_v1 }
  0x38   :  { %v137_v60 = vsel %vm135_vm7, %v133_v55, 0  ;;  %v120_v61 = vadd.f32 %v116_v53, %v110_v56  ;;  %15824 = vmatprep.subr.bf16.mxu0 %v16845_v57  ;;  %15848 = vmatprep.subr.bf16.mxu1 %v16845_v57  ;;  %v1253_v20 = vrot.slane %v1236_v9, 1  ;;  %v1252_v21 = vrot.slane %v1245_v15, 1 }
  0x39   :  { %v16849_v63 = vand.u32 4294901760, %v137_v60  ;;  %v1246_v16 = vsel %vm64_vm0, %v1235_v2, %v1240_v6  ;;  %v1261_v22 = vmul.f32 1.6, %v1245_v15  ;;  %v1262_v23 = vmul.f32 1.6, %v1236_v9  ;;  %v2425_v2 = vld [vmem:[#allocation2 + $0x18] sm:$0xff] }
  0x3a   :  { %v134_v0 = vadd.f32 %v130_v58, %v120_v61  ;;  %v1247_v24 = vsel %vm79_vm2, %v1246_v16, %v1242_v10  ;;  %v16869_v26 = vpack.c.bf16 %v16823_v17, %v16818_v13  ;;  %v1248_v28 = vmul.f32 0.2, %v1245_v15 }
  0x3b   :  { %v16854_v3 = vsub.f32 %v137_v60, %v16849_v63  ;;  %v1255_v29 = vrot.slane %v1247_v24, 1  ;;  %v1263_v30 = vmul.f32 1.6, %v1247_v24  ;;  %v1254_v31 = vsel %vm85_vm3, %v1252_v21, %v1253_v20 }
  0x3c   :  { %v140_v4 = vsel %vm135_vm7, %v134_v0, 0  ;;  %v1267_v32 = vrot.slane %v1261_v22, 2  ;;  %v1268_v33 = vrot.slane %v1262_v23, 2  ;;  %v1249_v34 = vmul.f32 0.2, %v1236_v9 }
  0x3d   :  { %v211_v7 = vand.u32 4294901760, %v16854_v3  ;;  %v16859_v8 = vand.u32 4294901760, %v140_v4  ;;  %v1259_v35 = vadd.f32 %v1254_v31, %v1248_v28  ;;  %v1256_v36 = vsel %vm85_vm3, %v1253_v20, %v1255_v29 }
  0x3e   :  { %v1270_v39 = vrot.slane %v1263_v30, 2  ;;  %v1269_v40 = vsel %vm101_vm4, %v1267_v32, %v1268_v33  ;;  %v1276_v41 = vrot.slane %v1245_v15, 3  ;;  %v1277_v42 = vrot.slane %v1236_v9, 3 }
  0x3f   :  { %v212_v12 = vsub.f32 %v16854_v3, %v211_v7  ;;  %v220_v14 = vsub.f32 %v140_v4, %v16859_v8  ;;  %v1260_v43 = vadd.f32 %v1256_v36, %v1249_v34  ;;  %v1274_v44 = vadd.f32 %v1269_v40, %v1259_v35 }
  0x40   :  { %v1271_v45 = vsel %vm101_vm4, %v1268_v33, %v1270_v39  ;;  %v1279_v46 = vrot.slane %v1247_v24, 3  ;;  %v1285_v47 = vmul.f32 0.2, %v1247_v24  ;;  %v1278_v48 = vsel %vm111_vm5, %v1276_v41, %v1277_v42 }
  0x41   :  { %v213_v18 = vand.u32 4294901760, %v212_v12  ;;  %v221_v19 = vand.u32 4294901760, %v220_v14  ;;  %v1289_v49 = vrot.slane %v1248_v28, 4  ;;  %v1290_v50 = vrot.slane %v1249_v34, 4 }
  0x42   :  { %v1275_v51 = vadd.f32 %v1271_v45, %v1260_v43  ;;  %v1283_v52 = vadd.f32 %v1278_v48, %v1274_v44  ;;  %v1280_v53 = vsel %vm111_vm5, %v1277_v42, %v1279_v46  ;;  %v1292_v54 = vrot.slane %v1285_v47, 4 }
  0x43   :  { %14815 = vmatprep.mubr.f32.mxu0 %v213_v18  ;;  %v222_v25 = vsub.f32 %v220_v14, %v221_v19  ;;  %v1291_v55 = vsel %vm125_vm6, %v1289_v49, %v1290_v50  ;;  %v16889_v58 = vpack.c.bf16 %v239_v38, %v232_v37  ;;  %v2424_v38 = vld [vmem:[#allocation2 + $0x10] sm:$0xff]  ;;  %v2431_v6 = vrot.slane %v2425_v2, 6 }
  0x44   :  { %v1284_v56 = vadd.f32 %v1280_v53, %v1275_v51  ;;  %v1296_v59 = vadd.f32 %v1291_v55, %v1283_v52  ;;  %v1293_v60 = vsel %vm125_vm6, %v1290_v50, %v1292_v54  ;;  %v2427_v4 = vrot.slane %v2424_v38, 7 }
  0x45   :  { %v223_v27 = vand.u32 4294901760, %v222_v25  ;;  %v2430_v5 = vrot.slane %v2424_v38, 6  ;;  %v2436_v9 = vrot.slane %v2425_v2, 5  ;;  %v2438_v15 = vrot.slane %v2425_v2, 4 }
  0x46   :  { %v1297_v61 = vadd.f32 %v1293_v60, %v1284_v56  ;;  %v1299_v62 = vsel %vm135_vm7, %v1296_v59, 0  ;;  %v2440_v12 = vsel %vm75_vm1, %v2424_v38, %v2427_v4  ;;  %v3587_v38 = vld [vmem:[#allocation5 + $0x10] sm:$0xff] }
  0x47   :  { %14816 = vmatmul.mubr.f32.vlgmr.msra.gmra.mrb[0].mxu0 %v223_v27  ;;  %v16895_v0 = vand.u32 4294901760, %v1299_v62  ;;  %v2441_v18 = vsel %vm64_vm0, %v2440_v12, %v2430_v5 }
  0x48   :  { %15826 = vmatpush3.bf16.msra.mxu0 %v16845_v57  ;;  %14822 = vmatprep.mubr.f32.mxu0 %v16849_v63  ;;  %v1302_v13 = vsel %vm135_vm7, %v1297_v61, 0  ;;  %v2448_v21 = vrot.slane %v2441_v18, 1  ;;  %v2457_v22 = vmul.f32 1.6, %v2441_v18  ;;  %v2444_v27 = vmul.f32 0.2, %v2441_v18 }
  0x49   :  { %15828 = vmatprep.subr.bf16.mxu0 %v16869_v26  ;;  %v16898_v17 = vand.u32 4294901760, %v1302_v13  ;;  %v16903_v37 = vsub.f32 %v1299_v62, %v16895_v0  ;;  %v2472_v39 = vrot.slane %v2441_v18, 3 }
  0x4a   :  { %v2463_v31 = vrot.slane %v2457_v22, 2  ;;  %v2485_v47 = vrot.slane %v2444_v27, 4 }
  0x4b   :  { %v16907_v1 = vsub.f32 %v1302_v13, %v16898_v17 }
  0x4f   :  { %14823 = vmatmul.mubr.f32.vlgmr.msra.gmra.mrb[0].mxu0 %v16859_v8 }
  0x50   :  { %15830 = vmatpush3.bf16.msra.mxu0 %v16869_v26  ;;  %14829 = vmatprep.mubr.f32.mxu0 %v16854_v3  ;;  %v1373_v3 = vand.u32 4294901760, %v16903_v37 }
  0x51   :  { %15832 = vmatprep.subr.bf16.mxu0 %v16815_v11 }
  0x52   :  { %v1374_v10 = vsub.f32 %v16903_v37, %v1373_v3 }
  0x57   :  { %14830 = vmatmul.mubr.f32.vlgmr.msra.gmra.mrb[0].mxu0 %v220_v14  ;;  %v2432_v14 = vsel %vm64_vm0, %v2430_v5, %v2431_v6  ;;  %v3593_v5 = vrot.slane %v3587_v38, 6 }
  0x58   :  { %15834 = vmatpush3.bf16.msra.mxu0 %v16815_v11  ;;  %14836 = vmatprep.mubr.f32.mxu0 %v211_v7  ;;  %v1383_v7 = vand.u32 4294901760, %v16907_v1  ;;  %v2449_v20 = vrot.slane %v2432_v14, 1  ;;  %v2458_v23 = vmul.f32 1.6, %v2432_v14  ;;  %v2445_v33 = vmul.f32 0.2, %v2432_v14 }
  0x59   :  { %15836 = vmatprep.subr.bf16.mxu0 %v16889_v58  ;;  %v2473_v40 = vrot.slane %v2432_v14, 3 }
  0x5a   :  { %v1384_v16 = vsub.f32 %v16907_v1, %v1383_v7  ;;  %v2450_v30 = vsel %vm85_vm3, %v2448_v21, %v2449_v20  ;;  %v2464_v32 = vrot.slane %v2458_v23, 2  ;;  %v2486_v48 = vrot.slane %v2445_v33, 4 }
  0x5b   :  { %v2474_v46 = vsel %vm111_vm5, %v2472_v39, %v2473_v40 }
  0x5c   :  { %v1385_v25 = vand.u32 4294901760, %v1384_v16  ;;  %v2465_v36 = vsel %vm101_vm4, %v2463_v31, %v2464_v32  ;;  %v2487_v53 = vsel %vm125_vm6, %v2485_v47, %v2486_v48 }
  0x5f   :  { %14837 = vmatmul.mubr.f32.vlgmr.msra.gmra.mrb[0].mxu0 %v221_v19  ;;  %v2442_v19 = vsel %vm64_vm0, %v2431_v6, %v2436_v9 }
  0x60   :  { %15838 = vmatpush3.bf16.msra.mxu0 %v16889_v58  ;;  %14843 = vmatprep.mubr.f32.mxu0 %v16849_v63  ;;  %v2443_v24 = vsel %vm79_vm2, %v2442_v19, %v2438_v15 }
  0x61   :  { %15840 = vmatprep.subr.bf16.mxu0 %v16815_v11  ;;  %v2451_v28 = vrot.slane %v2443_v24, 1  ;;  %v2459_v29 = vmul.f32 1.6, %v2443_v24  ;;  %v2475_v44 = vrot.slane %v2443_v24, 3  ;;  %v2481_v45 = vmul.f32 0.2, %v2443_v24 }
  0x63   :  { %v2452_v34 = vsel %vm85_vm3, %v2449_v20, %v2451_v28  ;;  %v2466_v35 = vrot.slane %v2459_v29, 2  ;;  %v2476_v51 = vsel %vm111_vm5, %v2473_v40, %v2475_v44  ;;  %v2488_v52 = vrot.slane %v2481_v45, 4 }
  0x64   :  { %v2456_v41 = vadd.f32 %v2452_v34, %v2445_v33 }
  0x65   :  { %v2467_v43 = vsel %vm101_vm4, %v2464_v32, %v2466_v35  ;;  %v2489_v56 = vsel %vm125_vm6, %v2486_v48, %v2488_v52 }
  0x66   :  { %v2471_v49 = vadd.f32 %v2467_v43, %v2456_v41 }
  0x67   :  { %14844 = vmatmul.mubr.f32.vlgmr.msra.gmra.mrb[0].mxu0 %v16859_v8 }
  0x68   :  { %15842 = vmatpush3.bf16.msra.mxu0 %v16815_v11  ;;  %14850 = vmatprep.mubr.f32.mxu0 %v16849_v63  ;;  %v1375_v63 = vand.u32 4294901760, %v1374_v10  ;;  %v2480_v54 = vadd.f32 %v2476_v51, %v2471_v49 }
  0x69   :  { %15868 = vmatprep.subr.bf16.mxu0 %v16815_v11 }
  0x6a   :  { %v2493_v59 = vadd.f32 %v2489_v56, %v2480_v54 }
  0x6c   :  { %v2498_v62 = vsel %vm135_vm7, %v2493_v59, 0 }
  0x6d   :  { %v16955_v13 = vand.u32 4294901760, %v2498_v62 }
  0x6f   :  { %14851 = vmatmul.mubr.f32.vlgmr.msra.gmra.mrb[0].mxu0 %v16859_v8  ;;  %v2455_v8 = vadd.f32 %v2450_v30, %v2444_v27  ;;  %v16964_v2 = vsub.f32 %v2498_v62, %v16955_v13 }
  0x70   :  { %15870 = vmatpush3.bf16.msra.mxu0 %v16815_v11  ;;  %14899 = vmatprep.mubr.f32.mxu0 %v1375_v63 }
  0x71   :  { %15872 = vmatprep.subr.bf16.mxu0 %v16845_v57  ;;  %v2470_v42 = vadd.f32 %v2465_v36, %v2455_v8  ;;  %v2579_v6 = vand.u32 4294901760, %v16964_v2 }
  0x73   :  { %14900 = vmatmul.mubr.f32.vlgmr.msra.gmra.mrb[2].mxu0 %v1385_v25  ;;  %v2479_v50 = vadd.f32 %v2474_v46, %v2470_v42  ;;  %v2580_v16 = vsub.f32 %v16964_v2, %v2579_v6 }
  0x74   :  { %15874 = vmatpush3.bf16.msra.mxu0 %v16845_v57  ;;  %14906 = vmatprep.mubr.f32.mxu0 %v16895_v0 }
  0x75   :  { %15876 = vmatprep.subr.bf16.mxu0 %v16869_v26  ;;  %v2492_v55 = vadd.f32 %v2487_v53, %v2479_v50  ;;  %v2581_v24 = vand.u32 4294901760, %v2580_v16 }
  0x77   :  { %v2495_v60 = vsel %vm135_vm7, %v2492_v55, 0 }
  0x78   :  { %v16950_v61 = vand.u32 4294901760, %v2495_v60 }
  0x7b   :  { %14907 = vmatmul.mubr.f32.vlgmr.msra.gmra.mrb[2].mxu0 %v16898_v17 }
  0x7c   :  { %15878 = vmatpush3.bf16.msra.mxu0 %v16869_v26  ;;  %14913 = vmatprep.mubr.f32.mxu0 %v16903_v37  ;;  %v16960_v37 = vsub.f32 %v2495_v60, %v16950_v61 }
  0x7d   :  { %15880 = vmatprep.subr.bf16.mxu0 %v16815_v11 }
  0x7e   :  { %v2569_v4 = vand.u32 4294901760, %v16960_v37 }
  0x80   :  { %v2570_v12 = vsub.f32 %v16960_v37, %v2569_v4 }
  0x82   :  { %v2571_v63 = vand.u32 4294901760, %v2570_v12 }
  0x83   :  { %14914 = vmatmul.mubr.f32.vlgmr.msra.gmra.mrb[2].mxu0 %v16907_v1  ;;  %v3588_v1 = vld [vmem:[#allocation5 + $0x18] sm:$0xff] }
  0x84   :  { %15882 = vmatpush3.bf16.msra.mxu0 %v16815_v11  ;;  %14920 = vmatprep.mubr.f32.mxu0 %v1373_v3  ;;  %v3590_v3 = vrot.slane %v3587_v38, 7  ;;  %v3599_v10 = vrot.slane %v3588_v1, 5  ;;  %v3601_v15 = vrot.slane %v3588_v1, 4 }
  0x85   :  { %15884 = vmatprep.subr.bf16.mxu0 %v16889_v58 }
  0x86   :  { %v3603_v9 = vsel %vm75_vm1, %v3587_v38, %v3590_v3  ;;  %v4783_v38 = vld [vmem:[#allocation2 + $0x20] sm:$0xff] }
  0x87   :  { %v3604_v14 = vsel %vm64_vm0, %v3603_v9, %v3593_v5 }
  0x88   :  { %v3611_v20 = vrot.slane %v3604_v14, 1  ;;  %v3620_v21 = vmul.f32 1.6, %v3604_v14  ;;  %v3607_v25 = vmul.f32 0.2, %v3604_v14  ;;  %v3635_v35 = vrot.slane %v3604_v14, 3 }
  0x8a   :  { %v3626_v30 = vrot.slane %v3620_v21, 2  ;;  %v3648_v45 = vrot.slane %v3607_v25, 4 }
  0x8b   :  { %14921 = vmatmul.mubr.f32.vlgmr.msra.gmra.mrb[2].mxu0 %v1383_v7  ;;  %v3594_v7 = vrot.slane %v3588_v1, 6 }
  0x8c   :  { %15886 = vmatpush3.bf16.msra.mxu0 %v16889_v58  ;;  %14927 = vmatprep.mubr.f32.mxu0 %v16895_v0 }
  0x8d   :  { %15888 = vmatprep.subr.bf16.mxu0 %v16815_v11  ;;  %v3595_v18 = vsel %vm64_vm0, %v3593_v5, %v3594_v7  ;;  %v3605_v19 = vsel %vm64_vm0, %v3594_v7, %v3599_v10  ;;  %v4789_v5 = vrot.slane %v4783_v38, 6 }
  0x8e   :  { %v3621_v22 = vmul.f32 1.6, %v3595_v18  ;;  %v3606_v23 = vsel %vm79_vm2, %v3605_v19, %v3601_v15  ;;  %v3608_v32 = vmul.f32 0.2, %v3595_v18  ;;  %v3636_v36 = vrot.slane %v3595_v18, 3 }
  0x8f   :  { %v3614_v27 = vrot.slane %v3606_v23, 1  ;;  %v3622_v28 = vmul.f32 1.6, %v3606_v23  ;;  %v3638_v42 = vrot.slane %v3606_v23, 3  ;;  %v3644_v43 = vmul.f32 0.2, %v3606_v23 }
  0x90   :  { %v3627_v31 = vrot.slane %v3621_v22, 2  ;;  %v3637_v44 = vsel %vm111_vm5, %v3635_v35, %v3636_v36  ;;  %v3649_v46 = vrot.slane %v3608_v32, 4 }
  0x91   :  { %v3629_v8 = vrot.slane %v3622_v28, 2  ;;  %v3639_v49 = vsel %vm111_vm5, %v3636_v36, %v3638_v42  ;;  %v3651_v50 = vrot.slane %v3644_v43, 4 }
  0x92   :  { %v3628_v34 = vsel %vm101_vm4, %v3626_v30, %v3627_v31  ;;  %v3650_v51 = vsel %vm125_vm6, %v3648_v45, %v3649_v46 }
  0x93   :  { %14928 = vmatmul.mubr.f32.vlgmr.msra.gmra.mrb[2].mxu0 %v16898_v17  ;;  %v3630_v41 = vsel %vm101_vm4, %v3627_v31, %v3629_v8  ;;  %v3652_v54 = vsel %vm125_vm6, %v3649_v46, %v3651_v50 }
  0x94   :  { %15890 = vmatpush3.bf16.msra.mxu0 %v16815_v11  ;;  %14934 = vmatprep.mubr.f32.mxu0 %v16895_v0  ;;  %v3612_v0 = vrot.slane %v3595_v18, 1 }
  0x95   :  { %15916 = vmatprep.subr.bf16.mxu0 %v16815_v11 }
  0x96   :  { %v3613_v29 = vsel %vm85_vm3, %v3611_v20, %v3612_v0  ;;  %v3615_v33 = vsel %vm85_vm3, %v3612_v0, %v3614_v27 }
  0x97   :  { %v3619_v39 = vadd.f32 %v3615_v33, %v3608_v32 }
  0x99   :  { %v3634_v47 = vadd.f32 %v3630_v41, %v3619_v39 }
  0x9b   :  { %14935 = vmatmul.mubr.f32.vlgmr.msra.gmra.mrb[2].mxu0 %v16898_v17  ;;  %v3618_v17 = vadd.f32 %v3613_v29, %v3607_v25  ;;  %v3643_v52 = vadd.f32 %v3639_v49, %v3634_v47 }
  0x9c   :  { %15918 = vmatpush3.bf16.msra.mxu0 %v16815_v11  ;;  %14983 = vmatprep.mubr.f32.mxu0 %v2571_v63 }
  0x9d   :  { %15920 = vmatprep.subr.bf16.mxu0 %v16845_v57  ;;  %v3633_v40 = vadd.f32 %v3628_v34, %v3618_v17  ;;  %v3656_v55 = vadd.f32 %v3652_v54, %v3643_v52 }
  0x9f   :  { %14984 = vmatmul.mubr.f32.vlgmr.msra.gmra.mrb[4].mxu0 %v2581_v24  ;;  %v3642_v48 = vadd.f32 %v3637_v44, %v3633_v40  ;;  %v3661_v60 = vsel %vm135_vm7, %v3656_v55, 0 }
  0xa0   :  { %15922 = vmatpush3.bf16.msra.mxu0 %v16845_v57  ;;  %14990 = vmatprep.mubr.f32.mxu0 %v16950_v61  ;;  %v17012_v62 = vand.u32 4294901760, %v3661_v60 }
  0xa1   :  { %15924 = vmatprep.subr.bf16.mxu0 %v16869_v26  ;;  %v3655_v53 = vadd.f32 %v3650_v51, %v3642_v48 }
  0xa2   :  { %v17021_v3 = vsub.f32 %v3661_v60, %v17012_v62 }
  0xa3   :  { %v3658_v56 = vsel %vm135_vm7, %v3655_v53, 0 }
  0xa4   :  { %v17007_v59 = vand.u32 4294901760, %v3658_v56 }
  0xa7   :  { %14991 = vmatmul.mubr.f32.vlgmr.msra.gmra.mrb[4].mxu0 %v16955_v13 }
  0xa8   :  { %15926 = vmatpush3.bf16.msra.mxu0 %v16869_v26  ;;  %14997 = vmatprep.mubr.f32.mxu0 %v16960_v37  ;;  %v17017_v37 = vsub.f32 %v3658_v56, %v17007_v59 }
  0xa9   :  { %15928 = vmatprep.subr.bf16.mxu0 %v16815_v11 }
  0xaa   :  { %v3732_v1 = vand.u32 4294901760, %v17017_v37 }
  0xac   :  { %v3733_v12 = vsub.f32 %v17017_v37, %v3732_v1 }
  0xae   :  { %v3734_v63 = vand.u32 4294901760, %v3733_v12 }
  0xaf   :  { %14998 = vmatmul.mubr.f32.vlgmr.msra.gmra.mrb[4].mxu0 %v16964_v2  ;;  %v4784_v2 = vld [vmem:[#allocation2 + $0x28] sm:$0xff] }
  0xb0   :  { %15930 = vmatpush3.bf16.msra.mxu0 %v16815_v11  ;;  %15004 = vmatprep.mubr.f32.mxu0 %v2569_v4  ;;  %v4786_v4 = vrot.slane %v4783_v38, 7  ;;  %v4790_v7 = vrot.slane %v4784_v2, 6  ;;  %v4795_v10 = vrot.slane %v4784_v2, 5  ;;  %v4797_v15 = vrot.slane %v4784_v2, 4  ;;  %v5947_v2 = vld [vmem:[#allocation5 + $0x28] sm:$0xff] }
  0xb1   :  { %15932 = vmatprep.subr.bf16.mxu0 %v16889_v58 }
  0xb2   :  { %v4799_v9 = vsel %vm75_vm1, %v4783_v38, %v4786_v4  ;;  %v4791_v18 = vsel %vm64_vm0, %v4789_v5, %v4790_v7  ;;  %v4801_v19 = vsel %vm64_vm0, %v4790_v7, %v4795_v10  ;;  %v5946_v38 = vld [vmem:[#allocation5 + $0x20] sm:$0xff] }
  0xb3   :  { %v4800_v14 = vsel %vm64_vm0, %v4799_v9, %v4789_v5  ;;  %v4817_v21 = vmul.f32 1.6, %v4791_v18  ;;  %v4802_v22 = vsel %vm79_vm2, %v4801_v19, %v4797_v15  ;;  %v4804_v31 = vmul.f32 0.2, %v4791_v18 }
  0xb4   :  { %v4807_v20 = vrot.slane %v4800_v14, 1  ;;  %v4816_v0 = vmul.f32 1.6, %v4800_v14  ;;  %v4803_v24 = vmul.f32 0.2, %v4800_v14  ;;  %v4810_v25 = vrot.slane %v4802_v22, 1 }
  0xb5   :  { %v4818_v27 = vmul.f32 1.6, %v4802_v22  ;;  %v4823_v30 = vrot.slane %v4817_v21, 2  ;;  %v4831_v8 = vrot.slane %v4800_v14, 3  ;;  %v4832_v34 = vrot.slane %v4791_v18, 3 }
  0xb6   :  { %v4822_v29 = vrot.slane %v4816_v0, 2  ;;  %v4834_v40 = vrot.slane %v4802_v22, 3  ;;  %v4840_v41 = vmul.f32 0.2, %v4802_v22  ;;  %v4844_v43 = vrot.slane %v4803_v24, 4 }
  0xb7   :  { %15005 = vmatmul.mubr.f32.vlgmr.msra.gmra.mrb[4].mxu0 %v2579_v6  ;;  %v3742_v6 = vand.u32 4294901760, %v17021_v3  ;;  %v4825_v17 = vrot.slane %v4818_v27, 2  ;;  %v4833_v42 = vsel %vm111_vm5, %v4831_v8, %v4832_v34  ;;  %v4845_v44 = vrot.slane %v4804_v31, 4 }
  0xb8   :  { %15934 = vmatpush3.bf16.msra.mxu0 %v16889_v58  ;;  %15011 = vmatprep.mubr.f32.mxu0 %v16950_v61  ;;  %v4824_v33 = vsel %vm101_vm4, %v4822_v29, %v4823_v30  ;;  %v4835_v47 = vsel %vm111_vm5, %v4832_v34, %v4834_v40  ;;  %v4847_v48 = vrot.slane %v4840_v41, 4  ;;  %v5949_v4 = vrot.slane %v5946_v38, 7 }
  0xb9   :  { %15936 = vmatprep.subr.bf16.mxu0 %v16815_v11  ;;  %v3743_v16 = vsub.f32 %v17021_v3, %v3742_v6  ;;  %v4826_v39 = vsel %vm101_vm4, %v4823_v30, %v4825_v17  ;;  %v4846_v49 = vsel %vm125_vm6, %v4844_v43, %v4845_v44  ;;  %v5952_v5 = vrot.slane %v5946_v38, 6 }
  0xba   :  { %v4848_v52 = vsel %vm125_vm6, %v4845_v44, %v4847_v48  ;;  %v5962_v7 = vsel %vm75_vm1, %v5946_v38, %v5949_v4  ;;  %v5958_v9 = vrot.slane %v5947_v2, 5  ;;  %v5960_v15 = vrot.slane %v5947_v2, 4  ;;  %v7143_v38 = vld [vmem:[#allocation2 + $0x38] sm:$0xff] }
  0xbb   :  { %v3744_v23 = vand.u32 4294901760, %v3743_v16  ;;  %v5963_v14 = vsel %vm64_vm0, %v5962_v7, %v5952_v5 }
  0xbc   :  { %v5994_v17 = vrot.slane %v5963_v14, 3 }
  0xbf   :  { %15012 = vmatmul.mubr.f32.vlgmr.msra.gmra.mrb[4].mxu0 %v16955_v13 }
  0xc0   :  { %15938 = vmatpush3.bf16.msra.mxu0 %v16815_v11  ;;  %15018 = vmatprep.mubr.f32.mxu0 %v16950_v61  ;;  %v4808_v61 = vrot.slane %v4791_v18, 1 }
  0xc1   :  { %15964 = vmatprep.subr.bf16.mxu0 %v16815_v11 }
  0xc2   :  { %v4809_v28 = vsel %vm85_vm3, %v4807_v20, %v4808_v61  ;;  %v4811_v32 = vsel %vm85_vm3, %v4808_v61, %v4810_v25  ;;  %v5970_v20 = vrot.slane %v5963_v14, 1  ;;  %v5979_v61 = vmul.f32 1.6, %v5963_v14 }
  0xc3   :  { %v4815_v35 = vadd.f32 %v4811_v32, %v4804_v31 }
  0xc5   :  { %v4830_v45 = vadd.f32 %v4826_v39, %v4815_v35 }
  0xc7   :  { %15019 = vmatmul.mubr.f32.vlgmr.msra.gmra.mrb[4].mxu0 %v16955_v13  ;;  %v4814_v13 = vadd.f32 %v4809_v28, %v4803_v24  ;;  %v4839_v50 = vadd.f32 %v4835_v47, %v4830_v45  ;;  %v5985_v28 = vrot.slane %v5979_v61, 2 }
  0xc8   :  { %15966 = vmatpush3.bf16.msra.mxu0 %v16815_v11  ;;  %15067 = vmatprep.mubr.f32.mxu0 %v3734_v63 }
  0xc9   :  { %15968 = vmatprep.subr.bf16.mxu0 %v16845_v57  ;;  %v4829_v36 = vadd.f32 %v4824_v33, %v4814_v13  ;;  %v4852_v53 = vadd.f32 %v4848_v52, %v4839_v50 }
  0xcb   :  { %15068 = vmatmul.mubr.f32.vlgmr.msra.gmra.mrb[6].mxu0 %v3744_v23  ;;  %v4838_v46 = vadd.f32 %v4833_v42, %v4829_v36  ;;  %v4857_v56 = vsel %vm135_vm7, %v4852_v53, 0  ;;  %v5966_v23 = vmul.f32 0.2, %v5963_v14  ;;  %v7142_v53 = vld [vmem:[#allocation2 + $0x30] sm:$0xff] }
  0xcc   :  { %15970 = vmatpush3.bf16.msra.mxu0 %v16845_v57  ;;  %15074 = vmatprep.mubr.f32.mxu0 %v17007_v59  ;;  %v17069_v60 = vand.u32 4294901760, %v4857_v56  ;;  %v7145_v4 = vrot.slane %v7142_v53, 7 }
  0xcd   :  { %15972 = vmatprep.subr.bf16.mxu0 %v16869_v26  ;;  %v4851_v51 = vadd.f32 %v4846_v49, %v4838_v46  ;;  %v6007_v41 = vrot.slane %v5966_v23, 4 }
  0xce   :  { %v7158_v7 = vsel %vm75_vm1, %v7142_v53, %v7145_v4 }
  0xcf   :  { %v4854_v54 = vsel %vm135_vm7, %v4851_v51, 0 }
  0xd0   :  { %v17064_v55 = vand.u32 4294901760, %v4854_v54 }
  0xd3   :  { %15075 = vmatmul.mubr.f32.vlgmr.msra.gmra.mrb[6].mxu0 %v17012_v62 }
  0xd4   :  { %15974 = vmatpush3.bf16.msra.mxu0 %v16869_v26  ;;  %15081 = vmatprep.mubr.f32.mxu0 %v17017_v37  ;;  %v17074_v37 = vsub.f32 %v4854_v54, %v17064_v55 }
  0xd5   :  { %15976 = vmatprep.subr.bf16.mxu0 %v16815_v11 }
  0xdb   :  { %15082 = vmatmul.mubr.f32.vlgmr.msra.gmra.mrb[6].mxu0 %v17021_v3  ;;  %v4928_v3 = vand.u32 4294901760, %v17074_v37 }
  0xdc   :  { %15978 = vmatpush3.bf16.msra.mxu0 %v16815_v11  ;;  %15088 = vmatprep.mubr.f32.mxu0 %v3732_v1  ;;  %v17078_v1 = vsub.f32 %v4857_v56, %v17069_v60 }
  0xdd   :  { %15980 = vmatprep.subr.bf16.mxu0 %v16889_v58  ;;  %v4929_v12 = vsub.f32 %v17074_v37, %v4928_v3 }
  0xde   :  { %v4938_v10 = vand.u32 4294901760, %v17078_v1 }
  0xdf   :  { %v4930_v63 = vand.u32 4294901760, %v4929_v12 }
  0xe0   :  { %v4939_v19 = vsub.f32 %v17078_v1, %v4938_v10 }
  0xe2   :  { %v4940_v22 = vand.u32 4294901760, %v4939_v19 }
  0xe3   :  { %15089 = vmatmul.mubr.f32.vlgmr.msra.gmra.mrb[6].mxu0 %v3742_v6  ;;  %v5953_v6 = vrot.slane %v5947_v2, 6 }
  0xe4   :  { %15982 = vmatpush3.bf16.msra.mxu0 %v16889_v58  ;;  %15095 = vmatprep.mubr.f32.mxu0 %v17007_v59 }
  0xe5   :  { %15984 = vmatprep.subr.bf16.mxu0 %v16815_v11  ;;  %v5954_v16 = vsel %vm64_vm0, %v5952_v5, %v5953_v6  ;;  %v5964_v18 = vsel %vm64_vm0, %v5953_v6, %v5958_v9  ;;  %v7149_v5 = vrot.slane %v7143_v38, 6  ;;  %v7154_v6 = vrot.slane %v7143_v38, 5 }
  0xe6   :  { %v5980_v0 = vmul.f32 1.6, %v5954_v16  ;;  %v5965_v21 = vsel %vm79_vm2, %v5964_v18, %v5960_v15  ;;  %v5967_v30 = vmul.f32 0.2, %v5954_v16  ;;  %v5995_v33 = vrot.slane %v5954_v16, 3 }
  0xe7   :  { %v5973_v24 = vrot.slane %v5965_v21, 1  ;;  %v5981_v25 = vmul.f32 1.6, %v5965_v21  ;;  %v5997_v36 = vrot.slane %v5965_v21, 3  ;;  %v6003_v39 = vmul.f32 0.2, %v5965_v21 }
  0xe8   :  { %v5986_v29 = vrot.slane %v5980_v0, 2  ;;  %v5996_v40 = vsel %vm111_vm5, %v5994_v17, %v5995_v33  ;;  %v6008_v42 = vrot.slane %v5967_v30, 4  ;;  %v7156_v9 = vrot.slane %v7143_v38, 4 }
  0xe9   :  { %v5988_v13 = vrot.slane %v5981_v25, 2  ;;  %v5998_v45 = vsel %vm111_vm5, %v5995_v33, %v5997_v36  ;;  %v6010_v46 = vrot.slane %v6003_v39, 4  ;;  %v7160_v14 = vsel %vm64_vm0, %v7149_v5, %v7154_v6 }
  0xea   :  { %v5987_v32 = vsel %vm101_vm4, %v5985_v28, %v5986_v29  ;;  %v6009_v47 = vsel %vm125_vm6, %v6007_v41, %v6008_v42 }
  0xeb   :  { %15096 = vmatmul.mubr.f32.vlgmr.msra.gmra.mrb[6].mxu0 %v17012_v62  ;;  %v5989_v35 = vsel %vm101_vm4, %v5986_v29, %v5988_v13  ;;  %v6011_v50 = vsel %vm125_vm6, %v6008_v42, %v6010_v46 }
  0xec   :  { %15986 = vmatpush3.bf16.msra.mxu0 %v16815_v11  ;;  %15102 = vmatprep.mubr.f32.mxu0 %v17007_v59  ;;  %v5971_v59 = vrot.slane %v5954_v16, 1  ;;  %v7161_v16 = vsel %vm79_vm2, %v7160_v14, %v7156_v9 }
  0xed   :  { %16012 = vmatprep.subr.bf16.mxu0 %v16815_v11  ;;  %v7169_v0 = vrot.slane %v7161_v16, 1  ;;  %v7177_v21 = vmul.f32 1.6, %v7161_v16 }
  0xee   :  { %v5972_v27 = vsel %vm85_vm3, %v5970_v20, %v5971_v59  ;;  %v5974_v31 = vsel %vm85_vm3, %v5971_v59, %v5973_v24 }
  0xef   :  { %v5978_v8 = vadd.f32 %v5974_v31, %v5967_v30 }
  0xf1   :  { %v5993_v43 = vadd.f32 %v5989_v35, %v5978_v8  ;;  %v7199_v35 = vmul.f32 0.2, %v7161_v16 }
  0xf3   :  { %15103 = vmatmul.mubr.f32.vlgmr.msra.gmra.mrb[6].mxu0 %v17012_v62  ;;  %v5977_v62 = vadd.f32 %v5972_v27, %v5966_v23  ;;  %v6002_v48 = vadd.f32 %v5998_v45, %v5993_v43  ;;  %v7206_v43 = vrot.slane %v7199_v35, 4 }
  0xf4   :  { %16014 = vmatpush3.bf16.msra.mxu0 %v16815_v11  ;;  %15151 = vmatprep.mubr.f32.mxu0 %v4930_v63 }
  0xf5   :  { %16016 = vmatprep.subr.bf16.mxu0 %v16845_v57  ;;  %v5992_v34 = vadd.f32 %v5987_v32, %v5977_v62  ;;  %v6015_v51 = vadd.f32 %v6011_v50, %v6002_v48  ;;  %v7184_v62 = vrot.slane %v7177_v21, 2  ;;  %v8305_v48 = vld [vmem:[#allocation5 + $0x30] sm:$0xff] }
  0xf6   :  { %v8311_v4 = vrot.slane %v8305_v48, 6 }
  0xf7   :  { %15152 = vmatmul.mubr.f32.vlgmr.msra.gmra.mrb[8].mxu0 %v4940_v22  ;;  %v6001_v44 = vadd.f32 %v5996_v40, %v5992_v34  ;;  %v6020_v56 = vsel %vm135_vm7, %v6015_v51, 0  ;;  %v7193_v34 = vrot.slane %v7161_v16, 3  ;;  %v45_v51 = vlaneseq }
  0xf8   :  { %16018 = vmatpush3.bf16.msra.mxu0 %v16845_v57  ;;  %15158 = vmatprep.mubr.f32.mxu0 %v17064_v55  ;;  %v17124_v2 = vand.u32 4294901760, %v6020_v56 }
  0xf9   :  { %16020 = vmatprep.subr.bf16.mxu0 %v16869_v26  ;;  %v6014_v49 = vadd.f32 %v6009_v47, %v6001_v44 }
  0xfa   :  { %v17136_v12 = vsub.f32 %v6020_v56, %v17124_v2 }
  0xfb   :  { %v6017_v52 = vsel %vm135_vm7, %v6014_v49, 0 }
  0xfc   :  { %v17121_v54 = vand.u32 4294901760, %v6017_v52  ;;  %v6101_v18 = vand.u32 4294901760, %v17136_v12 }
  0xfe   :  { %v6102_v22 = vsub.f32 %v17136_v12, %v6101_v18 }
  0xff   :  { %15159 = vmatmul.mubr.f32.vlgmr.msra.gmra.mrb[8].mxu0 %v17069_v60 }
 0x100   :  { %16022 = vmatpush3.bf16.msra.mxu0 %v16869_v26  ;;  %15165 = vmatprep.mubr.f32.mxu0 %v17074_v37  ;;  %v17129_v37 = vsub.f32 %v6017_v52, %v17121_v54  ;;  %v8308_v52 = vrot.slane %v8305_v48, 7 }
 0x101   :  { %16024 = vmatprep.subr.bf16.mxu0 %v16815_v11 }
 0x107   :  { %15166 = vmatmul.mubr.f32.vlgmr.msra.gmra.mrb[8].mxu0 %v17078_v1  ;;  %v6091_v1 = vand.u32 4294901760, %v17129_v37 }
 0x108   :  { %16026 = vmatpush3.bf16.msra.mxu0 %v16815_v11  ;;  %15172 = vmatprep.mubr.f32.mxu0 %v4928_v3  ;;  %v7148_v3 = vrot.slane %v7142_v53, 6  ;;  %v8306_v53 = vld [vmem:[#allocation5 + $0x38] sm:$0xff] }
 0x109   :  { %16028 = vmatprep.subr.bf16.mxu0 %v16889_v58  ;;  %v6092_v19 = vsub.f32 %v17129_v37, %v6091_v1  ;;  %v8312_v6 = vrot.slane %v8306_v53, 6 }
 0x10a   :  { %v7159_v15 = vsel %vm64_vm0, %v7158_v7, %v7148_v3  ;;  %v8317_v7 = vrot.slane %v8306_v53, 5 }
 0x10b   :  { %v7166_v63 = vrot.slane %v7159_v15, 1  ;;  %v7175_v59 = vmul.f32 1.6, %v7159_v15  ;;  %v6093_v23 = vand.u32 4294901760, %v6092_v19  ;;  %v7162_v24 = vmul.f32 0.2, %v7159_v15 }
 0x10c   :  { %v7190_v13 = vrot.slane %v7159_v15, 3  ;;  %v8319_v15 = vrot.slane %v8306_v53, 4  ;;  %v49_v19 = vand.u32 127, %v45_v51 }
 0x10d   :  { %v7181_v28 = vrot.slane %v7175_v59, 2  ;;  %v7203_v40 = vrot.slane %v7162_v24, 4 }
 0x10f   :  { %15173 = vmatmul.mubr.f32.vlgmr.msra.gmra.mrb[8].mxu0 %v4938_v10  ;;  %v7150_v10 = vsel %vm64_vm0, %v7148_v3, %v7149_v5  ;;  %v46_v5 = vshrl.u32 %v45_v51, 7  ;;  %v8321_v3 = vsel %vm75_vm1, %v8305_v48, %v8308_v52 }
 0x110   :  { %16030 = vmatpush3.bf16.msra.mxu0 %v16889_v58  ;;  %15179 = vmatprep.mubr.f32.mxu0 %v17064_v55  ;;  %v7167_v20 = vrot.slane %v7150_v10, 1  ;;  %v7176_v61 = vmul.f32 1.6, %v7150_v10  ;;  %v7163_v25 = vmul.f32 0.2, %v7150_v10  ;;  %v7191_v32 = vrot.slane %v7150_v10, 3 }
 0x111   :  { %16032 = vmatprep.subr.bf16.mxu0 %v16815_v11  ;;  %v17184_v10 = vsel %vm64_vm0, %v8321_v3, %v8311_v4  ;;  %v47_v16 = vadd.s32 8, %v46_v5 }
 0x112   :  { %v7168_v27 = vsel %vm85_vm3, %v7166_v63, %v7167_v20  ;;  %v7182_v29 = vrot.slane %v7176_v61, 2  ;;  %v7170_v30 = vsel %vm85_vm3, %v7167_v20, %v7169_v0  ;;  %v7192_v39 = vsel %vm111_vm5, %v7190_v13, %v7191_v32 }
 0x113   :  { %v7173_v31 = vadd.f32 %v7168_v27, %v7162_v24  ;;  %v7174_v17 = vadd.f32 %v7170_v30, %v7163_v25  ;;  %v7204_v41 = vrot.slane %v7163_v25, 4  ;;  %v7194_v42 = vsel %vm111_vm5, %v7191_v32, %v7193_v34 }
 0x114   :  { %v7183_v33 = vsel %vm101_vm4, %v7181_v28, %v7182_v29  ;;  %v7185_v8 = vsel %vm101_vm4, %v7182_v29, %v7184_v62  ;;  %v17188_v63 = vsel %vm64_vm0, %v8311_v4, %v8312_v6  ;;  %v8323_v20 = vsel %vm64_vm0, %v8312_v6, %v8317_v7 }
 0x115   :  { %v7188_v36 = vadd.f32 %v7183_v33, %v7173_v31  ;;  %v7205_v46 = vsel %vm125_vm6, %v7203_v40, %v7204_v41  ;;  %v7207_v47 = vsel %vm125_vm6, %v7204_v41, %v7206_v43  ;;  %v8338_v0 = vmul.f32 1.6, %v17184_v10 }
 0x116   :  { %v8339_v21 = vmul.f32 1.6, %v17188_v63  ;;  %v54_v24 = vand.u32 1, %v49_v19  ;;  %v50_v25 = vand.u32 1, %v46_v5  ;;  %v17209_v29 = vmul.f32 0.2, %v17184_v10 }
 0x117   :  { %15180 = vmatmul.mubr.f32.vlgmr.msra.gmra.mrb[8].mxu0 %v17069_v60  ;;  %v7197_v44 = vadd.f32 %v7192_v39, %v7188_v36  ;;  %v17226_v32 = vmul.f32 0.2, %v17188_v63  ;;  %v8353_v39 = vrot.slane %v17184_v10, 3 }
 0x118   :  { %16034 = vmatpush3.bf16.msra.mxu0 %v16815_v11  ;;  %15186 = vmatprep.mubr.f32.mxu0 %v17064_v55  ;;  %v6103_v55 = vand.u32 4294901760, %v6102_v22  ;;  %v17202_v22 = vsel %vm79_vm2, %v8323_v20, %v8319_v15  ;;  %v8345_v31 = vrot.slane %v8339_v21, 2  ;;  %vm55_vm9 = vcmp.eq.s32.totalorder %v54_v24, 0 }
 0x119   :  { %16060 = vmatprep.subr.bf16.mxu0 %v16815_v11  ;;  %v7210_v49 = vadd.f32 %v7205_v46, %v7197_v44  ;;  %v8340_v30 = vmul.f32 1.6, %v17202_v22  ;;  %v8332_v13 = vrot.slane %v17202_v22, 1  ;;  %vm52_vm10 = vcmp.eq.s32.totalorder %v50_v25, 0 }
 0x11a   :  { %vm17235_vm12 = vmand %vm52_vm10, %vm55_vm9  ;;  %v8366_v5 = vrot.slane %v17209_v29, 4  ;;  %v8367_v6 = vrot.slane %v17226_v32, 4  ;;  %v8362_v3 = vmul.f32 0.2, %v17202_v22 }
 0x11b   :  { %v7213_v56 = vsel %vm135_vm7, %v7210_v49, 0  ;;  %v8347_v33 = vrot.slane %v8340_v30, 2 }
 0x11c   :  { %v17175_v9 = vand.u32 4294901760, %v7213_v56 }
 0x11e   :  { %v17192_v59 = vsub.f32 %v7213_v56, %v17175_v9 }
 0x11f   :  { %15187 = vmatmul.mubr.f32.vlgmr.msra.gmra.mrb[8].mxu0 %v17069_v60  ;;  %v7189_v60 = vadd.f32 %v7185_v8, %v7174_v17 }
 0x120   :  { %16062 = vmatpush3.bf16.msra.mxu0 %v16815_v11  ;;  %15235 = vmatprep.mubr.f32.mxu0 %v6093_v23  ;;  %v51_v23 = vand.u32 1, %v47_v16  ;;  %v7287_v27 = vand.u32 4294901760, %v17192_v59 }
 0x121   :  { %16064 = vmatprep.subr.bf16.mxu0 %v16845_v57  ;;  %v7198_v45 = vadd.f32 %v7194_v42, %v7189_v60  ;;  %v8354_v60 = vrot.slane %v17188_v63, 3 }
 0x122   :  { %vm53_vm8 = vcmp.eq.s32.totalorder %v51_v23, 0 }
 0x123   :  { %15236 = vmatmul.mubr.f32.vlgmr.msra.gmra.mrb[10].mxu0 %v6103_v55  ;;  %v7211_v50 = vadd.f32 %v7207_v47, %v7198_v45  ;;  %v8344_v55 = vrot.slane %v8338_v0, 2  ;;  %vm17229_vm11 = vmand %vm53_vm8, %vm55_vm9  ;;  %v8348_v47 = vsel %vm101_vm4, %v8345_v31, %v8347_v33  ;;  %v8355_v56 = vsel %vm111_vm5, %v8353_v39, %v8354_v60 }
 0x124   :  { %16066 = vmatpush3.bf16.msra.mxu0 %v16845_v57  ;;  %15242 = vmatprep.mubr.f32.mxu0 %v17121_v54 }
 0x125   :  { %16068 = vmatprep.subr.bf16.mxu0 %v16869_v26  ;;  %v7216_v38 = vsel %vm135_vm7, %v7211_v50, 0  ;;  %v8346_v34 = vsel %vm101_vm4, %v8344_v55, %v8345_v31 }
 0x126   :  { %v17177_v14 = vand.u32 4294901760, %v7216_v38 }
 0x128   :  { %v17195_v61 = vsub.f32 %v7216_v38, %v17177_v14  ;;  %v8356_v38 = vrot.slane %v17202_v22, 3 }
 0x12a   :  { %v7297_v28 = vand.u32 4294901760, %v17195_v61 }
 0x12b   :  { %15243 = vmatmul.mubr.f32.vlgmr.msra.gmra.mrb[10].mxu0 %v17124_v2 }
 0x12c   :  { %16070 = vmatpush3.bf16.msra.mxu0 %v16869_v26  ;;  %15249 = vmatprep.mubr.f32.mxu0 %v17129_v37  ;;  %v8329_v37 = vrot.slane %v17184_v10, 1 }
 0x12d   :  { %16072 = vmatprep.subr.bf16.mxu0 %v16815_v11 }
 0x133   :  { %15250 = vmatmul.mubr.f32.vlgmr.msra.gmra.mrb[10].mxu0 %v17136_v12  ;;  %v7288_v12 = vsub.f32 %v17192_v59, %v7287_v27 }
 0x134   :  { %16074 = vmatpush3.bf16.msra.mxu0 %v16815_v11  ;;  %15256 = vmatprep.mubr.f32.mxu0 %v6091_v1  ;;  %v8330_v1 = vrot.slane %v17188_v63, 1 }
 0x135   :  { %16076 = vmatprep.subr.bf16.mxu0 %v16889_v58  ;;  %v7289_v41 = vand.u32 4294901760, %v7288_v12 }
 0x136   :  { %v8331_v62 = vsel %vm85_vm3, %v8329_v37, %v8330_v1  ;;  %v8333_v35 = vsel %vm85_vm3, %v8330_v1, %v8332_v13 }
 0x137   :  { %v8336_v17 = vadd.f32 %v8331_v62, %v17209_v29  ;;  %v8337_v46 = vadd.f32 %v8333_v35, %v17226_v32 }
 0x139   :  { %v17245_v45 = vadd.f32 %v8346_v34, %v8336_v17  ;;  %v8352_v15 = vadd.f32 %v8348_v47, %v8337_v46 }
 0x13b   :  { %15257 = vmatmul.mubr.f32.vlgmr.msra.gmra.mrb[10].mxu0 %v6101_v18  ;;  %v17223_v18 = vsub.f32 %v17195_v61, %v7297_v28 }
 0x13c   :  { %16078 = vmatpush3.bf16.msra.mxu0 %v16889_v58  ;;  %15263 = vmatprep.mubr.f32.mxu0 %v17121_v54 }
 0x13d   :  { %16080 = vmatprep.subr.bf16.mxu0 %v16815_v11  ;;  %v7299_v42 = vand.u32 4294901760, %v17223_v18 }
 0x142   :  { %v14852_v40 = vpop.f32.mrb[0].mxu0 }
 0x143   :  { %v645_v43 = vsel %vm17229_vm11, %v14852_v40, 0.0  ;;  %v634_v44 = vpop.f32.mrb[1].mxu0  ;;  %15264 = vmatmul.mubr.f32.vlgmr.msra.gmra.mrb[10].mxu0 %v17124_v2 }
 0x144   :  { %v651_v48 = vrot.slane %v645_v43, 6  ;;  %v656_v49 = vrot.slane %v645_v43, 5  ;;  %v658_v50 = vrot.slane %v645_v43, 4  ;;  %v644_v51 = vsel %vm17235_vm12, %v634_v44, 0.0  ;;  %16082 = vmatpush3.bf16.msra.mxu0 %v16815_v11  ;;  %15270 = vmatprep.mubr.f32.mxu0 %v17121_v54 }
 0x145   :  { %v647_v52 = vrot.slane %v644_v51, 7  ;;  %v650_v53 = vrot.slane %v644_v51, 6  ;;  %16108 = vmatprep.subr.bf16.mxu0 %v16815_v11 }
 0x146   :  { %v662_v4 = vsel %vm64_vm0, %v651_v48, %v656_v49 }
 0x147   :  { %v663_v54 = vsel %vm79_vm2, %v662_v4, %v658_v50  ;;  %v652_v7 = vsel %vm64_vm0, %v650_v53, %v651_v48  ;;  %v660_v10 = vsel %vm75_vm1, %v644_v51, %v647_v52  ;;  %v8357_v50 = vsel %vm111_vm5, %v8354_v60, %v8356_v38 }
 0x148   :  { %v668_v16 = vmul.f32 0.25, %v663_v54  ;;  %v683_v19 = vmul.f32 0.4, %v663_v54  ;;  %v705_v20 = vmul.f32 0.05, %v663_v54  ;;  %v661_v37 = vsel %vm64_vm0, %v660_v10, %v650_v53 }
 0x149   :  { %v664_v1 = vmul.f32 0.05, %v661_v37  ;;  %v665_v0 = vmul.f32 0.05, %v652_v7  ;;  %v666_v21 = vmul.f32 0.25, %v661_v37  ;;  %v667_v23 = vmul.f32 0.25, %v652_v7 }
 0x14a   :  { %v675_v24 = vrot.slane %v668_v16, 1  ;;  %v690_v25 = vrot.slane %v683_v19, 2  ;;  %v699_v29 = vrot.slane %v668_v16, 3  ;;  %v712_v22 = vrot.slane %v705_v20, 4 }
 0x14b   :  { %v672_v30 = vrot.slane %v666_v21, 1  ;;  %v673_v62 = vrot.slane %v667_v23, 1  ;;  %v681_v55 = vmul.f32 0.4, %v661_v37  ;;  %v682_v31 = vmul.f32 0.4, %v652_v7  ;;  %15271 = vmatmul.mubr.f32.vlgmr.msra.gmra.mrb[10].mxu0 %v17124_v2 }
 0x14c   :  { %v696_v13 = vrot.slane %v666_v21, 3  ;;  %v697_v12 = vrot.slane %v667_v23, 3  ;;  %v709_v18 = vrot.slane %v664_v1, 4  ;;  %v710_v32 = vrot.slane %v665_v0, 4  ;;  %16110 = vmatpush3.bf16.msra.mxu0 %v16815_v11  ;;  %15319 = vmatprep.mubr.f32.mxu0 %v7289_v41 }
 0x14d   :  { %v674_v17 = vsel %vm85_vm3, %v672_v30, %v673_v62  ;;  %v676_v33 = vsel %vm85_vm3, %v673_v62, %v675_v24  ;;  %v687_v34 = vrot.slane %v681_v55, 2  ;;  %v688_v35 = vrot.slane %v682_v31, 2  ;;  %16112 = vmatprep.subr.bf16.mxu0 %v16845_v57  ;;  %v9502_v24 = vld [vmem:[#allocation2 + $0x48] sm:$0xff] }
 0x14e   :  { %v679_v39 = vadd.f32 %v674_v17, %v664_v1  ;;  %v680_v40 = vadd.f32 %v676_v33, %v665_v0  ;;  %v698_v43 = vsel %vm111_vm5, %v696_v13, %v697_v12  ;;  %v711_v2 = vsel %vm125_vm6, %v709_v18, %v710_v32 }
 0x14f   :  { %v689_v44 = vsel %vm101_vm4, %v687_v34, %v688_v35  ;;  %v691_v46 = vsel %vm101_vm4, %v688_v35, %v690_v25  ;;  %15320 = vmatmul.mubr.f32.vlgmr.msra.gmra.mrb[12].mxu0 %v7299_v42  ;;  %v700_v41 = vsel %vm111_vm5, %v697_v12, %v699_v29  ;;  %v713_v47 = vsel %vm125_vm6, %v710_v32, %v712_v22 }
 0x150   :  { %v694_v48 = vadd.f32 %v689_v44, %v679_v39  ;;  %v695_v49 = vadd.f32 %v691_v46, %v680_v40  ;;  %16114 = vmatpush3.bf16.msra.mxu0 %v16845_v57  ;;  %15326 = vmatprep.mubr.f32.mxu0 %v17175_v9  ;;  %v8369_v51 = vrot.slane %v8362_v3, 4  ;;  %v8360_v42 = vadd.f32 %v8355_v56, %v17245_v45 }
 0x151   :  { %16116 = vmatprep.subr.bf16.mxu0 %v16869_v26  ;;  %v8361_v4 = vadd.f32 %v8357_v50, %v8352_v15  ;;  %v8368_v10 = vsel %vm125_vm6, %v8366_v5, %v8367_v6  ;;  %v9501_v5 = vld [vmem:[#allocation2 + $0x40] sm:$0xff]  ;;  %v9508_v55 = vrot.slane %v9502_v24, 6  ;;  %v9513_v13 = vrot.slane %v9502_v24, 5 }
 0x152   :  { %v703_v52 = vadd.f32 %v698_v43, %v694_v48  ;;  %v704_v53 = vadd.f32 %v700_v41, %v695_v49  ;;  %v8370_v16 = vsel %vm125_vm6, %v8367_v6, %v8369_v51  ;;  %v8373_v3 = vadd.f32 %v8368_v10, %v8360_v42 }
 0x153   :  { %v8374_v20 = vadd.f32 %v8370_v16, %v8361_v4  ;;  %v9504_v0 = vrot.slane %v9501_v5, 7  ;;  %v9507_v30 = vrot.slane %v9501_v5, 6  ;;  %v9519_v17 = vsel %vm64_vm0, %v9508_v55, %v9513_v13 }
 0x154   :  { %v716_v54 = vadd.f32 %v711_v2, %v703_v52  ;;  %v717_v7 = vadd.f32 %v713_v47, %v704_v53  ;;  %v8376_v37 = vsel %vm135_vm7, %v8373_v3, 0 }
 0x155   :  { %v8379_v1 = vsel %vm135_vm7, %v8374_v20, 0  ;;  %v17312_v25 = vand.u32 4294901760, %v8376_v37  ;;  %v9517_v31 = vsel %vm75_vm1, %v9501_v5, %v9504_v0  ;;  %v17335_v32 = vsel %vm64_vm0, %v9507_v30, %v9508_v55 }
 0x156   :  { %v719_v19 = vsel %vm135_vm7, %v716_v54, 0  ;;  %v722_v63 = vsel %vm135_vm7, %v717_v7, 0  ;;  %v17314_v29 = vand.u32 4294901760, %v8379_v1  ;;  %v9526_v39 = vrot.slane %v17335_v32, 1 }
 0x157   :  { %15327 = vmatmul.mubr.f32.vlgmr.msra.gmra.mrb[12].mxu0 %v17177_v14  ;;  %v17289_v60 = vand.u32 4294901760, %v719_v19  ;;  %v17291_v38 = vand.u32 4294901760, %v722_v63  ;;  %v17323_v12 = vsub.f32 %v8376_v37, %v17312_v25  ;;  %v9535_v43 = vmul.f32 1.6, %v17335_v32 }
 0x158   :  { %16118 = vmatpush3.bf16.msra.mxu0 %v16869_v26  ;;  %15333 = vmatprep.mubr.f32.mxu0 %v17192_v59  ;;  %v17326_v18 = vsub.f32 %v8379_v1, %v17314_v29  ;;  %v17331_v59 = vsel %vm64_vm0, %v9517_v31, %v9507_v30  ;;  %v17374_v52 = vmul.f32 0.2, %v17335_v32  ;;  %v9550_v0 = vrot.slane %v17335_v32, 3 }
 0x159   :  { %16120 = vmatprep.subr.bf16.mxu0 %v16815_v11  ;;  %v17297_v45 = vsub.f32 %v719_v19, %v17289_v60  ;;  %v17300_v56 = vsub.f32 %v722_v63, %v17291_v38  ;;  %v8450_v33 = vand.u32 4294901760, %v17323_v12  ;;  %v9525_v35 = vrot.slane %v17331_v59, 1 }
 0x15a   :  { %v8460_v34 = vand.u32 4294901760, %v17326_v18  ;;  %v9534_v40 = vmul.f32 1.6, %v17331_v59  ;;  %v17364_v44 = vmul.f32 0.2, %v17331_v59  ;;  %v9541_v48 = vrot.slane %v9535_v43, 2 }
 0x15b   :  { %v793_v6 = vand.u32 4294901760, %v17297_v45  ;;  %v803_v15 = vand.u32 4294901760, %v17300_v56  ;;  %v9527_v41 = vsel %vm85_vm3, %v9525_v35, %v9526_v39  ;;  %v9549_v1 = vrot.slane %v17331_v59, 3 }
 0x15c   :  { %v9540_v47 = vrot.slane %v9534_v40, 2  ;;  %v9532_v53 = vadd.f32 %v9527_v41, %v17364_v44 }
 0x15d   :  { %v794_v21 = vsub.f32 %v17297_v45, %v793_v6  ;;  %v804_v23 = vsub.f32 %v17300_v56, %v803_v15 }
 0x15e   :  { %v9542_v10 = vsel %vm101_vm4, %v9540_v47, %v9541_v48 }
 0x15f   :  { %15334 = vmatmul.mubr.f32.vlgmr.msra.gmra.mrb[12].mxu0 %v17195_v61  ;;  %v795_v22 = vand.u32 4294901760, %v794_v21  ;;  %v805_v62 = vand.u32 4294901760, %v804_v23  ;;  %v17356_v61 = vsub.f32 %v17323_v12, %v8450_v33  ;;  %v17392_v23 = vadd.f32 %v9542_v10, %v9532_v53 }
 0x160   :  { %16122 = vmatpush3.bf16.msra.mxu0 %v16815_v11  ;;  %15340 = vmatprep.mubr.f32.mxu0 %v7287_v27  ;;  %v9515_v27 = vrot.slane %v9502_v24, 4 }
 0x161   :  { %14857 = vmatprep.mubr.f32.mxu1 %v795_v22  ;;  %16124 = vmatprep.subr.bf16.mxu0 %v16889_v58  ;;  %v8452_v51 = vand.u32 4294901760, %v17356_v61 }
 0x162   :  { %14858 = vmatmul.mubr.f32.vlgmr.msra.gmra.mrb[0].mxu1 %v805_v62  ;;  %v17347_v2 = vsel %vm79_vm2, %v9519_v17, %v9515_v27 }
 0x163   :  { %15850 = vmatpush3.bf16.msra.mxu1 %v16845_v57  ;;  %14864 = vmatprep.mubr.f32.mxu1 %v17289_v60  ;;  %v9536_v46 = vmul.f32 1.6, %v17347_v2  ;;  %v9528_v49 = vrot.slane %v17347_v2, 1  ;;  %v9552_v55 = vrot.slane %v17347_v2, 3 }
 0x164   :  { %15852 = vmatprep.subr.bf16.mxu1 %v16869_v26 }
 0x165   :  { %v9543_v42 = vrot.slane %v9536_v46, 2  ;;  %v9529_v16 = vsel %vm85_vm3, %v9526_v39, %v9528_v49 }
 0x166   :  { %v9533_v24 = vadd.f32 %v9529_v16, %v17374_v52 }
 0x167   :  { %15341 = vmatmul.mubr.f32.vlgmr.msra.gmra.mrb[12].mxu0 %v7297_v28  ;;  %v17361_v28 = vsub.f32 %v17326_v18, %v8460_v34  ;;  %v9544_v22 = vsel %vm101_vm4, %v9541_v48, %v9543_v42 }
 0x168   :  { %16126 = vmatpush3.bf16.msra.mxu0 %v16889_v58  ;;  %15347 = vmatprep.mubr.f32.mxu0 %v17175_v9 }
 0x169   :  { %16128 = vmatprep.subr.bf16.mxu0 %v16815_v11  ;;  %v8462_v7 = vand.u32 4294901760, %v17361_v28  ;;  %v9548_v28 = vadd.f32 %v9544_v22, %v9533_v24 }
 0x16a   :  { %14865 = vmatmul.mubr.f32.vlgmr.msra.gmra.mrb[0].mxu1 %v17291_v38 }
 0x16b   :  { %15854 = vmatpush3.bf16.msra.mxu1 %v16869_v26  ;;  %14871 = vmatprep.mubr.f32.mxu1 %v17297_v45 }
 0x16c   :  { %15856 = vmatprep.subr.bf16.mxu1 %v16815_v11 }
 0x16e   :  { %v14936_v50 = vpop.f32.mrb[2].mxu0 }
 0x16f   :  { %v1807_v4 = vsel %vm17229_vm11, %v14936_v50, 0.0  ;;  %v1796_v54 = vpop.f32.mrb[3].mxu0  ;;  %15348 = vmatmul.mubr.f32.vlgmr.msra.gmra.mrb[12].mxu0 %v17177_v14 }
 0x170   :  { %v1813_v19 = vrot.slane %v1807_v4, 6  ;;  %v1818_v63 = vrot.slane %v1807_v4, 5  ;;  %v1820_v3 = vrot.slane %v1807_v4, 4  ;;  %v1806_v20 = vsel %vm17235_vm12, %v1796_v54, 0.0  ;;  %16130 = vmatpush3.bf16.msra.mxu0 %v16815_v11  ;;  %15354 = vmatprep.mubr.f32.mxu0 %v17175_v9 }
 0x171   :  { %v1809_v5 = vrot.slane %v1806_v20, 7  ;;  %v1812_v37 = vrot.slane %v1806_v20, 6  ;;  %16156 = vmatprep.subr.bf16.mxu0 %v16815_v11 }
 0x172   :  { %v1824_v21 = vsel %vm64_vm0, %v1813_v19, %v1818_v63  ;;  %14872 = vmatmul.mubr.f32.vlgmr.msra.gmra.mrb[0].mxu1 %v17300_v56 }
 0x173   :  { %v1825_v9 = vsel %vm79_vm2, %v1824_v21, %v1820_v3  ;;  %v1814_v30 = vsel %vm64_vm0, %v1812_v37, %v1813_v19  ;;  %v1822_v62 = vsel %vm75_vm1, %v1806_v20, %v1809_v5  ;;  %15858 = vmatpush3.bf16.msra.mxu1 %v16815_v11  ;;  %14878 = vmatprep.mubr.f32.mxu1 %v793_v6 }
 0x174   :  { %v1830_v31 = vmul.f32 0.25, %v1825_v9  ;;  %v1845_v13 = vmul.f32 0.4, %v1825_v9  ;;  %v1867_v59 = vmul.f32 0.05, %v1825_v9  ;;  %v1823_v27 = vsel %vm64_vm0, %v1822_v62, %v1812_v37  ;;  %15860 = vmatprep.subr.bf16.mxu1 %v16889_v58 }
 0x175   :  { %v1826_v17 = vmul.f32 0.05, %v1823_v27  ;;  %v1827_v35 = vmul.f32 0.05, %v1814_v30  ;;  %v1828_v39 = vmul.f32 0.25, %v1823_v27  ;;  %v1829_v40 = vmul.f32 0.25, %v1814_v30 }
 0x176   :  { %v1837_v43 = vrot.slane %v1830_v31, 1  ;;  %v1852_v61 = vrot.slane %v1845_v13, 2  ;;  %v1861_v46 = vrot.slane %v1830_v31, 3  ;;  %v1874_v41 = vrot.slane %v1867_v59, 4 }
 0x177   :  { %v1834_v47 = vrot.slane %v1828_v39, 1  ;;  %v1835_v45 = vrot.slane %v1829_v40, 1  ;;  %v1843_v6 = vmul.f32 0.4, %v1823_v27  ;;  %v1844_v48 = vmul.f32 0.4, %v1814_v30  ;;  %15355 = vmatmul.mubr.f32.vlgmr.msra.gmra.mrb[12].mxu0 %v17177_v14 }
 0x178   :  { %v1858_v49 = vrot.slane %v1828_v39, 3  ;;  %v1859_v50 = vrot.slane %v1829_v40, 3  ;;  %v1871_v53 = vrot.slane %v1826_v17, 4  ;;  %v1872_v42 = vrot.slane %v1827_v35, 4  ;;  %16158 = vmatpush3.bf16.msra.mxu0 %v16815_v11  ;;  %15403 = vmatprep.mubr.f32.mxu0 %v8452_v51  ;;  %v10665_v40 = vld [vmem:[#allocation5 + $0x48] sm:$0xff] }
 0x179   :  { %v1836_v4 = vsel %vm85_vm3, %v1834_v47, %v1835_v45  ;;  %v1838_v54 = vsel %vm85_vm3, %v1835_v45, %v1837_v43  ;;  %v1849_v10 = vrot.slane %v1843_v6, 2  ;;  %v1850_v16 = vrot.slane %v1844_v48, 2  ;;  %16160 = vmatprep.subr.bf16.mxu0 %v16845_v57 }
 0x17a   :  { %v1841_v19 = vadd.f32 %v1836_v4, %v1826_v17  ;;  %v1842_v63 = vadd.f32 %v1838_v54, %v1827_v35  ;;  %v1860_v3 = vsel %vm111_vm5, %v1858_v49, %v1859_v50  ;;  %v1862_v14 = vsel %vm111_vm5, %v1859_v50, %v1861_v46  ;;  %14879 = vmatmul.mubr.f32.vlgmr.msra.gmra.mrb[0].mxu1 %v803_v15 }
 0x17b   :  { %v1851_v20 = vsel %vm101_vm4, %v1849_v10, %v1850_v16  ;;  %v1853_v51 = vsel %vm101_vm4, %v1850_v16, %v1852_v61  ;;  %v1875_v5 = vsel %vm125_vm6, %v1872_v42, %v1874_v41  ;;  %15862 = vmatpush3.bf16.msra.mxu1 %v16889_v58  ;;  %14885 = vmatprep.mubr.f32.mxu1 %v17289_v60  ;;  %v9558_v37 = vmul.f32 0.2, %v17347_v2 }
 0x17c   :  { %v1856_v21 = vadd.f32 %v1851_v20, %v1841_v19  ;;  %v1857_v9 = vadd.f32 %v1853_v51, %v1842_v63  ;;  %15404 = vmatmul.mubr.f32.vlgmr.msra.gmra.mrb[14].mxu0 %v8462_v7  ;;  %15864 = vmatprep.subr.bf16.mxu1 %v16815_v11  ;;  %v1873_v56 = vsel %vm125_vm6, %v1871_v53, %v1872_v42  ;;  %v9562_v30 = vrot.slane %v17364_v44, 4 }
 0x17d   :  { %16162 = vmatpush3.bf16.msra.mxu0 %v16845_v57  ;;  %15410 = vmatprep.mubr.f32.mxu0 %v17312_v25  ;;  %v9551_v15 = vsel %vm111_vm5, %v9549_v1, %v9550_v0  ;;  %v9563_v2 = vrot.slane %v17374_v52, 4  ;;  %v9553_v7 = vsel %vm111_vm5, %v9550_v0, %v9552_v55  ;;  %v9565_v13 = vrot.slane %v9558_v37, 4  ;;  %v10664_v55 = vld [vmem:[#allocation5 + $0x40] sm:$0xff] }
 0x17e   :  { %v1865_v62 = vadd.f32 %v1860_v3, %v1856_v21  ;;  %v1866_v31 = vadd.f32 %v1862_v14, %v1857_v9  ;;  %16164 = vmatprep.subr.bf16.mxu0 %v16869_v26  ;;  %v9556_v17 = vadd.f32 %v9551_v15, %v17392_v23  ;;  %v9557_v35 = vadd.f32 %v9553_v7, %v9548_v28 }
 0x17f   :  { %v9564_v1 = vsel %vm125_vm6, %v9562_v30, %v9563_v2  ;;  %v9566_v24 = vsel %vm125_vm6, %v9563_v2, %v9565_v13  ;;  %v10667_v41 = vrot.slane %v10664_v55, 7  ;;  %v10671_v6 = vrot.slane %v10665_v40, 6 }
 0x180   :  { %v1878_v59 = vadd.f32 %v1873_v56, %v1865_v62  ;;  %v1879_v27 = vadd.f32 %v1875_v5, %v1866_v31  ;;  %v9569_v23 = vadd.f32 %v9564_v1, %v9556_v17  ;;  %v9570_v39 = vadd.f32 %v9566_v24, %v9557_v35 }
 0x181   :  { %v10676_v48 = vrot.slane %v10665_v40, 5  ;;  %v10670_v42 = vrot.slane %v10664_v55, 6  ;;  %v10680_v54 = vsel %vm75_vm1, %v10664_v55, %v10667_v41  ;;  %v10678_v10 = vrot.slane %v10665_v40, 4 }
 0x182   :  { %14886 = vmatmul.mubr.f32.vlgmr.msra.gmra.mrb[0].mxu1 %v17291_v38  ;;  %v1881_v44 = vsel %vm135_vm7, %v1878_v59, 0  ;;  %v1884_v52 = vsel %vm135_vm7, %v1879_v27, 0  ;;  %v9572_v46 = vsel %vm135_vm7, %v9569_v23, 0  ;;  %v9575_v49 = vsel %vm135_vm7, %v9570_v39, 0 }
 0x183   :  { %15866 = vmatpush3.bf16.msra.mxu1 %v16815_v11  ;;  %14892 = vmatprep.mubr.f32.mxu1 %v17289_v60  ;;  %v17442_v32 = vand.u32 4294901760, %v1881_v44  ;;  %v17444_v0 = vand.u32 4294901760, %v1884_v52  ;;  %v17470_v53 = vand.u32 4294901760, %v9572_v46  ;;  %v10682_v16 = vsel %vm64_vm0, %v10671_v6, %v10676_v48 }
 0x184   :  { %15411 = vmatmul.mubr.f32.vlgmr.msra.gmra.mrb[14].mxu0 %v17314_v29  ;;  %15892 = vmatprep.subr.bf16.mxu1 %v16815_v11  ;;  %v17487_v63 = vsel %vm64_vm0, %v10670_v42, %v10671_v6  ;;  %v10681_v3 = vsel %vm64_vm0, %v10680_v54, %v10670_v42  ;;  %v17493_v14 = vsel %vm79_vm2, %v10682_v16, %v10678_v10 }
 0x185   :  { %16166 = vmatpush3.bf16.msra.mxu0 %v16869_v26  ;;  %15417 = vmatprep.mubr.f32.mxu0 %v17323_v12  ;;  %v17452_v22 = vsub.f32 %v1881_v44, %v17442_v32  ;;  %v17455_v60 = vsub.f32 %v1884_v52, %v17444_v0  ;;  %v17484_v19 = vsub.f32 %v9572_v46, %v17470_v53  ;;  %v10689_v20 = vrot.slane %v17487_v63, 1 }
 0x186   :  { %16168 = vmatprep.subr.bf16.mxu0 %v16815_v11  ;;  %v10697_v51 = vmul.f32 1.6, %v10681_v3  ;;  %v10698_v5 = vmul.f32 1.6, %v17487_v63  ;;  %v10691_v21 = vrot.slane %v17493_v14, 1  ;;  %v10712_v17 = vrot.slane %v10681_v3, 3 }
 0x187   :  { %v1955_v43 = vand.u32 4294901760, %v17452_v22  ;;  %v1965_v61 = vand.u32 4294901760, %v17455_v60  ;;  %v9646_v37 = vand.u32 4294901760, %v17484_v19  ;;  %v10699_v9 = vmul.f32 1.6, %v17493_v14 }
 0x188   :  { %v17508_v15 = vmul.f32 0.2, %v10681_v3  ;;  %v17513_v30 = vmul.f32 0.2, %v17487_v63  ;;  %v10703_v62 = vrot.slane %v10697_v51, 2  ;;  %v10692_v31 = vsel %vm85_vm3, %v10689_v20, %v10691_v21 }
 0x189   :  { %v1956_v47 = vsub.f32 %v17452_v22, %v1955_v43  ;;  %v1966_v45 = vsub.f32 %v17455_v60, %v1965_v61  ;;  %v10706_v28 = vrot.slane %v10699_v9, 2  ;;  %v10713_v1 = vrot.slane %v17487_v63, 3 }
 0x18a   :  { %14893 = vmatmul.mubr.f32.vlgmr.msra.gmra.mrb[0].mxu1 %v17291_v38  ;;  %v17476_v38 = vand.u32 4294901760, %v9575_v49  ;;  %v10696_v44 = vadd.f32 %v10692_v31, %v17513_v30  ;;  %v10715_v42 = vrot.slane %v17493_v14, 3  ;;  %v10721_v10 = vmul.f32 0.2, %v17493_v14 }
 0x18b   :  { %15894 = vmatpush3.bf16.msra.mxu1 %v16815_v11  ;;  %v1957_v50 = vand.u32 4294901760, %v1956_v47  ;;  %v1967_v4 = vand.u32 4294901760, %v1966_v45 }
 0x18c   :  { %15418 = vmatmul.mubr.f32.vlgmr.msra.gmra.mrb[14].mxu0 %v17326_v18  ;;  %15896 = vmatprep.subr.bf16.mxu1 %v16845_v57  ;;  %v17496_v12 = vsub.f32 %v9575_v49, %v17476_v38  ;;  %v10704_v18 = vrot.slane %v10698_v5, 2  ;;  %v10714_v49 = vsel %vm111_vm5, %v10712_v17, %v10713_v1 }
 0x18d   :  { %16170 = vmatpush3.bf16.msra.mxu0 %v16815_v11  ;;  %14941 = vmatprep.mubr.f32.mxu1 %v1957_v50 }
 0x18e   :  { %14942 = vmatmul.mubr.f32.vlgmr.msra.gmra.mrb[2].mxu1 %v1967_v4  ;;  %15424 = vmatprep.mubr.f32.mxu0 %v8450_v33  ;;  %v10688_v33 = vrot.slane %v10681_v3, 1  ;;  %v9656_v56 = vand.u32 4294901760, %v17496_v12  ;;  %v10705_v27 = vsel %vm101_vm4, %v10703_v62, %v10704_v18  ;;  %v10707_v23 = vsel %vm101_vm4, %v10704_v18, %v10706_v28 }
 0x18f   :  { %15898 = vmatpush3.bf16.msra.mxu1 %v16845_v57  ;;  %14948 = vmatprep.mubr.f32.mxu1 %v17442_v32  ;;  %v17552_v50 = vadd.f32 %v10707_v23, %v10696_v44 }
 0x190   :  { %16172 = vmatprep.subr.bf16.mxu0 %v16889_v58  ;;  %15900 = vmatprep.subr.bf16.mxu1 %v16869_v26  ;;  %v10690_v2 = vsel %vm85_vm3, %v10688_v33, %v10689_v20  ;;  %v17528_v7 = vsub.f32 %v17496_v12, %v9656_v56 }
 0x191   :  { %v10695_v13 = vadd.f32 %v10690_v2, %v17508_v15 }
 0x192   :  { %v9658_v45 = vand.u32 4294901760, %v17528_v7 }
 0x193   :  { %v17544_v6 = vadd.f32 %v10705_v27, %v10695_v13 }
 0x194   :  { %15425 = vmatmul.mubr.f32.vlgmr.msra.gmra.mrb[14].mxu0 %v8460_v34  ;;  %v17521_v34 = vsub.f32 %v17484_v19, %v9646_v37 }
 0x195   :  { %16174 = vmatpush3.bf16.msra.mxu0 %v16889_v58  ;;  %15431 = vmatprep.mubr.f32.mxu0 %v17312_v25 }
 0x196   :  { %14949 = vmatmul.mubr.f32.vlgmr.msra.gmra.mrb[2].mxu1 %v17444_v0  ;;  %16176 = vmatprep.subr.bf16.mxu0 %v16815_v11  ;;  %v9648_v24 = vand.u32 4294901760, %v17521_v34 }
 0x197   :  { %15902 = vmatpush3.bf16.msra.mxu1 %v16869_v26  ;;  %14955 = vmatprep.mubr.f32.mxu1 %v17452_v22 }
 0x198   :  { %15904 = vmatprep.subr.bf16.mxu1 %v16815_v11 }
 0x19a   :  { %v15020_v59 = vpop.f32.mrb[4].mxu0 }
 0x19b   :  { %v3003_v52 = vsel %vm17229_vm11, %v15020_v59, 0.0  ;;  %v2992_v35 = vpop.f32.mrb[5].mxu0 }
 0x19c   :  { %v3009_v55 = vrot.slane %v3003_v52, 6  ;;  %v3014_v39 = vrot.slane %v3003_v52, 5  ;;  %v3016_v40 = vrot.slane %v3003_v52, 4  ;;  %v3002_v46 = vsel %vm17235_vm12, %v2992_v35, 0.0  ;;  %15432 = vmatmul.mubr.f32.vlgmr.msra.gmra.mrb[14].mxu0 %v17314_v29 }
 0x19d   :  { %v3005_v41 = vrot.slane %v3002_v46, 7  ;;  %v3008_v47 = vrot.slane %v3002_v46, 6  ;;  %16178 = vmatpush3.bf16.msra.mxu0 %v16815_v11  ;;  %15438 = vmatprep.mubr.f32.mxu0 %v17312_v25 }
 0x19e   :  { %v3020_v48 = vsel %vm64_vm0, %v3009_v55, %v3014_v39  ;;  %14956 = vmatmul.mubr.f32.vlgmr.msra.gmra.mrb[2].mxu1 %v17455_v60  ;;  %16204 = vmatprep.subr.bf16.mxu0 %v16815_v11 }
 0x19f   :  { %v3021_v25 = vsel %vm79_vm2, %v3020_v48, %v3016_v40  ;;  %v3010_v4 = vsel %vm64_vm0, %v3008_v47, %v3009_v55  ;;  %v3018_v54 = vsel %vm75_vm1, %v3002_v46, %v3005_v41  ;;  %15906 = vmatpush3.bf16.msra.mxu1 %v16815_v11  ;;  %14962 = vmatprep.mubr.f32.mxu1 %v1955_v43 }
 0x1a0   :  { %v3026_v16 = vmul.f32 0.25, %v3021_v25  ;;  %v3041_v3 = vmul.f32 0.4, %v3021_v25  ;;  %v3063_v33 = vmul.f32 0.05, %v3021_v25  ;;  %v3019_v20 = vsel %vm64_vm0, %v3018_v54, %v3008_v47  ;;  %15908 = vmatprep.subr.bf16.mxu1 %v16889_v58 }
 0x1a1   :  { %v3022_v51 = vmul.f32 0.05, %v3019_v20  ;;  %v3023_v5 = vmul.f32 0.05, %v3010_v4  ;;  %v3024_v21 = vmul.f32 0.25, %v3019_v20  ;;  %v3025_v9 = vmul.f32 0.25, %v3010_v4 }
 0x1a2   :  { %v3033_v2 = vrot.slane %v3026_v16, 1  ;;  %v3048_v62 = vrot.slane %v3041_v3, 2  ;;  %v3057_v18 = vrot.slane %v3026_v16, 3  ;;  %v3070_v34 = vrot.slane %v3063_v33, 4 }
 0x1a3   :  { %v3030_v31 = vrot.slane %v3024_v21, 1  ;;  %v3031_v22 = vrot.slane %v3025_v9, 1  ;;  %v3039_v43 = vmul.f32 0.4, %v3019_v20  ;;  %v3040_v28 = vmul.f32 0.4, %v3010_v4 }
 0x1a4   :  { %v3054_v14 = vrot.slane %v3024_v21, 3  ;;  %v3055_v7 = vrot.slane %v3025_v9, 3  ;;  %v3067_v13 = vrot.slane %v3022_v51, 4  ;;  %v3068_v59 = vrot.slane %v3023_v5, 4  ;;  %15439 = vmatmul.mubr.f32.vlgmr.msra.gmra.mrb[14].mxu0 %v17314_v29 }
 0x1a5   :  { %v3032_v27 = vsel %vm85_vm3, %v3030_v31, %v3031_v22  ;;  %v3034_v17 = vsel %vm85_vm3, %v3031_v22, %v3033_v2  ;;  %v3045_v44 = vrot.slane %v3039_v43, 2  ;;  %v3046_v52 = vrot.slane %v3040_v28, 2  ;;  %16206 = vmatpush3.bf16.msra.mxu0 %v16815_v11  ;;  %15487 = vmatprep.mubr.f32.mxu0 %v9648_v24  ;;  %v11861_v2 = vld [vmem:[#allocation2 + $0x58] sm:$0xff] }
 0x1a6   :  { %v3037_v35 = vadd.f32 %v3032_v27, %v3022_v51  ;;  %v3038_v23 = vadd.f32 %v3034_v17, %v3023_v5  ;;  %v3056_v55 = vsel %vm111_vm5, %v3054_v14, %v3055_v7  ;;  %v3058_v39 = vsel %vm111_vm5, %v3055_v7, %v3057_v18  ;;  %14963 = vmatmul.mubr.f32.vlgmr.msra.gmra.mrb[2].mxu1 %v1965_v61 }
 0x1a7   :  { %v3047_v29 = vsel %vm101_vm4, %v3045_v44, %v3046_v52  ;;  %v3049_v40 = vsel %vm101_vm4, %v3046_v52, %v3048_v62  ;;  %v3071_v46 = vsel %vm125_vm6, %v3068_v59, %v3070_v34  ;;  %15910 = vmatpush3.bf16.msra.mxu1 %v16889_v58  ;;  %16208 = vmatprep.subr.bf16.mxu0 %v16845_v57  ;;  %v10725_v24 = vrot.slane %v17508_v15, 4 }
 0x1a8   :  { %v3052_v41 = vadd.f32 %v3047_v29, %v3037_v35  ;;  %v3053_v47 = vadd.f32 %v3049_v40, %v3038_v23  ;;  %14969 = vmatprep.mubr.f32.mxu1 %v17442_v32  ;;  %15488 = vmatmul.mubr.f32.vlgmr.msra.gmra.mrb[16].mxu0 %v9658_v45  ;;  %v3069_v60 = vsel %vm125_vm6, %v3067_v13, %v3068_v59  ;;  %v10726_v61 = vrot.slane %v17513_v30, 4 }
 0x1a9   :  { %16210 = vmatpush3.bf16.msra.mxu0 %v16845_v57  ;;  %15912 = vmatprep.subr.bf16.mxu1 %v16815_v11  ;;  %v10716_v48 = vsel %vm111_vm5, %v10713_v1, %v10715_v42  ;;  %v10728_v25 = vrot.slane %v10721_v10, 4  ;;  %v10719_v45 = vadd.f32 %v10714_v49, %v17544_v6  ;;  %v11867_v14 = vrot.slane %v11861_v2, 6 }
 0x1aa   :  { %v3061_v4 = vadd.f32 %v3056_v55, %v3052_v41  ;;  %v3062_v15 = vadd.f32 %v3058_v39, %v3053_v47  ;;  %15494 = vmatprep.mubr.f32.mxu0 %v17470_v53  ;;  %16212 = vmatprep.subr.bf16.mxu0 %v16869_v26  ;;  %v10727_v30 = vsel %vm125_vm6, %v10725_v24, %v10726_v61  ;;  %v11872_v59 = vrot.slane %v11861_v2, 5 }
 0x1ab   :  { %v10720_v3 = vadd.f32 %v10716_v48, %v17552_v50  ;;  %v10729_v33 = vsel %vm125_vm6, %v10726_v61, %v10728_v25  ;;  %v10732_v49 = vadd.f32 %v10727_v30, %v10719_v45  ;;  %v11874_v52 = vrot.slane %v11861_v2, 4 }
 0x1ac   :  { %v3074_v54 = vadd.f32 %v3069_v60, %v3061_v4  ;;  %v3075_v16 = vadd.f32 %v3071_v46, %v3062_v15 }
 0x1ad   :  { %v10733_v50 = vadd.f32 %v10729_v33, %v10720_v3  ;;  %v10735_v21 = vsel %vm135_vm7, %v10732_v49, 0 }
 0x1ae   :  { %14970 = vmatmul.mubr.f32.vlgmr.msra.gmra.mrb[2].mxu1 %v17444_v0  ;;  %v3077_v63 = vsel %vm135_vm7, %v3074_v54, 0  ;;  %v3080_v1 = vsel %vm135_vm7, %v3075_v16, 0  ;;  %v17623_v31 = vand.u32 4294901760, %v10735_v21 }
 0x1af   :  { %15914 = vmatpush3.bf16.msra.mxu1 %v16815_v11  ;;  %14976 = vmatprep.mubr.f32.mxu1 %v17442_v32  ;;  %v17597_v42 = vand.u32 4294901760, %v3077_v63  ;;  %v17599_v6 = vand.u32 4294901760, %v3080_v1  ;;  %v11860_v32 = vld [vmem:[#allocation2 + $0x50] sm:$0xff]  ;;  %v10738_v9 = vsel %vm135_vm7, %v10733_v50, 0 }
 0x1b0   :  { %15495 = vmatmul.mubr.f32.vlgmr.msra.gmra.mrb[16].mxu0 %v17476_v38  ;;  %15940 = vmatprep.subr.bf16.mxu1 %v16815_v11  ;;  %v11863_v62 = vrot.slane %v11860_v32, 7  ;;  %v17626_v43 = vand.u32 4294901760, %v10738_v9  ;;  %v11866_v28 = vrot.slane %v11860_v32, 6 }
 0x1b1   :  { %16214 = vmatpush3.bf16.msra.mxu0 %v16869_v26  ;;  %15501 = vmatprep.mubr.f32.mxu0 %v17484_v19  ;;  %v17606_v10 = vsub.f32 %v3077_v63, %v17597_v42  ;;  %v17609_v20 = vsub.f32 %v3080_v1, %v17599_v6  ;;  %v11878_v19 = vsel %vm64_vm0, %v11867_v14, %v11872_v59 }
 0x1b2   :  { %16216 = vmatprep.subr.bf16.mxu0 %v16815_v11  ;;  %v11876_v13 = vsel %vm75_vm1, %v11860_v32, %v11863_v62  ;;  %v17640_v27 = vsub.f32 %v10738_v9, %v17626_v43  ;;  %v17643_v17 = vsel %vm64_vm0, %v11866_v28, %v11867_v14  ;;  %v17658_v40 = vsel %vm79_vm2, %v11878_v19, %v11874_v52 }
 0x1b3   :  { %v3151_v51 = vand.u32 4294901760, %v17606_v10  ;;  %v3161_v5 = vand.u32 4294901760, %v17609_v20  ;;  %v17646_v44 = vsel %vm64_vm0, %v11876_v13, %v11866_v28  ;;  %v11885_v35 = vrot.slane %v17643_v17, 1 }
 0x1b4   :  { %v11893_v23 = vmul.f32 1.6, %v17646_v44  ;;  %v11894_v55 = vmul.f32 1.6, %v17643_v17  ;;  %v10819_v29 = vand.u32 4294901760, %v17640_v27  ;;  %v11887_v61 = vrot.slane %v17658_v40, 1 }
 0x1b5   :  { %v3152_v18 = vsub.f32 %v17606_v10, %v3151_v51  ;;  %v3162_v34 = vsub.f32 %v17609_v20, %v3161_v5  ;;  %v17665_v46 = vmul.f32 0.2, %v17646_v44  ;;  %v11895_v60 = vmul.f32 1.6, %v17658_v40 }
 0x1b6   :  { %14977 = vmatmul.mubr.f32.vlgmr.msra.gmra.mrb[2].mxu1 %v17444_v0  ;;  %v17635_v0 = vsub.f32 %v10735_v21, %v17623_v31  ;;  %v11899_v41 = vrot.slane %v11893_v23, 2  ;;  %v11900_v47 = vrot.slane %v11894_v55, 2  ;;  %v17687_v4 = vmul.f32 0.2, %v17643_v17 }
 0x1b7   :  { %15942 = vmatpush3.bf16.msra.mxu1 %v16815_v11  ;;  %v3153_v22 = vand.u32 4294901760, %v3152_v18  ;;  %v3163_v7 = vand.u32 4294901760, %v3162_v34  ;;  %v11902_v45 = vrot.slane %v11895_v60, 2  ;;  %v11888_v33 = vsel %vm85_vm3, %v11885_v35, %v11887_v61 }
 0x1b8   :  { %15502 = vmatmul.mubr.f32.vlgmr.msra.gmra.mrb[16].mxu0 %v17496_v12  ;;  %15944 = vmatprep.subr.bf16.mxu1 %v16845_v57  ;;  %v10809_v39 = vand.u32 4294901760, %v17635_v0  ;;  %v11901_v15 = vsel %vm101_vm4, %v11899_v41, %v11900_v47  ;;  %v11908_v2 = vrot.slane %v17646_v44, 3  ;;  %v11909_v18 = vrot.slane %v17643_v17, 3 }
 0x1b9   :  { %16218 = vmatpush3.bf16.msra.mxu0 %v16815_v11  ;;  %15025 = vmatprep.mubr.f32.mxu1 %v3153_v22  ;;  %v11892_v34 = vadd.f32 %v11888_v33, %v17687_v4  ;;  %v11903_v22 = vsel %vm101_vm4, %v11900_v47, %v11902_v45 }
 0x1ba   :  { %15026 = vmatmul.mubr.f32.vlgmr.msra.gmra.mrb[4].mxu1 %v3163_v7  ;;  %15508 = vmatprep.mubr.f32.mxu0 %v9646_v37  ;;  %v11884_v37 = vrot.slane %v17646_v44, 1  ;;  %v17676_v12 = vsub.f32 %v17635_v0, %v10809_v39  ;;  %v11911_v7 = vrot.slane %v17658_v40, 3 }
 0x1bb   :  { %15946 = vmatpush3.bf16.msra.mxu1 %v16845_v57  ;;  %15032 = vmatprep.mubr.f32.mxu1 %v17597_v42 }
 0x1bc   :  { %16220 = vmatprep.subr.bf16.mxu0 %v16889_v58  ;;  %15948 = vmatprep.subr.bf16.mxu1 %v16869_v26  ;;  %v11886_v24 = vsel %vm85_vm3, %v11884_v37, %v11885_v35  ;;  %v10811_v30 = vand.u32 4294901760, %v17676_v12 }
 0x1bd   :  { %v11891_v48 = vadd.f32 %v11886_v24, %v17665_v46 }
 0x1bf   :  { %v17700_v9 = vadd.f32 %v11901_v15, %v11891_v48 }
 0x1c0   :  { %15509 = vmatmul.mubr.f32.vlgmr.msra.gmra.mrb[16].mxu0 %v9656_v56  ;;  %v17681_v56 = vsub.f32 %v17640_v27, %v10819_v29 }
 0x1c1   :  { %16222 = vmatpush3.bf16.msra.mxu0 %v16889_v58  ;;  %15515 = vmatprep.mubr.f32.mxu0 %v17470_v53 }
 0x1c2   :  { %15033 = vmatmul.mubr.f32.vlgmr.msra.gmra.mrb[4].mxu1 %v17599_v6  ;;  %16224 = vmatprep.subr.bf16.mxu0 %v16815_v11  ;;  %v10821_v3 = vand.u32 4294901760, %v17681_v56  ;;  %v11907_v56 = vadd.f32 %v11903_v22, %v11892_v34 }
 0x1c3   :  { %15950 = vmatpush3.bf16.msra.mxu1 %v16869_v26  ;;  %15039 = vmatprep.mubr.f32.mxu1 %v17606_v10 }
 0x1c4   :  { %15952 = vmatprep.subr.bf16.mxu1 %v16815_v11 }
 0x1c6   :  { %v15104_v25 = vpop.f32.mrb[6].mxu0 }
 0x1c7   :  { %v4166_v54 = vsel %vm17229_vm11, %v15104_v25, 0.0  ;;  %v4155_v16 = vpop.f32.mrb[7].mxu0 }
 0x1c8   :  { %v4172_v63 = vrot.slane %v4166_v54, 6  ;;  %v4177_v1 = vrot.slane %v4166_v54, 5  ;;  %v4179_v49 = vrot.slane %v4166_v54, 4  ;;  %v4165_v50 = vsel %vm17235_vm12, %v4155_v16, 0.0  ;;  %15516 = vmatmul.mubr.f32.vlgmr.msra.gmra.mrb[16].mxu0 %v17476_v38 }
 0x1c9   :  { %v4168_v32 = vrot.slane %v4165_v50, 7  ;;  %v4171_v21 = vrot.slane %v4165_v50, 6  ;;  %16226 = vmatpush3.bf16.msra.mxu0 %v16815_v11  ;;  %15522 = vmatprep.mubr.f32.mxu0 %v17470_v53 }
 0x1ca   :  { %v4183_v62 = vsel %vm64_vm0, %v4172_v63, %v4177_v1  ;;  %15040 = vmatmul.mubr.f32.vlgmr.msra.gmra.mrb[4].mxu1 %v17609_v20  ;;  %16252 = vmatprep.subr.bf16.mxu0 %v16815_v11 }
 0x1cb   :  { %v4184_v28 = vsel %vm79_vm2, %v4183_v62, %v4179_v49  ;;  %v4173_v53 = vsel %vm64_vm0, %v4171_v21, %v4172_v63  ;;  %v4181_v14 = vsel %vm75_vm1, %v4165_v50, %v4168_v32  ;;  %15954 = vmatpush3.bf16.msra.mxu1 %v16815_v11  ;;  %15046 = vmatprep.mubr.f32.mxu1 %v3151_v51 }
 0x1cc   :  { %v4189_v13 = vmul.f32 0.25, %v4184_v28  ;;  %v4204_v59 = vmul.f32 0.4, %v4184_v28  ;;  %v4226_v44 = vmul.f32 0.05, %v4184_v28  ;;  %v4182_v52 = vsel %vm64_vm0, %v4181_v14, %v4171_v21  ;;  %15956 = vmatprep.subr.bf16.mxu1 %v16889_v58 }
 0x1cd   :  { %v4185_v19 = vmul.f32 0.05, %v4182_v52  ;;  %v4186_v37 = vmul.f32 0.05, %v4173_v53  ;;  %v4187_v35 = vmul.f32 0.25, %v4182_v52  ;;  %v4188_v23 = vmul.f32 0.25, %v4173_v53 }
 0x1ce   :  { %v4196_v55 = vrot.slane %v4189_v13, 1  ;;  %v4211_v24 = vrot.slane %v4204_v59, 2  ;;  %v4220_v41 = vrot.slane %v4189_v13, 3  ;;  %v4233_v47 = vrot.slane %v4226_v44, 4 }
 0x1cf   :  { %v4193_v60 = vrot.slane %v4187_v35, 1  ;;  %v4194_v10 = vrot.slane %v4188_v23, 1  ;;  %v4202_v51 = vmul.f32 0.4, %v4182_v52  ;;  %v4203_v12 = vmul.f32 0.4, %v4173_v53 }
 0x1d0   :  { %v4217_v61 = vrot.slane %v4187_v35, 3  ;;  %v4218_v48 = vrot.slane %v4188_v23, 3  ;;  %v4230_v25 = vrot.slane %v4185_v19, 4  ;;  %v4231_v15 = vrot.slane %v4186_v37, 4  ;;  %15523 = vmatmul.mubr.f32.vlgmr.msra.gmra.mrb[16].mxu0 %v17476_v38 }
 0x1d1   :  { %v4195_v45 = vsel %vm85_vm3, %v4193_v60, %v4194_v10  ;;  %v4197_v54 = vsel %vm85_vm3, %v4194_v10, %v4196_v55  ;;  %v4208_v16 = vrot.slane %v4202_v51, 2  ;;  %v4209_v33 = vrot.slane %v4203_v12, 2  ;;  %16254 = vmatpush3.bf16.msra.mxu0 %v16815_v11  ;;  %15571 = vmatprep.mubr.f32.mxu0 %v10811_v30  ;;  %v13024_v10 = vld [vmem:[#allocation5 + $0x58] sm:$0xff] }
 0x1d2   :  { %v4200_v63 = vadd.f32 %v4195_v45, %v4185_v19  ;;  %v4201_v1 = vadd.f32 %v4197_v54, %v4186_v37  ;;  %v4219_v49 = vsel %vm111_vm5, %v4217_v61, %v4218_v48  ;;  %v4221_v50 = vsel %vm111_vm5, %v4218_v48, %v4220_v41  ;;  %15047 = vmatmul.mubr.f32.vlgmr.msra.gmra.mrb[4].mxu1 %v3161_v5 }
 0x1d3   :  { %v4210_v38 = vsel %vm101_vm4, %v4208_v16, %v4209_v33  ;;  %v4212_v32 = vsel %vm101_vm4, %v4209_v33, %v4211_v24  ;;  %v4234_v21 = vsel %vm125_vm6, %v4231_v15, %v4233_v47  ;;  %15958 = vmatpush3.bf16.msra.mxu1 %v16889_v58  ;;  %16256 = vmatprep.subr.bf16.mxu0 %v16845_v57  ;;  %v11917_v30 = vmul.f32 0.2, %v17658_v40  ;;  %v13023_v47 = vld [vmem:[#allocation5 + $0x50] sm:$0xff] }
 0x1d4   :  { %v4215_v62 = vadd.f32 %v4210_v38, %v4200_v63  ;;  %v4216_v28 = vadd.f32 %v4212_v32, %v4201_v1  ;;  %15053 = vmatprep.mubr.f32.mxu1 %v17597_v42  ;;  %15572 = vmatmul.mubr.f32.vlgmr.msra.gmra.mrb[18].mxu0 %v10821_v3  ;;  %v4232_v20 = vsel %vm125_vm6, %v4230_v25, %v4231_v15  ;;  %v11921_v53 = vrot.slane %v17665_v46, 4 }
 0x1d5   :  { %16258 = vmatpush3.bf16.msra.mxu0 %v16845_v57  ;;  %15960 = vmatprep.subr.bf16.mxu1 %v16815_v11  ;;  %v11910_v5 = vsel %vm111_vm5, %v11908_v2, %v11909_v18  ;;  %v11922_v40 = vrot.slane %v17687_v4, 4  ;;  %v11912_v3 = vsel %vm111_vm5, %v11909_v18, %v11911_v7  ;;  %v11924_v59 = vrot.slane %v11917_v30, 4 }
 0x1d6   :  { %v4224_v14 = vadd.f32 %v4219_v49, %v4215_v62  ;;  %v4225_v13 = vadd.f32 %v4221_v50, %v4216_v28  ;;  %15578 = vmatprep.mubr.f32.mxu0 %v17623_v31  ;;  %16260 = vmatprep.subr.bf16.mxu0 %v16869_v26  ;;  %v11915_v2 = vadd.f32 %v11910_v5, %v17700_v9  ;;  %v13026_v48 = vrot.slane %v13023_v47, 7 }
 0x1d7   :  { %v11923_v46 = vsel %vm125_vm6, %v11921_v53, %v11922_v40  ;;  %v11916_v37 = vadd.f32 %v11912_v3, %v11907_v56  ;;  %v11925_v34 = vsel %vm125_vm6, %v11922_v40, %v11924_v59  ;;  %v13035_v15 = vrot.slane %v13024_v10, 5 }
 0x1d8   :  { %v4237_v44 = vadd.f32 %v4232_v20, %v4224_v14  ;;  %v4238_v52 = vadd.f32 %v4234_v21, %v4225_v13  ;;  %v11928_v9 = vadd.f32 %v11923_v46, %v11915_v2  ;;  %v13029_v54 = vrot.slane %v13023_v47, 6 }
 0x1d9   :  { %v11929_v7 = vadd.f32 %v11925_v34, %v11916_v37  ;;  %v13039_v16 = vsel %vm75_vm1, %v13023_v47, %v13026_v48  ;;  %v13037_v33 = vrot.slane %v13024_v10, 4 }
 0x1da   :  { %15054 = vmatmul.mubr.f32.vlgmr.msra.gmra.mrb[4].mxu1 %v17599_v6  ;;  %v4240_v4 = vsel %vm135_vm7, %v4237_v44, 0  ;;  %v4243_v19 = vsel %vm135_vm7, %v4238_v52, 0  ;;  %v11931_v55 = vsel %vm135_vm7, %v11928_v9, 0  ;;  %v17809_v49 = vsel %vm64_vm0, %v13039_v16, %v13029_v54 }
 0x1db   :  { %15962 = vmatpush3.bf16.msra.mxu1 %v16815_v11  ;;  %15060 = vmatprep.mubr.f32.mxu1 %v17597_v42  ;;  %v17755_v17 = vand.u32 4294901760, %v4240_v4  ;;  %v17757_v18 = vand.u32 4294901760, %v4243_v19  ;;  %v11934_v60 = vsel %vm135_vm7, %v11929_v7, 0  ;;  %v17783_v12 = vand.u32 4294901760, %v11931_v55 }
 0x1dc   :  { %15579 = vmatmul.mubr.f32.vlgmr.msra.gmra.mrb[18].mxu0 %v17626_v43  ;;  %15988 = vmatprep.subr.bf16.mxu1 %v16815_v11  ;;  %v17788_v25 = vand.u32 4294901760, %v11934_v60  ;;  %v13047_v32 = vrot.slane %v17809_v49, 1  ;;  %v17842_v20 = vmul.f32 0.2, %v17809_v49 }
 0x1dd   :  { %16262 = vmatpush3.bf16.msra.mxu0 %v16869_v26  ;;  %15585 = vmatprep.mubr.f32.mxu0 %v17635_v0  ;;  %v17765_v22 = vsub.f32 %v4240_v4, %v17755_v17  ;;  %v17768_v42 = vsub.f32 %v4243_v19, %v17757_v18  ;;  %v17795_v45 = vsub.f32 %v11931_v55, %v17783_v12 }
 0x1de   :  { %16264 = vmatprep.subr.bf16.mxu0 %v16815_v11  ;;  %v17801_v63 = vsub.f32 %v11934_v60, %v17788_v25 }
 0x1df   :  { %v4314_v35 = vand.u32 4294901760, %v17765_v22  ;;  %v4324_v23 = vand.u32 4294901760, %v17768_v42 }
 0x1e0   :  { %v12015_v38 = vand.u32 4294901760, %v17801_v63 }
 0x1e1   :  { %v4315_v24 = vsub.f32 %v17765_v22, %v4314_v35  ;;  %v4325_v41 = vsub.f32 %v17768_v42, %v4324_v23 }
 0x1e2   :  { %15061 = vmatmul.mubr.f32.vlgmr.msra.gmra.mrb[4].mxu1 %v17599_v6  ;;  %v13030_v6 = vrot.slane %v13024_v10, 6  ;;  %v17839_v28 = vsub.f32 %v17801_v63, %v12015_v38 }
 0x1e3   :  { %15990 = vmatpush3.bf16.msra.mxu1 %v16815_v11  ;;  %v4316_v51 = vand.u32 4294901760, %v4315_v24  ;;  %v4326_v61 = vand.u32 4294901760, %v4325_v41  ;;  %v13071_v41 = vrot.slane %v17809_v49, 3 }
 0x1e4   :  { %15586 = vmatmul.mubr.f32.vlgmr.msra.gmra.mrb[18].mxu0 %v17640_v27  ;;  %15992 = vmatprep.subr.bf16.mxu1 %v16845_v57  ;;  %v13041_v0 = vsel %vm64_vm0, %v13030_v6, %v13035_v15  ;;  %v17806_v1 = vsel %vm64_vm0, %v13029_v54, %v13030_v6  ;;  %v13056_v27 = vmul.f32 1.6, %v17809_v49  ;;  %v12017_v9 = vand.u32 4294901760, %v17839_v28 }
 0x1e5   :  { %16266 = vmatpush3.bf16.msra.mxu0 %v16815_v11  ;;  %15109 = vmatprep.mubr.f32.mxu1 %v4316_v51  ;;  %v17814_v50 = vsel %vm79_vm2, %v13041_v0, %v13037_v33  ;;  %v13048_v21 = vrot.slane %v17806_v1, 1  ;;  %v17845_v53 = vmul.f32 0.2, %v17806_v1 }
 0x1e6   :  { %15110 = vmatmul.mubr.f32.vlgmr.msra.gmra.mrb[6].mxu1 %v4326_v61  ;;  %15592 = vmatprep.mubr.f32.mxu0 %v10809_v39  ;;  %v12005_v39 = vand.u32 4294901760, %v17795_v45  ;;  %v13050_v62 = vrot.slane %v17814_v50, 1  ;;  %v13062_v14 = vrot.slane %v13056_v27, 2  ;;  %v17854_v52 = vmul.f32 1.6, %v17814_v50 }
 0x1e7   :  { %15994 = vmatpush3.bf16.msra.mxu1 %v16845_v57  ;;  %15116 = vmatprep.mubr.f32.mxu1 %v17755_v17  ;;  %v13049_v40 = vsel %vm85_vm3, %v13047_v32, %v13048_v21 }
 0x1e8   :  { %16268 = vmatprep.subr.bf16.mxu0 %v16889_v58  ;;  %15996 = vmatprep.subr.bf16.mxu1 %v16869_v26  ;;  %v17832_v30 = vsub.f32 %v17795_v45, %v12005_v39  ;;  %v13051_v44 = vsel %vm85_vm3, %v13048_v21, %v13050_v62  ;;  %v17863_v7 = vadd.f32 %v13049_v40, %v17842_v20  ;;  %v13065_v51 = vrot.slane %v17854_v52, 2 }
 0x1e9   :  { %v17873_v47 = vadd.f32 %v13051_v44, %v17845_v53 }
 0x1ea   :  { %v12007_v59 = vand.u32 4294901760, %v17832_v30 }
 0x1ec   :  { %15593 = vmatmul.mubr.f32.vlgmr.msra.gmra.mrb[18].mxu0 %v10819_v29  ;;  %v17825_v29 = vmul.f32 1.6, %v17806_v1 }
 0x1ed   :  { %16270 = vmatpush3.bf16.msra.mxu0 %v16889_v58  ;;  %15599 = vmatprep.mubr.f32.mxu0 %v17623_v31 }
 0x1ee   :  { %15117 = vmatmul.mubr.f32.vlgmr.msra.gmra.mrb[6].mxu1 %v17757_v18  ;;  %16272 = vmatprep.subr.bf16.mxu0 %v16815_v11  ;;  %v13063_v13 = vrot.slane %v17825_v29, 2  ;;  %v13084_v29 = vrot.slane %v17842_v20, 4 }
 0x1ef   :  { %15998 = vmatpush3.bf16.msra.mxu1 %v16869_v26  ;;  %15123 = vmatprep.mubr.f32.mxu1 %v17765_v22 }
 0x1f0   :  { %16000 = vmatprep.subr.bf16.mxu1 %v16815_v11  ;;  %v13064_v24 = vsel %vm101_vm4, %v13062_v14, %v13063_v13 }
 0x1f2   :  { %v15188_v5 = vpop.f32.mrb[8].mxu0 }
 0x1f3   :  { %v5362_v56 = vsel %vm17229_vm11, %v15188_v5, 0.0  ;;  %v5351_v3 = vpop.f32.mrb[9].mxu0 }
 0x1f4   :  { %v5368_v2 = vrot.slane %v5362_v56, 6  ;;  %v5373_v46 = vrot.slane %v5362_v56, 5  ;;  %v5375_v4 = vrot.slane %v5362_v56, 4  ;;  %v5361_v19 = vsel %vm17235_vm12, %v5351_v3, 0.0  ;;  %15600 = vmatmul.mubr.f32.vlgmr.msra.gmra.mrb[18].mxu0 %v17626_v43 }
 0x1f5   :  { %v5364_v37 = vrot.slane %v5361_v19, 7  ;;  %v5367_v34 = vrot.slane %v5361_v19, 6  ;;  %16274 = vmatpush3.bf16.msra.mxu0 %v16815_v11  ;;  %15606 = vmatprep.mubr.f32.mxu0 %v17623_v31 }
 0x1f6   :  { %v5379_v55 = vsel %vm64_vm0, %v5368_v2, %v5373_v46  ;;  %15124 = vmatmul.mubr.f32.vlgmr.msra.gmra.mrb[6].mxu1 %v17768_v42  ;;  %16300 = vmatprep.subr.bf16.mxu0 %v16815_v11 }
 0x1f7   :  { %v5380_v31 = vsel %vm79_vm2, %v5379_v55, %v5375_v4  ;;  %v5369_v60 = vsel %vm64_vm0, %v5367_v34, %v5368_v2  ;;  %v5377_v10 = vsel %vm75_vm1, %v5361_v19, %v5364_v37  ;;  %16002 = vmatpush3.bf16.msra.mxu1 %v16815_v11  ;;  %15130 = vmatprep.mubr.f32.mxu1 %v4314_v35 }
 0x1f8   :  { %v5385_v61 = vmul.f32 0.25, %v5380_v31  ;;  %v5400_v48 = vmul.f32 0.4, %v5380_v31  ;;  %v5422_v6 = vmul.f32 0.05, %v5380_v31  ;;  %v5378_v15 = vsel %vm64_vm0, %v5377_v10, %v5367_v34  ;;  %16004 = vmatprep.subr.bf16.mxu1 %v16889_v58 }
 0x1f9   :  { %v5381_v54 = vmul.f32 0.05, %v5378_v15  ;;  %v5382_v16 = vmul.f32 0.05, %v5369_v60  ;;  %v5383_v33 = vmul.f32 0.25, %v5378_v15  ;;  %v5384_v0 = vmul.f32 0.25, %v5369_v60 }
 0x1fa   :  { %v5392_v32 = vrot.slane %v5385_v61, 1  ;;  %v5407_v21 = vrot.slane %v5400_v48, 2  ;;  %v5416_v27 = vrot.slane %v5385_v61, 3  ;;  %v5429_v30 = vrot.slane %v5422_v6, 4 }
 0x1fb   :  { %v5389_v62 = vrot.slane %v5383_v33, 1  ;;  %v5390_v22 = vrot.slane %v5384_v0, 1  ;;  %v5398_v35 = vmul.f32 0.4, %v5378_v15  ;;  %v5399_v28 = vmul.f32 0.4, %v5369_v60 }
 0x1fc   :  { %v5413_v5 = vrot.slane %v5383_v33, 3  ;;  %v5414_v40 = vrot.slane %v5384_v0, 3  ;;  %v5426_v14 = vrot.slane %v5381_v54, 4  ;;  %v5427_v56 = vrot.slane %v5382_v16, 4  ;;  %15607 = vmatmul.mubr.f32.vlgmr.msra.gmra.mrb[18].mxu0 %v17626_v43 }
 0x1fd   :  { %v5391_v3 = vsel %vm85_vm3, %v5389_v62, %v5390_v22  ;;  %v5393_v44 = vsel %vm85_vm3, %v5390_v22, %v5392_v32  ;;  %v5404_v52 = vrot.slane %v5398_v35, 2  ;;  %v5405_v2 = vrot.slane %v5399_v28, 2  ;;  %16302 = vmatpush3.bf16.msra.mxu0 %v16815_v11  ;;  %15655 = vmatprep.mubr.f32.mxu0 %v12007_v59 }
 0x1fe   :  { %v5396_v46 = vadd.f32 %v5391_v3, %v5381_v54  ;;  %v5397_v4 = vadd.f32 %v5393_v44, %v5382_v16  ;;  %v5415_v19 = vsel %vm111_vm5, %v5413_v5, %v5414_v40  ;;  %v5417_v37 = vsel %vm111_vm5, %v5414_v40, %v5416_v27  ;;  %15131 = vmatmul.mubr.f32.vlgmr.msra.gmra.mrb[6].mxu1 %v4324_v23 }
 0x1ff   :  { %v5406_v43 = vsel %vm101_vm4, %v5404_v52, %v5405_v2  ;;  %v5408_v34 = vsel %vm101_vm4, %v5405_v2, %v5407_v21  ;;  %v5430_v55 = vsel %vm125_vm6, %v5427_v56, %v5429_v30  ;;  %16006 = vmatpush3.bf16.msra.mxu1 %v16889_v58  ;;  %16304 = vmatprep.subr.bf16.mxu0 %v16845_v57  ;;  %v13072_v59 = vrot.slane %v17806_v1, 3 }
 0x200   :  { %v5411_v31 = vadd.f32 %v5406_v43, %v5396_v46  ;;  %v5412_v60 = vadd.f32 %v5408_v34, %v5397_v4  ;;  %15137 = vmatprep.mubr.f32.mxu1 %v17755_v17  ;;  %15656 = vmatmul.mubr.f32.vlgmr.msra.gmra.mrb[20].mxu0 %v12017_v9  ;;  %v5428_v42 = vsel %vm125_vm6, %v5426_v14, %v5427_v56  ;;  %v13074_v10 = vrot.slane %v17814_v50, 3 }
 0x201   :  { %16306 = vmatpush3.bf16.msra.mxu0 %v16845_v57  ;;  %16008 = vmatprep.subr.bf16.mxu1 %v16815_v11  ;;  %v13066_v23 = vsel %vm101_vm4, %v13063_v13, %v13065_v51  ;;  %v13080_v61 = vmul.f32 0.2, %v17814_v50  ;;  %v13069_v9 = vadd.f32 %v13064_v24, %v17863_v7  ;;  %v13073_v6 = vsel %vm111_vm5, %v13071_v41, %v13072_v59 }
 0x202   :  { %v5420_v1 = vadd.f32 %v5415_v19, %v5411_v31  ;;  %v5421_v48 = vadd.f32 %v5417_v37, %v5412_v60  ;;  %15662 = vmatprep.mubr.f32.mxu0 %v17783_v12  ;;  %16308 = vmatprep.subr.bf16.mxu0 %v16869_v26  ;;  %v13085_v51 = vrot.slane %v17845_v53, 4  ;;  %v13070_v50 = vadd.f32 %v13066_v23, %v17873_v47 }
 0x203   :  { %v13075_v54 = vsel %vm111_vm5, %v13072_v59, %v13074_v10  ;;  %v13087_v16 = vrot.slane %v13080_v61, 4  ;;  %v13078_v53 = vadd.f32 %v13073_v6, %v13069_v9 }
 0x204   :  { %v5433_v15 = vadd.f32 %v5428_v42, %v5420_v1  ;;  %v5434_v13 = vadd.f32 %v5430_v55, %v5421_v48  ;;  %v13086_v24 = vsel %vm125_vm6, %v13084_v29, %v13085_v51  ;;  %v13079_v41 = vadd.f32 %v13075_v54, %v13070_v50 }
 0x205   :  { %v13088_v0 = vsel %vm125_vm6, %v13085_v51, %v13087_v16  ;;  %v13091_v27 = vadd.f32 %v13086_v24, %v13078_v53 }
 0x206   :  { %15138 = vmatmul.mubr.f32.vlgmr.msra.gmra.mrb[6].mxu1 %v17757_v18  ;;  %v5436_v33 = vsel %vm135_vm7, %v5433_v15, 0  ;;  %v5439_v7 = vsel %vm135_vm7, %v5434_v13, 0  ;;  %v13092_v30 = vadd.f32 %v13088_v0, %v13079_v41 }
 0x207   :  { %16010 = vmatpush3.bf16.msra.mxu1 %v16815_v11  ;;  %15144 = vmatprep.mubr.f32.mxu1 %v17755_v17  ;;  %v17922_v49 = vand.u32 4294901760, %v5436_v33  ;;  %v17924_v20 = vand.u32 4294901760, %v5439_v7  ;;  %v13094_v28 = vsel %vm135_vm7, %v13091_v27, 0 }
 0x208   :  { %15663 = vmatmul.mubr.f32.vlgmr.msra.gmra.mrb[20].mxu0 %v17788_v25  ;;  %16036 = vmatprep.subr.bf16.mxu1 %v16815_v11  ;;  %v13097_v40 = vsel %vm135_vm7, %v13092_v30, 0 }
 0x209   :  { %16310 = vmatpush3.bf16.msra.mxu0 %v16869_v26  ;;  %15669 = vmatprep.mubr.f32.mxu0 %v17795_v45  ;;  %v5509_v47 = vsub.f32 %v5436_v33, %v17922_v49  ;;  %v17933_v17 = vsub.f32 %v5439_v7, %v17924_v20  ;;  %v17954_v14 = vand.u32 4294901760, %v13097_v40 }
 0x20a   :  { %16312 = vmatprep.subr.bf16.mxu0 %v16815_v11 }
 0x20b   :  { %v5510_v32 = vand.u32 4294901760, %v5509_v47  ;;  %v5520_v21 = vand.u32 4294901760, %v17933_v17  ;;  %v17962_v3 = vsub.f32 %v13097_v40, %v17954_v14 }
 0x20d   :  { %v5511_v62 = vsub.f32 %v5509_v47, %v5510_v32  ;;  %v5521_v22 = vsub.f32 %v17933_v17, %v5520_v21 }
 0x20e   :  { %15145 = vmatmul.mubr.f32.vlgmr.msra.gmra.mrb[6].mxu1 %v17757_v18  ;;  %v17950_v18 = vand.u32 4294901760, %v13094_v28 }
 0x20f   :  { %16038 = vmatpush3.bf16.msra.mxu1 %v16815_v11  ;;  %v5512_v35 = vand.u32 4294901760, %v5511_v62  ;;  %v5522_v5 = vand.u32 4294901760, %v5521_v22 }
 0x210   :  { %15670 = vmatmul.mubr.f32.vlgmr.msra.gmra.mrb[20].mxu0 %v17801_v63  ;;  %16040 = vmatprep.subr.bf16.mxu1 %v16845_v57  ;;  %v17959_v56 = vsub.f32 %v13094_v28, %v17950_v18 }
 0x211   :  { %16314 = vmatpush3.bf16.msra.mxu0 %v16815_v11  ;;  %15193 = vmatprep.mubr.f32.mxu1 %v5512_v35 }
 0x212   :  { %15194 = vmatmul.mubr.f32.vlgmr.msra.gmra.mrb[8].mxu1 %v5522_v5  ;;  %15676 = vmatprep.mubr.f32.mxu0 %v12005_v39  ;;  %v13168_v45 = vand.u32 4294901760, %v17959_v56  ;;  %v13178_v39 = vand.u32 4294901760, %v17962_v3 }
 0x213   :  { %16042 = vmatpush3.bf16.msra.mxu1 %v16845_v57  ;;  %15200 = vmatprep.mubr.f32.mxu1 %v17922_v49 }
 0x214   :  { %16316 = vmatprep.subr.bf16.mxu0 %v16889_v58  ;;  %16044 = vmatprep.subr.bf16.mxu1 %v16869_v26  ;;  %v13169_v63 = vsub.f32 %v17959_v56, %v13168_v45  ;;  %v13179_v2 = vsub.f32 %v17962_v3, %v13178_v39 }
 0x216   :  { %v13170_v59 = vand.u32 4294901760, %v13169_v63  ;;  %v13180_v23 = vand.u32 4294901760, %v13179_v2 }
 0x218   :  { %15677 = vmatmul.mubr.f32.vlgmr.msra.gmra.mrb[20].mxu0 %v12015_v38 }
 0x219   :  { %16318 = vmatpush3.bf16.msra.mxu0 %v16889_v58  ;;  %15683 = vmatprep.mubr.f32.mxu0 %v17783_v12 }
 0x21a   :  { %15201 = vmatmul.mubr.f32.vlgmr.msra.gmra.mrb[8].mxu1 %v17924_v20  ;;  %16320 = vmatprep.subr.bf16.mxu0 %v16815_v11 }
 0x21b   :  { %16046 = vmatpush3.bf16.msra.mxu1 %v16869_v26  ;;  %15207 = vmatprep.mubr.f32.mxu1 %v5509_v47 }
 0x21c   :  { %16048 = vmatprep.subr.bf16.mxu1 %v16815_v11 }
 0x21e   :  { %v15272_v44 = vpop.f32.mrb[10].mxu0 }
 0x21f   :  { %v6525_v38 = vsel %vm17229_vm11, %v15272_v44, 0.0  ;;  %v6514_v52 = vpop.f32.mrb[11].mxu0 }
 0x220   :  { %v6531_v46 = vrot.slane %v6525_v38, 6  ;;  %v6536_v4 = vrot.slane %v6525_v38, 5  ;;  %v6538_v19 = vrot.slane %v6525_v38, 4  ;;  %v6524_v37 = vsel %vm17235_vm12, %v6514_v52, 0.0  ;;  %15684 = vmatmul.mubr.f32.vlgmr.msra.gmra.mrb[20].mxu0 %v17788_v25 }
 0x221   :  { %v6527_v43 = vrot.slane %v6524_v37, 7  ;;  %v6530_v34 = vrot.slane %v6524_v37, 6  ;;  %16322 = vmatpush3.bf16.msra.mxu0 %v16815_v11  ;;  %15690 = vmatprep.mubr.f32.mxu0 %v17783_v12 }
 0x222   :  { %v6542_v55 = vsel %vm64_vm0, %v6531_v46, %v6536_v4  ;;  %15208 = vmatmul.mubr.f32.vlgmr.msra.gmra.mrb[8].mxu1 %v17933_v17  ;;  %16348 = vmatprep.subr.bf16.mxu0 %v16815_v11 }
 0x223   :  { %v6543_v31 = vsel %vm79_vm2, %v6542_v55, %v6538_v19  ;;  %v6532_v60 = vsel %vm64_vm0, %v6530_v34, %v6531_v46  ;;  %v6540_v42 = vsel %vm75_vm1, %v6524_v37, %v6527_v43  ;;  %16050 = vmatpush3.bf16.msra.mxu1 %v16815_v11  ;;  %15214 = vmatprep.mubr.f32.mxu1 %v5510_v32 }
 0x224   :  { %v6548_v10 = vmul.f32 0.25, %v6543_v31  ;;  %v6563_v61 = vmul.f32 0.4, %v6543_v31  ;;  %v6585_v12 = vmul.f32 0.05, %v6543_v31  ;;  %v6541_v1 = vsel %vm64_vm0, %v6540_v42, %v6530_v34  ;;  %16052 = vmatprep.subr.bf16.mxu1 %v16889_v58 }
 0x225   :  { %v6544_v48 = vmul.f32 0.05, %v6541_v1  ;;  %v6545_v9 = vmul.f32 0.05, %v6532_v60  ;;  %v6546_v6 = vmul.f32 0.25, %v6541_v1  ;;  %v6547_v29 = vmul.f32 0.25, %v6532_v60 }
 0x226   :  { %v6555_v15 = vrot.slane %v6548_v10, 1  ;;  %v6570_v13 = vrot.slane %v6563_v61, 2  ;;  %v6579_v51 = vrot.slane %v6548_v10, 3  ;;  %v6592_v50 = vrot.slane %v6585_v12, 4 }
 0x227   :  { %v6552_v54 = vrot.slane %v6546_v6, 1  ;;  %v6553_v16 = vrot.slane %v6547_v29, 1  ;;  %v6561_v33 = vmul.f32 0.4, %v6541_v1  ;;  %v6562_v7 = vmul.f32 0.4, %v6532_v60 }
 0x228   :  { %v6576_v53 = vrot.slane %v6546_v6, 3  ;;  %v6577_v24 = vrot.slane %v6547_v29, 3  ;;  %v6589_v41 = vrot.slane %v6544_v48, 4  ;;  %v6590_v47 = vrot.slane %v6545_v9, 4  ;;  %15691 = vmatmul.mubr.f32.vlgmr.msra.gmra.mrb[20].mxu0 %v17788_v25 }
 0x229   :  { %v6554_v0 = vsel %vm85_vm3, %v6552_v54, %v6553_v16  ;;  %v6556_v32 = vsel %vm85_vm3, %v6553_v16, %v6555_v15  ;;  %v6567_v27 = vrot.slane %v6561_v33, 2  ;;  %v6568_v30 = vrot.slane %v6562_v7, 2  ;;  %16350 = vmatpush3.bf16.msra.mxu0 %v16815_v11  ;;  %15739 = vmatprep.mubr.f32.mxu0 %v13170_v59 }
 0x22a   :  { %v6559_v62 = vadd.f32 %v6554_v0, %v6544_v48  ;;  %v6560_v22 = vadd.f32 %v6556_v32, %v6545_v9  ;;  %v6578_v35 = vsel %vm111_vm5, %v6576_v53, %v6577_v24  ;;  %v6580_v28 = vsel %vm111_vm5, %v6577_v24, %v6579_v51  ;;  %15215 = vmatmul.mubr.f32.vlgmr.msra.gmra.mrb[8].mxu1 %v5520_v21 }
 0x22b   :  { %v6569_v25 = vsel %vm101_vm4, %v6567_v27, %v6568_v30  ;;  %v6571_v5 = vsel %vm101_vm4, %v6568_v30, %v6570_v13  ;;  %v6593_v40 = vsel %vm125_vm6, %v6590_v47, %v6592_v50  ;;  %16054 = vmatpush3.bf16.msra.mxu1 %v16889_v58  ;;  %16352 = vmatprep.subr.bf16.mxu0 %v16845_v57 }
 0x22c   :  { %v6574_v44 = vadd.f32 %v6569_v25, %v6559_v62  ;;  %v6575_v63 = vadd.f32 %v6571_v5, %v6560_v22  ;;  %15221 = vmatprep.mubr.f32.mxu1 %v17922_v49  ;;  %15740 = vmatmul.mubr.f32.vlgmr.msra.gmra.mrb[22].mxu0 %v13180_v23  ;;  %v6591_v38 = vsel %vm125_vm6, %v6589_v41, %v6590_v47 }
 0x22d   :  { %16354 = vmatpush3.bf16.msra.mxu0 %v16845_v57  ;;  %16056 = vmatprep.subr.bf16.mxu1 %v16815_v11 }
 0x22e   :  { %v6583_v17 = vadd.f32 %v6578_v35, %v6574_v44  ;;  %v6584_v21 = vadd.f32 %v6580_v28, %v6575_v63  ;;  %15746 = vmatprep.mubr.f32.mxu0 %v17950_v18  ;;  %16356 = vmatprep.subr.bf16.mxu0 %v16869_v26 }
 0x230   :  { %v6596_v52 = vadd.f32 %v6591_v38, %v6583_v17  ;;  %v6597_v2 = vadd.f32 %v6593_v40, %v6584_v21 }
 0x232   :  { %15222 = vmatmul.mubr.f32.vlgmr.msra.gmra.mrb[8].mxu1 %v17924_v20  ;;  %v6599_v46 = vsel %vm135_vm7, %v6596_v52, 0  ;;  %v6602_v4 = vsel %vm135_vm7, %v6597_v2, 0 }
 0x233   :  { %16058 = vmatpush3.bf16.msra.mxu1 %v16815_v11  ;;  %15228 = vmatprep.mubr.f32.mxu1 %v17922_v49  ;;  %v18020_v19 = vand.u32 4294901760, %v6599_v46  ;;  %v18022_v37 = vand.u32 4294901760, %v6602_v4 }
 0x234   :  { %15747 = vmatmul.mubr.f32.vlgmr.msra.gmra.mrb[22].mxu0 %v17954_v14  ;;  %16084 = vmatprep.subr.bf16.mxu1 %v16815_v11 }
 0x235   :  { %16358 = vmatpush3.bf16.msra.mxu0 %v16869_v26  ;;  %15753 = vmatprep.mubr.f32.mxu0 %v17959_v56  ;;  %v6672_v43 = vsub.f32 %v6599_v46, %v18020_v19  ;;  %v18030_v34 = vsub.f32 %v6602_v4, %v18022_v37 }
 0x236   :  { %16360 = vmatprep.subr.bf16.mxu0 %v16815_v11 }
 0x237   :  { %v6673_v49 = vand.u32 4294901760, %v6672_v43  ;;  %v6683_v55 = vand.u32 4294901760, %v18030_v34 }
 0x239   :  { %v6674_v59 = vsub.f32 %v6672_v43, %v6673_v49  ;;  %v6684_v31 = vsub.f32 %v18030_v34, %v6683_v55 }
 0x23a   :  { %15229 = vmatmul.mubr.f32.vlgmr.msra.gmra.mrb[8].mxu1 %v17924_v20 }
 0x23b   :  { %16086 = vmatpush3.bf16.msra.mxu1 %v16815_v11  ;;  %v6675_v60 = vand.u32 4294901760, %v6674_v59  ;;  %v6685_v42 = vand.u32 4294901760, %v6684_v31 }
 0x23c   :  { %15754 = vmatmul.mubr.f32.vlgmr.msra.gmra.mrb[22].mxu0 %v17962_v3  ;;  %16088 = vmatprep.subr.bf16.mxu1 %v16845_v57 }
 0x23d   :  { %16362 = vmatpush3.bf16.msra.mxu0 %v16815_v11  ;;  %15277 = vmatprep.mubr.f32.mxu1 %v6675_v60 }
 0x23e   :  { %15278 = vmatmul.mubr.f32.vlgmr.msra.gmra.mrb[10].mxu1 %v6685_v42  ;;  %15760 = vmatprep.mubr.f32.mxu0 %v13168_v45 }
 0x23f   :  { %16090 = vmatpush3.bf16.msra.mxu1 %v16845_v57  ;;  %15284 = vmatprep.mubr.f32.mxu1 %v18020_v19 }
 0x240   :  { %16364 = vmatprep.subr.bf16.mxu0 %v16889_v58  ;;  %16092 = vmatprep.subr.bf16.mxu1 %v16869_v26 }
 0x244   :  { %15761 = vmatmul.mubr.f32.vlgmr.msra.gmra.mrb[22].mxu0 %v13178_v39 }
 0x245   :  { %16366 = vmatpush3.bf16.msra.mxu0 %v16889_v58  ;;  %15767 = vmatprep.mubr.f32.mxu0 %v17950_v18 }
 0x246   :  { %15285 = vmatmul.mubr.f32.vlgmr.msra.gmra.mrb[10].mxu1 %v18022_v37  ;;  %16368 = vmatprep.subr.bf16.mxu0 %v16815_v11 }
 0x247   :  { %16094 = vmatpush3.bf16.msra.mxu1 %v16869_v26  ;;  %15291 = vmatprep.mubr.f32.mxu1 %v6672_v43 }
 0x248   :  { %16096 = vmatprep.subr.bf16.mxu1 %v16815_v11 }
 0x24a   :  { %v15356_v20 = vpop.f32.mrb[12].mxu0 }
 0x24b   :  { %v7721_v56 = vsel %vm17229_vm11, %v15356_v20, 0.0  ;;  %v7710_v45 = vpop.f32.mrb[13].mxu0 }
 0x24c   :  { %v7727_v3 = vrot.slane %v7721_v56, 6  ;;  %v7732_v39 = vrot.slane %v7721_v56, 5  ;;  %v7734_v23 = vrot.slane %v7721_v56, 4  ;;  %v7720_v10 = vsel %vm17235_vm12, %v7710_v45, 0.0  ;;  %15768 = vmatmul.mubr.f32.vlgmr.msra.gmra.mrb[22].mxu0 %v17954_v14 }
 0x24d   :  { %v7723_v61 = vrot.slane %v7720_v10, 7  ;;  %v7726_v12 = vrot.slane %v7720_v10, 6  ;;  %16370 = vmatpush3.bf16.msra.mxu0 %v16815_v11  ;;  %15774 = vmatprep.mubr.f32.mxu0 %v17950_v18 }
 0x24e   :  { %v7738_v1 = vsel %vm64_vm0, %v7727_v3, %v7732_v39  ;;  %15292 = vmatmul.mubr.f32.vlgmr.msra.gmra.mrb[10].mxu1 %v18030_v34 }
 0x24f   :  { %v7739_v48 = vsel %vm79_vm2, %v7738_v1, %v7734_v23  ;;  %v7728_v9 = vsel %vm64_vm0, %v7726_v12, %v7727_v3  ;;  %v7736_v6 = vsel %vm75_vm1, %v7720_v10, %v7723_v61  ;;  %16098 = vmatpush3.bf16.msra.mxu1 %v16815_v11  ;;  %15298 = vmatprep.mubr.f32.mxu1 %v6673_v49 }
 0x250   :  { %v7744_v29 = vmul.f32 0.25, %v7739_v48  ;;  %v7759_v15 = vmul.f32 0.4, %v7739_v48  ;;  %v7781_v13 = vmul.f32 0.05, %v7739_v48  ;;  %v7737_v51 = vsel %vm64_vm0, %v7736_v6, %v7726_v12  ;;  %16100 = vmatprep.subr.bf16.mxu1 %v16889_v58 }
 0x251   :  { %v7740_v18 = vmul.f32 0.05, %v7737_v51  ;;  %v7741_v50 = vmul.f32 0.05, %v7728_v9  ;;  %v7742_v54 = vmul.f32 0.25, %v7737_v51  ;;  %v7743_v16 = vmul.f32 0.25, %v7728_v9 }
 0x252   :  { %v7751_v33 = vrot.slane %v7744_v29, 1  ;;  %v7766_v7 = vrot.slane %v7759_v15, 2  ;;  %v7775_v53 = vrot.slane %v7744_v29, 3  ;;  %v7788_v24 = vrot.slane %v7781_v13, 4 }
 0x253   :  { %v7748_v41 = vrot.slane %v7742_v54, 1  ;;  %v7749_v47 = vrot.slane %v7743_v16, 1  ;;  %v7757_v0 = vmul.f32 0.4, %v7737_v51  ;;  %v7758_v32 = vmul.f32 0.4, %v7728_v9 }
 0x254   :  { %v7772_v27 = vrot.slane %v7742_v54, 3  ;;  %v7773_v30 = vrot.slane %v7743_v16, 3  ;;  %v7785_v62 = vrot.slane %v7740_v18, 4  ;;  %v7786_v22 = vrot.slane %v7741_v50, 4  ;;  %15775 = vmatmul.mubr.f32.vlgmr.msra.gmra.mrb[22].mxu0 %v17954_v14 }
 0x255   :  { %v7750_v35 = vsel %vm85_vm3, %v7748_v41, %v7749_v47  ;;  %v7752_v28 = vsel %vm85_vm3, %v7749_v47, %v7751_v33  ;;  %v7763_v25 = vrot.slane %v7757_v0, 2  ;;  %v7764_v5 = vrot.slane %v7758_v32, 2 }
 0x256   :  { %v7755_v40 = vadd.f32 %v7750_v35, %v7740_v18  ;;  %v7756_v44 = vadd.f32 %v7752_v28, %v7741_v50  ;;  %v7774_v63 = vsel %vm111_vm5, %v7772_v27, %v7773_v30  ;;  %v7776_v38 = vsel %vm111_vm5, %v7773_v30, %v7775_v53  ;;  %15299 = vmatmul.mubr.f32.vlgmr.msra.gmra.mrb[10].mxu1 %v6683_v55 }
 0x257   :  { %v7765_v17 = vsel %vm101_vm4, %v7763_v25, %v7764_v5  ;;  %v7767_v21 = vsel %vm101_vm4, %v7764_v5, %v7766_v7  ;;  %v7789_v14 = vsel %vm125_vm6, %v7786_v22, %v7788_v24  ;;  %16102 = vmatpush3.bf16.msra.mxu1 %v16889_v58  ;;  %15305 = vmatprep.mubr.f32.mxu1 %v18020_v19 }
 0x258   :  { %v7770_v52 = vadd.f32 %v7765_v17, %v7755_v40  ;;  %v7771_v2 = vadd.f32 %v7767_v21, %v7756_v44  ;;  %16104 = vmatprep.subr.bf16.mxu1 %v16815_v11  ;;  %v7787_v46 = vsel %vm125_vm6, %v7785_v62, %v7786_v22 }
 0x25a   :  { %v7779_v4 = vadd.f32 %v7774_v63, %v7770_v52  ;;  %v7780_v43 = vadd.f32 %v7776_v38, %v7771_v2 }
 0x25c   :  { %v7792_v34 = vadd.f32 %v7787_v46, %v7779_v4  ;;  %v7793_v49 = vadd.f32 %v7789_v14, %v7780_v43 }
 0x25d   :  { %v18085_v55 = vpop.f32.mrb[0].mxu1 }
 0x25e   :  { %v18087_v59 = vpop.f32.mrb[1].mxu1  ;;  %15306 = vmatmul.mubr.f32.vlgmr.msra.gmra.mrb[10].mxu1 %v18022_v37  ;;  %v7795_v31 = vsel %vm135_vm7, %v7792_v34, 0  ;;  %v7798_v60 = vsel %vm135_vm7, %v7793_v49, 0 }
 0x25f   :  { %16106 = vmatpush3.bf16.msra.mxu1 %v16815_v11  ;;  %15312 = vmatprep.mubr.f32.mxu1 %v18020_v19  ;;  %v18094_v42 = vand.u32 4294901760, %v7795_v31  ;;  %v18096_v20 = vand.u32 4294901760, %v7798_v60 }
 0x260   :  { %16132 = vmatprep.subr.bf16.mxu1 %v16815_v11 }
 0x261   :  { %v7868_v56 = vsub.f32 %v7795_v31, %v18094_v42  ;;  %v7878_v45 = vsub.f32 %v7798_v60, %v18096_v20 }
 0x263   :  { %v7869_v3 = vand.u32 4294901760, %v7868_v56  ;;  %v7879_v39 = vand.u32 4294901760, %v7878_v45 }
 0x265   :  { %v7870_v23 = vsub.f32 %v7868_v56, %v7869_v3  ;;  %v7880_v10 = vsub.f32 %v7878_v45, %v7879_v39 }
 0x266   :  { %15313 = vmatmul.mubr.f32.vlgmr.msra.gmra.mrb[10].mxu1 %v18022_v37 }
 0x267   :  { %16134 = vmatpush3.bf16.msra.mxu1 %v16815_v11  ;;  %v7871_v61 = vand.u32 4294901760, %v7870_v23  ;;  %v7881_v19 = vand.u32 4294901760, %v7880_v10 }
 0x268   :  { %16136 = vmatprep.subr.bf16.mxu1 %v16845_v57 }
 0x269   :  { %15361 = vmatprep.mubr.f32.mxu1 %v7871_v61  ;;  %v16676_v61 = vld [vmem:[#allocation2 + $0x8] sm:$0xff] }
 0x26a   :  { %15362 = vmatmul.mubr.f32.vlgmr.msra.gmra.mrb[12].mxu1 %v7881_v19  ;;  %v1227_v19 = vsub.f32 %v16676_v61, %v18085_v55 }
 0x26b   :  { %16138 = vmatpush3.bf16.msra.mxu1 %v16845_v57  ;;  %15368 = vmatprep.mubr.f32.mxu1 %v18094_v42 }
 0x26c   :  { %16140 = vmatprep.subr.bf16.mxu1 %v16869_v26 }
 0x272   :  { %15369 = vmatmul.mubr.f32.vlgmr.msra.gmra.mrb[12].mxu1 %v18096_v20 }
 0x273   :  { %16142 = vmatpush3.bf16.msra.mxu1 %v16869_v26  ;;  %15375 = vmatprep.mubr.f32.mxu1 %v7868_v56 }
 0x274   :  { %16144 = vmatprep.subr.bf16.mxu1 %v16815_v11 }
 0x277   :  { %v15440_v37 = vpop.f32.mrb[14].mxu0 }
 0x278   :  { %v8884_v12 = vsel %vm17229_vm11, %v15440_v37, 0.0  ;;  %v8873_v1 = vpop.f32.mrb[15].mxu0  ;;  %v16677_v37 = vld [vmem:[#allocation5 + $0x8] sm:$0xff] }
 0x279   :  { %v8890_v48 = vrot.slane %v8884_v12, 6  ;;  %v8895_v9 = vrot.slane %v8884_v12, 5  ;;  %v8897_v6 = vrot.slane %v8884_v12, 4  ;;  %v8883_v29 = vsel %vm17235_vm12, %v8873_v1, 0.0 }
 0x27a   :  { %v8886_v15 = vrot.slane %v8883_v29, 7  ;;  %v8889_v13 = vrot.slane %v8883_v29, 6  ;;  %15376 = vmatmul.mubr.f32.vlgmr.msra.gmra.mrb[12].mxu1 %v7878_v45 }
 0x27b   :  { %v8901_v51 = vsel %vm64_vm0, %v8890_v48, %v8895_v9  ;;  %16146 = vmatpush3.bf16.msra.mxu1 %v16815_v11  ;;  %15382 = vmatprep.mubr.f32.mxu1 %v7869_v3 }
 0x27c   :  { %v8902_v18 = vsel %vm79_vm2, %v8901_v51, %v8897_v6  ;;  %v8891_v50 = vsel %vm64_vm0, %v8889_v13, %v8890_v48  ;;  %v8899_v54 = vsel %vm75_vm1, %v8883_v29, %v8886_v15  ;;  %16148 = vmatprep.subr.bf16.mxu1 %v16889_v58  ;;  %v16678_v48 = vld [vmem:[#allocation2] sm:$0xff] }
 0x27d   :  { %v8907_v16 = vmul.f32 0.25, %v8902_v18  ;;  %v8922_v33 = vmul.f32 0.4, %v8902_v18  ;;  %v8944_v7 = vmul.f32 0.05, %v8902_v18  ;;  %v8900_v53 = vsel %vm64_vm0, %v8899_v54, %v8889_v13  ;;  %v16679_v6 = vld [vmem:[#allocation5] sm:$0xff] }
 0x27e   :  { %v8903_v24 = vmul.f32 0.05, %v8900_v53  ;;  %v8904_v41 = vmul.f32 0.05, %v8891_v50  ;;  %v8905_v47 = vmul.f32 0.25, %v8900_v53  ;;  %v8906_v0 = vmul.f32 0.25, %v8891_v50 }
 0x27f   :  { %v8914_v32 = vrot.slane %v8907_v16, 1  ;;  %v8929_v27 = vrot.slane %v8922_v33, 2  ;;  %v8938_v30 = vrot.slane %v8907_v16, 3  ;;  %v8951_v62 = vrot.slane %v8944_v7, 4 }
 0x280   :  { %v8911_v22 = vrot.slane %v8905_v47, 1  ;;  %v8912_v35 = vrot.slane %v8906_v0, 1  ;;  %v8920_v28 = vmul.f32 0.4, %v8900_v53  ;;  %v8921_v25 = vmul.f32 0.4, %v8891_v50 }
 0x281   :  { %v8935_v5 = vrot.slane %v8905_v47, 3  ;;  %v8936_v40 = vrot.slane %v8906_v0, 3  ;;  %v8948_v44 = vrot.slane %v8903_v24, 4  ;;  %v8949_v63 = vrot.slane %v8904_v41, 4 }
 0x282   :  { %v8913_v38 = vsel %vm85_vm3, %v8911_v22, %v8912_v35  ;;  %v8915_v17 = vsel %vm85_vm3, %v8912_v35, %v8914_v32  ;;  %v8926_v21 = vrot.slane %v8920_v28, 2  ;;  %v8927_v14 = vrot.slane %v8921_v25, 2  ;;  %15383 = vmatmul.mubr.f32.vlgmr.msra.gmra.mrb[12].mxu1 %v7879_v39 }
 0x283   :  { %v8918_v52 = vadd.f32 %v8913_v38, %v8903_v24  ;;  %v8919_v2 = vadd.f32 %v8915_v17, %v8904_v41  ;;  %v8937_v46 = vsel %vm111_vm5, %v8935_v5, %v8936_v40  ;;  %v8939_v4 = vsel %vm111_vm5, %v8936_v40, %v8938_v30  ;;  %16150 = vmatpush3.bf16.msra.mxu1 %v16889_v58 }
 0x284   :  { %v8928_v43 = vsel %vm101_vm4, %v8926_v21, %v8927_v14  ;;  %v8930_v34 = vsel %vm101_vm4, %v8927_v14, %v8929_v27  ;;  %v8952_v49 = vsel %vm125_vm6, %v8949_v63, %v8951_v62  ;;  %15389 = vmatprep.mubr.f32.mxu1 %v18094_v42  ;;  %16152 = vmatprep.subr.bf16.mxu1 %v16815_v11 }
 0x285   :  { %v8933_v31 = vadd.f32 %v8928_v43, %v8918_v52  ;;  %v8934_v60 = vadd.f32 %v8930_v34, %v8919_v2  ;;  %v8950_v56 = vsel %vm125_vm6, %v8948_v44, %v8949_v63  ;;  %v1226_v9 = vsub.f32 %v16678_v48, %v18087_v59 }
 0x287   :  { %v8942_v45 = vadd.f32 %v8937_v46, %v8933_v31  ;;  %v8943_v3 = vadd.f32 %v8939_v4, %v8934_v60 }
 0x289   :  { %v14978_v39 = vpop.f32.mrb[2].mxu1  ;;  %v8955_v23 = vadd.f32 %v8950_v56, %v8942_v45  ;;  %v8956_v10 = vadd.f32 %v8952_v49, %v8943_v3 }
 0x28a   :  { %v2389_v12 = vsub.f32 %v16677_v37, %v14978_v39  ;;  %v2378_v1 = vpop.f32.mrb[3].mxu1  ;;  %15390 = vmatmul.mubr.f32.vlgmr.msra.gmra.mrb[12].mxu1 %v18096_v20 }
 0x28b   :  { %v2388_v29 = vsub.f32 %v16679_v6, %v2378_v1  ;;  %16154 = vmatpush3.bf16.msra.mxu1 %v16815_v11  ;;  %15396 = vmatprep.mubr.f32.mxu1 %v18094_v42  ;;  %v8958_v15 = vsel %vm135_vm7, %v8955_v23, 0  ;;  %v8961_v13 = vsel %vm135_vm7, %v8956_v10, 0 }
 0x28c   :  { %v2391_v51 = vsub.f32 %v1227_v19, %v2389_v12  ;;  %16180 = vmatprep.subr.bf16.mxu1 %v16815_v11  ;;  %v18140_v55 = vand.u32 4294901760, %v8958_v15  ;;  %v18142_v18 = vand.u32 4294901760, %v8961_v13 }
 0x28d   :  { %v2390_v50 = vsub.f32 %v1226_v9, %v2388_v29 }
 0x28e   :  { %v2393_v54 = vmul.f32 %v2391_v51, %v2391_v51  ;;  %v9031_v59 = vsub.f32 %v8958_v15, %v18140_v55  ;;  %v18146_v16 = vsub.f32 %v8961_v13, %v18142_v18 }
 0x28f   :  { %v2392_v33 = vmul.f32 %v2390_v50, %v2390_v50 }
 0x290   :  { %v2395_v42 = vadd.f32 1e-06, %v2393_v54  ;;  %v9032_v7 = vand.u32 4294901760, %v9031_v59  ;;  %v9042_v53 = vand.u32 4294901760, %v18146_v16 }
 0x291   :  { %v2394_v24 = vadd.f32 1e-06, %v2392_v33 }
 0x292   :  { %15397 = vmatmul.mubr.f32.vlgmr.msra.gmra.mrb[12].mxu1 %v18096_v20  ;;  %v9033_v41 = vsub.f32 %v9031_v59, %v9032_v7  ;;  %v9043_v47 = vsub.f32 %v18146_v16, %v9042_v53  ;;  %16652 = vrsqrt.f32 %v2395_v42  ;;  %vm2405_vm13 = vcmp.eq.f32.partialorder %v2395_v42, inf }
 0x293   :  { %16182 = vmatpush3.bf16.msra.mxu1 %v16815_v11  ;;  %16654 = vrsqrt.f32 %v2394_v24  ;;  %v2408_v22 = vand.u32 2147483648, %v2395_v42  ;;  %vm2398_vm14 = vcmp.eq.f32.partialorder %v2394_v24, inf  ;;  %v2401_v35 = vand.u32 2147483648, %v2394_v24 }
 0x294   :  { %v9034_v0 = vand.u32 4294901760, %v9033_v41  ;;  %16184 = vmatprep.subr.bf16.mxu1 %v16845_v57  ;;  %v9044_v32 = vand.u32 4294901760, %v9043_v47  ;;  %vm2407_vm15 = vcmp.eq.f32.partialorder %v2395_v42, 0.0  ;;  %vm2400_vm8 = vcmp.eq.f32.partialorder %v2394_v24, 0.0 }
 0x296   :  { %15445 = vmatprep.mubr.f32.mxu1 %v9034_v0 }
 0x297   :  { %15446 = vmatmul.mubr.f32.vlgmr.msra.gmra.mrb[14].mxu1 %v9044_v32 }
 0x298   :  { %16186 = vmatpush3.bf16.msra.mxu1 %v16845_v57  ;;  %15452 = vmatprep.mubr.f32.mxu1 %v18140_v55 }
 0x299   :  { %16188 = vmatprep.subr.bf16.mxu1 %v16869_v26 }
 0x29c   :  { %v16653_v20 = vpop.eup %16652 }
 0x29d   :  { %v16655_v27 = vpop.eup %16654  ;;  %v2404_v30 = vmul.f32 %v16653_v20, %v2395_v42 }
 0x29e   :  { %v2397_v62 = vmul.f32 %v16655_v27, %v2394_v24 }
 0x29f   :  { %15453 = vmatmul.mubr.f32.vlgmr.msra.gmra.mrb[14].mxu1 %v18142_v18  ;;  %v2406_v28 = vsel %vm2405_vm13, %v2395_v42, %v2404_v30 }
 0x2a0   :  { %16190 = vmatpush3.bf16.msra.mxu1 %v16869_v26  ;;  %15459 = vmatprep.mubr.f32.mxu1 %v9031_v59  ;;  %v2399_v25 = vsel %vm2398_vm14, %v2394_v24, %v2397_v62  ;;  %v2409_v5 = vsel %vm2407_vm15, %v2408_v22, %v2406_v28 }
 0x2a1   :  { %16192 = vmatprep.subr.bf16.mxu1 %v16815_v11  ;;  %v2402_v40 = vsel %vm2400_vm8, %v2401_v35, %v2399_v25  ;;  %v2411_v44 = vsel %vm135_vm7, %v2409_v5, 0.0 }
 0x2a2   :  { %v2410_v63 = vsel %vm135_vm7, %v2402_v40, 0.0 }
 0x2a3   :  { %v15524_v38 = vpop.f32.mrb[16].mxu0  ;;  %v2412_v17 = vadd.f32 %v2411_v44, %v2410_v63 }
 0x2a4   :  { %v10080_v21 = vsel %vm17229_vm11, %v15524_v38, 0.0  ;;  %v10069_v14 = vpop.f32.mrb[17].mxu0 }
 0x2a5   :  { %v10086_v52 = vrot.slane %v10080_v21, 6  ;;  %v10091_v2 = vrot.slane %v10080_v21, 5  ;;  %v10093_v46 = vrot.slane %v10080_v21, 4  ;;  %v10079_v4 = vsel %vm17235_vm12, %v10069_v14, 0.0  ;;  %2413 = vadd.xlane.f32.xlu0 %v2412_v17 }
 0x2a6   :  { %v10082_v43 = vrot.slane %v10079_v4, 7  ;;  %v10085_v34 = vrot.slane %v10079_v4, 6 }
 0x2a7   :  { %v10097_v49 = vsel %vm64_vm0, %v10086_v52, %v10091_v2  ;;  %15460 = vmatmul.mubr.f32.vlgmr.msra.gmra.mrb[14].mxu1 %v18146_v16 }
 0x2a8   :  { %v10098_v31 = vsel %vm79_vm2, %v10097_v49, %v10093_v46  ;;  %v10087_v60 = vsel %vm64_vm0, %v10085_v34, %v10086_v52  ;;  %v10095_v56 = vsel %vm75_vm1, %v10079_v4, %v10082_v43  ;;  %16194 = vmatpush3.bf16.msra.mxu1 %v16815_v11  ;;  %15466 = vmatprep.mubr.f32.mxu1 %v9032_v7 }
 0x2a9   :  { %v10103_v45 = vmul.f32 0.25, %v10098_v31  ;;  %v10118_v3 = vmul.f32 0.4, %v10098_v31  ;;  %v10140_v39 = vmul.f32 0.05, %v10098_v31  ;;  %v10096_v23 = vsel %vm64_vm0, %v10095_v56, %v10085_v34  ;;  %16196 = vmatprep.subr.bf16.mxu1 %v16889_v58 }
 0x2aa   :  { %v10099_v10 = vmul.f32 0.05, %v10096_v23  ;;  %v10100_v61 = vmul.f32 0.05, %v10087_v60  ;;  %v10101_v19 = vmul.f32 0.25, %v10096_v23  ;;  %v10102_v37 = vmul.f32 0.25, %v10087_v60 }
 0x2ab   :  { %v10110_v12 = vrot.slane %v10103_v45, 1  ;;  %v10125_v1 = vrot.slane %v10118_v3, 2  ;;  %v10134_v48 = vrot.slane %v10103_v45, 3  ;;  %v10147_v9 = vrot.slane %v10140_v39, 4 }
 0x2ac   :  { %v10107_v6 = vrot.slane %v10101_v19, 1  ;;  %v10108_v29 = vrot.slane %v10102_v37, 1  ;;  %v10116_v15 = vmul.f32 0.4, %v10096_v23  ;;  %v10117_v13 = vmul.f32 0.4, %v10087_v60 }
 0x2ad   :  { %v10131_v51 = vrot.slane %v10101_v19, 3  ;;  %v10132_v50 = vrot.slane %v10102_v37, 3  ;;  %v10144_v54 = vrot.slane %v10099_v10, 4  ;;  %v10145_v59 = vrot.slane %v10100_v61, 4 }
 0x2ae   :  { %v10109_v33 = vsel %vm85_vm3, %v10107_v6, %v10108_v29  ;;  %v10111_v42 = vsel %vm85_vm3, %v10108_v29, %v10110_v12  ;;  %v10122_v7 = vrot.slane %v10116_v15, 2  ;;  %v10123_v24 = vrot.slane %v10117_v13, 2 }
 0x2af   :  { %v10114_v41 = vadd.f32 %v10109_v33, %v10099_v10  ;;  %v10115_v47 = vadd.f32 %v10111_v42, %v10100_v61  ;;  %v10133_v0 = vsel %vm111_vm5, %v10131_v51, %v10132_v50  ;;  %v10135_v32 = vsel %vm111_vm5, %v10132_v50, %v10134_v48  ;;  %15467 = vmatmul.mubr.f32.vlgmr.msra.gmra.mrb[14].mxu1 %v9042_v53 }
 0x2b0   :  { %v10124_v20 = vsel %vm101_vm4, %v10122_v7, %v10123_v24  ;;  %v10126_v27 = vsel %vm101_vm4, %v10123_v24, %v10125_v1  ;;  %v10148_v30 = vsel %vm125_vm6, %v10145_v59, %v10147_v9  ;;  %16198 = vmatpush3.bf16.msra.mxu1 %v16889_v58  ;;  %15473 = vmatprep.mubr.f32.mxu1 %v18140_v55 }
 0x2b1   :  { %v10129_v62 = vadd.f32 %v10124_v20, %v10114_v41  ;;  %v10130_v22 = vadd.f32 %v10126_v27, %v10115_v47  ;;  %16200 = vmatprep.subr.bf16.mxu1 %v16815_v11  ;;  %v10146_v35 = vsel %vm125_vm6, %v10144_v54, %v10145_v59 }
 0x2b3   :  { %v10138_v28 = vadd.f32 %v10133_v0, %v10129_v62  ;;  %v10139_v25 = vadd.f32 %v10135_v32, %v10130_v22 }
 0x2b5   :  { %v18188_v16 = vpop.f32.mrb[4].mxu1  ;;  %v10151_v53 = vadd.f32 %v10146_v35, %v10138_v28  ;;  %v10152_v5 = vadd.f32 %v10148_v30, %v10139_v25 }
 0x2b6   :  { %v18190_v40 = vpop.f32.mrb[5].mxu1 }
 0x2b7   :  { %15474 = vmatmul.mubr.f32.vlgmr.msra.gmra.mrb[14].mxu1 %v18142_v18  ;;  %v10154_v44 = vsel %vm135_vm7, %v10151_v53, 0  ;;  %v10157_v63 = vsel %vm135_vm7, %v10152_v5, 0 }
 0x2b8   :  { %16202 = vmatpush3.bf16.msra.mxu1 %v16815_v11  ;;  %15480 = vmatprep.mubr.f32.mxu1 %v18140_v55  ;;  %v18197_v38 = vand.u32 4294901760, %v10154_v44  ;;  %v18199_v17 = vand.u32 4294901760, %v10157_v63 }
 0x2b9   :  { %16228 = vmatprep.subr.bf16.mxu1 %v16815_v11 }
 0x2ba   :  { %v10227_v21 = vsub.f32 %v10154_v44, %v18197_v38  ;;  %v18204_v14 = vsub.f32 %v10157_v63, %v18199_v17 }
 0x2bc   :  { %v10228_v52 = vand.u32 4294901760, %v10227_v21  ;;  %v10238_v2 = vand.u32 4294901760, %v18204_v14 }
 0x2be   :  { %v10229_v46 = vsub.f32 %v10227_v21, %v10228_v52  ;;  %v10239_v4 = vsub.f32 %v18204_v14, %v10238_v2 }
 0x2bf   :  { %15481 = vmatmul.mubr.f32.vlgmr.msra.gmra.mrb[14].mxu1 %v18142_v18 }
 0x2c0   :  { %16230 = vmatpush3.bf16.msra.mxu1 %v16815_v11  ;;  %v10230_v55 = vand.u32 4294901760, %v10229_v46  ;;  %v10240_v43 = vand.u32 4294901760, %v10239_v4 }
 0x2c1   :  { %16232 = vmatprep.subr.bf16.mxu1 %v16845_v57 }
 0x2c2   :  { %15529 = vmatprep.mubr.f32.mxu1 %v10230_v55  ;;  %v16680_v55 = vld [vmem:[#allocation2 + $0x18] sm:$0xff] }
 0x2c3   :  { %15530 = vmatmul.mubr.f32.vlgmr.msra.gmra.mrb[16].mxu1 %v10240_v43  ;;  %v3585_v43 = vsub.f32 %v16680_v55, %v18188_v16 }
 0x2c4   :  { %16234 = vmatpush3.bf16.msra.mxu1 %v16845_v57  ;;  %15536 = vmatprep.mubr.f32.mxu1 %v18197_v38 }
 0x2c5   :  { %16236 = vmatprep.subr.bf16.mxu1 %v16869_v26 }
 0x2cb   :  { %15537 = vmatmul.mubr.f32.vlgmr.msra.gmra.mrb[16].mxu1 %v18199_v17 }
 0x2cc   :  { %16238 = vmatpush3.bf16.msra.mxu1 %v16869_v26  ;;  %15543 = vmatprep.mubr.f32.mxu1 %v10227_v21 }
 0x2cd   :  { %16240 = vmatprep.subr.bf16.mxu1 %v16815_v11 }
 0x2cf   :  { %v15608_v18 = vpop.f32.mrb[18].mxu0 }
 0x2d0   :  { %v11243_v34 = vsel %vm17229_vm11, %v15608_v18, 0.0  ;;  %v11232_v49 = vpop.f32.mrb[19].mxu0  ;;  %v16681_v18 = vld [vmem:[#allocation5 + $0x18] sm:$0xff] }
 0x2d1   :  { %v11249_v31 = vrot.slane %v11243_v34, 6  ;;  %v11254_v60 = vrot.slane %v11243_v34, 5  ;;  %v11256_v56 = vrot.slane %v11243_v34, 4  ;;  %v11242_v45 = vsel %vm17235_vm12, %v11232_v49, 0.0 }
 0x2d2   :  { %v11245_v3 = vrot.slane %v11242_v45, 7  ;;  %v11248_v39 = vrot.slane %v11242_v45, 6 }
 0x2d3   :  { %v11260_v23 = vsel %vm64_vm0, %v11249_v31, %v11254_v60  ;;  %15544 = vmatmul.mubr.f32.vlgmr.msra.gmra.mrb[16].mxu1 %v18204_v14 }
 0x2d4   :  { %v11261_v10 = vsel %vm79_vm2, %v11260_v23, %v11256_v56  ;;  %v11250_v61 = vsel %vm64_vm0, %v11248_v39, %v11249_v31  ;;  %v11258_v19 = vsel %vm75_vm1, %v11242_v45, %v11245_v3  ;;  %16242 = vmatpush3.bf16.msra.mxu1 %v16815_v11  ;;  %15550 = vmatprep.mubr.f32.mxu1 %v10228_v52  ;;  %v16682_v31 = vld [vmem:[#allocation2 + $0x10] sm:$0xff] }
 0x2d5   :  { %v11266_v37 = vmul.f32 0.25, %v11261_v10  ;;  %v11281_v12 = vmul.f32 0.4, %v11261_v10  ;;  %v11303_v1 = vmul.f32 0.05, %v11261_v10  ;;  %v11259_v48 = vsel %vm64_vm0, %v11258_v19, %v11248_v39  ;;  %16244 = vmatprep.subr.bf16.mxu1 %v16889_v58  ;;  %v16683_v56 = vld [vmem:[#allocation5 + $0x10] sm:$0xff] }
 0x2d6   :  { %v11262_v9 = vmul.f32 0.05, %v11259_v48  ;;  %v11263_v6 = vmul.f32 0.05, %v11250_v61  ;;  %v11264_v29 = vmul.f32 0.25, %v11259_v48  ;;  %v11265_v15 = vmul.f32 0.25, %v11250_v61 }
 0x2d7   :  { %v11273_v13 = vrot.slane %v11266_v37, 1  ;;  %v11288_v51 = vrot.slane %v11281_v12, 2  ;;  %v11297_v50 = vrot.slane %v11266_v37, 3  ;;  %v11310_v54 = vrot.slane %v11303_v1, 4 }
 0x2d8   :  { %v11270_v59 = vrot.slane %v11264_v29, 1  ;;  %v11271_v33 = vrot.slane %v11265_v15, 1  ;;  %v11279_v42 = vmul.f32 0.4, %v11259_v48  ;;  %v11280_v7 = vmul.f32 0.4, %v11250_v61 }
 0x2d9   :  { %v11294_v24 = vrot.slane %v11264_v29, 3  ;;  %v11295_v41 = vrot.slane %v11265_v15, 3  ;;  %v11307_v47 = vrot.slane %v11262_v9, 4  ;;  %v11308_v0 = vrot.slane %v11263_v6, 4 }
 0x2da   :  { %v11272_v32 = vsel %vm85_vm3, %v11270_v59, %v11271_v33  ;;  %v11274_v20 = vsel %vm85_vm3, %v11271_v33, %v11273_v13  ;;  %v11285_v27 = vrot.slane %v11279_v42, 2  ;;  %v11286_v30 = vrot.slane %v11280_v7, 2 }
 0x2db   :  { %v11277_v62 = vadd.f32 %v11272_v32, %v11262_v9  ;;  %v11278_v22 = vadd.f32 %v11274_v20, %v11263_v6  ;;  %v11296_v35 = vsel %vm111_vm5, %v11294_v24, %v11295_v41  ;;  %v11298_v28 = vsel %vm111_vm5, %v11295_v41, %v11297_v50  ;;  %15551 = vmatmul.mubr.f32.vlgmr.msra.gmra.mrb[16].mxu1 %v10238_v2 }
 0x2dc   :  { %v11287_v25 = vsel %vm101_vm4, %v11285_v27, %v11286_v30  ;;  %v11289_v53 = vsel %vm101_vm4, %v11286_v30, %v11288_v51  ;;  %v11311_v5 = vsel %vm125_vm6, %v11308_v0, %v11310_v54  ;;  %16246 = vmatpush3.bf16.msra.mxu1 %v16889_v58  ;;  %15557 = vmatprep.mubr.f32.mxu1 %v18197_v38 }
 0x2dd   :  { %v11292_v44 = vadd.f32 %v11287_v25, %v11277_v62  ;;  %v11293_v63 = vadd.f32 %v11289_v53, %v11278_v22  ;;  %16248 = vmatprep.subr.bf16.mxu1 %v16815_v11  ;;  %v11309_v21 = vsel %vm125_vm6, %v11307_v47, %v11308_v0  ;;  %v3584_v60 = vsub.f32 %v16682_v31, %v18190_v40 }
 0x2df   :  { %v11301_v52 = vadd.f32 %v11296_v35, %v11292_v44  ;;  %v11302_v46 = vadd.f32 %v11298_v28, %v11293_v63 }
 0x2e1   :  { %v15146_v14 = vpop.f32.mrb[6].mxu1  ;;  %v11314_v2 = vadd.f32 %v11309_v21, %v11301_v52  ;;  %v11315_v4 = vadd.f32 %v11311_v5, %v11302_v46 }
 0x2e2   :  { %v4748_v34 = vsub.f32 %v16681_v18, %v15146_v14  ;;  %v4737_v49 = vpop.f32.mrb[7].mxu1 }
 0x2e3   :  { %v4747_v45 = vsub.f32 %v16683_v56, %v4737_v49  ;;  %15558 = vmatmul.mubr.f32.vlgmr.msra.gmra.mrb[16].mxu1 %v18199_v17  ;;  %v11317_v3 = vsel %vm135_vm7, %v11314_v2, 0  ;;  %v11320_v39 = vsel %vm135_vm7, %v11315_v4, 0 }
 0x2e4   :  { %v4750_v23 = vsub.f32 %v3585_v43, %v4748_v34  ;;  %16250 = vmatpush3.bf16.msra.mxu1 %v16815_v11  ;;  %15564 = vmatprep.mubr.f32.mxu1 %v18197_v38  ;;  %v18251_v16 = vand.u32 4294901760, %v11317_v3  ;;  %v18253_v10 = vand.u32 4294901760, %v11320_v39 }
 0x2e5   :  { %v4749_v61 = vsub.f32 %v3584_v60, %v4747_v45  ;;  %16276 = vmatprep.subr.bf16.mxu1 %v16815_v11 }
 0x2e6   :  { %v4752_v40 = vmul.f32 %v4750_v23, %v4750_v23  ;;  %v11390_v19 = vsub.f32 %v11317_v3, %v18251_v16  ;;  %v18258_v37 = vsub.f32 %v11320_v39, %v18253_v10 }
 0x2e7   :  { %v4751_v12 = vmul.f32 %v4749_v61, %v4749_v61 }
 0x2e8   :  { %v4754_v1 = vadd.f32 1e-06, %v4752_v40  ;;  %v11391_v48 = vand.u32 4294901760, %v11390_v19  ;;  %v11401_v9 = vand.u32 4294901760, %v18258_v37 }
 0x2e9   :  { %v4753_v6 = vadd.f32 1e-06, %v4751_v12 }
 0x2ea   :  { %v11392_v38 = vsub.f32 %v11390_v19, %v11391_v48  ;;  %v11402_v29 = vsub.f32 %v18258_v37, %v11401_v9  ;;  %16656 = vrsqrt.f32 %v4754_v1  ;;  %vm4764_vm9 = vcmp.eq.f32.partialorder %v4754_v1, inf }
 0x2eb   :  { %15565 = vmatmul.mubr.f32.vlgmr.msra.gmra.mrb[16].mxu1 %v18199_v17  ;;  %16658 = vrsqrt.f32 %v4753_v6  ;;  %v4767_v17 = vand.u32 2147483648, %v4754_v1  ;;  %vm4757_vm10 = vcmp.eq.f32.partialorder %v4753_v6, inf  ;;  %v4760_v33 = vand.u32 2147483648, %v4753_v6 }
 0x2ec   :  { %16278 = vmatpush3.bf16.msra.mxu1 %v16815_v11  ;;  %v11393_v15 = vand.u32 4294901760, %v11392_v38  ;;  %v11403_v13 = vand.u32 4294901760, %v11402_v29  ;;  %vm4766_vm13 = vcmp.eq.f32.partialorder %v4754_v1, 0.0  ;;  %vm4759_vm14 = vcmp.eq.f32.partialorder %v4753_v6, 0.0 }
 0x2ed   :  { %16280 = vmatprep.subr.bf16.mxu1 %v16845_v57 }
 0x2ee   :  { %15613 = vmatprep.mubr.f32.mxu1 %v11393_v15 }
 0x2ef   :  { %15614 = vmatmul.mubr.f32.vlgmr.msra.gmra.mrb[18].mxu1 %v11403_v13 }
 0x2f0   :  { %16282 = vmatpush3.bf16.msra.mxu1 %v16845_v57  ;;  %15620 = vmatprep.mubr.f32.mxu1 %v18251_v16 }
 0x2f1   :  { %16284 = vmatprep.subr.bf16.mxu1 %v16869_v26 }
 0x2f4   :  { %v16657_v51 = vpop.eup %16656 }
 0x2f5   :  { %v16659_v50 = vpop.eup %16658  ;;  %v4763_v54 = vmul.f32 %v16657_v51, %v4754_v1 }
 0x2f6   :  { %v4756_v59 = vmul.f32 %v16659_v50, %v4753_v6 }
 0x2f7   :  { %15621 = vmatmul.mubr.f32.vlgmr.msra.gmra.mrb[18].mxu1 %v18253_v10  ;;  %v4765_v42 = vsel %vm4764_vm9, %v4754_v1, %v4763_v54 }
 0x2f8   :  { %16286 = vmatpush3.bf16.msra.mxu1 %v16869_v26  ;;  %15627 = vmatprep.mubr.f32.mxu1 %v11390_v19  ;;  %v4758_v7 = vsel %vm4757_vm10, %v4753_v6, %v4756_v59  ;;  %v4768_v24 = vsel %vm4766_vm13, %v4767_v17, %v4765_v42 }
 0x2f9   :  { %16288 = vmatprep.subr.bf16.mxu1 %v16815_v11  ;;  %v4761_v41 = vsel %vm4759_vm14, %v4760_v33, %v4758_v7  ;;  %v4770_v47 = vsel %vm135_vm7, %v4768_v24, 0.0 }
 0x2fa   :  { %v4769_v0 = vsel %vm135_vm7, %v4761_v41, 0.0 }
 0x2fb   :  { %v15692_v32 = vpop.f32.mrb[20].mxu0  ;;  %v4771_v20 = vadd.f32 %v4770_v47, %v4769_v0 }
 0x2fc   :  { %v12439_v27 = vsel %vm17229_vm11, %v15692_v32, 0.0  ;;  %v12428_v30 = vpop.f32.mrb[21].mxu0 }
 0x2fd   :  { %v12445_v62 = vrot.slane %v12439_v27, 6  ;;  %v12450_v22 = vrot.slane %v12439_v27, 5  ;;  %v12452_v35 = vrot.slane %v12439_v27, 4  ;;  %v12438_v28 = vsel %vm17235_vm12, %v12428_v30, 0.0  ;;  %4772 = vadd.xlane.f32.xlu0 %v4771_v20 }
 0x2fe   :  { %v12441_v25 = vrot.slane %v12438_v28, 7  ;;  %v12444_v53 = vrot.slane %v12438_v28, 6 }
 0x2ff   :  { %v12456_v5 = vsel %vm64_vm0, %v12445_v62, %v12450_v22  ;;  %15628 = vmatmul.mubr.f32.vlgmr.msra.gmra.mrb[18].mxu1 %v18258_v37 }
 0x300   :  { %v12457_v44 = vsel %vm79_vm2, %v12456_v5, %v12452_v35  ;;  %v12446_v63 = vsel %vm64_vm0, %v12444_v53, %v12445_v62  ;;  %v12454_v21 = vsel %vm75_vm1, %v12438_v28, %v12441_v25  ;;  %16290 = vmatpush3.bf16.msra.mxu1 %v16815_v11  ;;  %15634 = vmatprep.mubr.f32.mxu1 %v11391_v48 }
 0x301   :  { %v12462_v52 = vmul.f32 0.25, %v12457_v44  ;;  %v12477_v46 = vmul.f32 0.4, %v12457_v44  ;;  %v12499_v14 = vmul.f32 0.05, %v12457_v44  ;;  %v12455_v2 = vsel %vm64_vm0, %v12454_v21, %v12444_v53  ;;  %16292 = vmatprep.subr.bf16.mxu1 %v16889_v58 }
 0x302   :  { %v12458_v4 = vmul.f32 0.05, %v12455_v2  ;;  %v12459_v55 = vmul.f32 0.05, %v12446_v63  ;;  %v12460_v43 = vmul.f32 0.25, %v12455_v2  ;;  %v12461_v18 = vmul.f32 0.25, %v12446_v63 }
 0x303   :  { %v12469_v34 = vrot.slane %v12462_v52, 1  ;;  %v12484_v49 = vrot.slane %v12477_v46, 2  ;;  %v12493_v31 = vrot.slane %v12462_v52, 3  ;;  %v12506_v60 = vrot.slane %v12499_v14, 4 }
 0x304   :  { %v12466_v56 = vrot.slane %v12460_v43, 1  ;;  %v12467_v45 = vrot.slane %v12461_v18, 1  ;;  %v12475_v3 = vmul.f32 0.4, %v12455_v2  ;;  %v12476_v39 = vmul.f32 0.4, %v12446_v63 }
 0x305   :  { %v12490_v23 = vrot.slane %v12460_v43, 3  ;;  %v12491_v61 = vrot.slane %v12461_v18, 3  ;;  %v12503_v40 = vrot.slane %v12458_v4, 4  ;;  %v12504_v19 = vrot.slane %v12459_v55, 4 }
 0x306   :  { %v12468_v12 = vsel %vm85_vm3, %v12466_v56, %v12467_v45  ;;  %v12470_v1 = vsel %vm85_vm3, %v12467_v45, %v12469_v34  ;;  %v12481_v48 = vrot.slane %v12475_v3, 2  ;;  %v12482_v6 = vrot.slane %v12476_v39, 2 }
 0x307   :  { %v12473_v38 = vadd.f32 %v12468_v12, %v12458_v4  ;;  %v12474_v29 = vadd.f32 %v12470_v1, %v12459_v55  ;;  %v12492_v15 = vsel %vm111_vm5, %v12490_v23, %v12491_v61  ;;  %v12494_v13 = vsel %vm111_vm5, %v12491_v61, %v12493_v31  ;;  %15635 = vmatmul.mubr.f32.vlgmr.msra.gmra.mrb[18].mxu1 %v11401_v9 }
 0x308   :  { %v12483_v51 = vsel %vm101_vm4, %v12481_v48, %v12482_v6  ;;  %v12485_v50 = vsel %vm101_vm4, %v12482_v6, %v12484_v49  ;;  %v12507_v54 = vsel %vm125_vm6, %v12504_v19, %v12506_v60  ;;  %16294 = vmatpush3.bf16.msra.mxu1 %v16889_v58  ;;  %15641 = vmatprep.mubr.f32.mxu1 %v18251_v16 }
 0x309   :  { %v12488_v59 = vadd.f32 %v12483_v51, %v12473_v38  ;;  %v12489_v17 = vadd.f32 %v12485_v50, %v12474_v29  ;;  %16296 = vmatprep.subr.bf16.mxu1 %v16815_v11  ;;  %v12505_v33 = vsel %vm125_vm6, %v12503_v40, %v12504_v19 }
 0x30b   :  { %v12497_v42 = vadd.f32 %v12492_v15, %v12488_v59  ;;  %v12498_v7 = vadd.f32 %v12494_v13, %v12489_v17 }
 0x30d   :  { %v18300_v37 = vpop.f32.mrb[8].mxu1  ;;  %v12510_v9 = vadd.f32 %v12505_v33, %v12497_v42  ;;  %v12511_v24 = vadd.f32 %v12507_v54, %v12498_v7 }
 0x30e   :  { %v18302_v41 = vpop.f32.mrb[9].mxu1 }
 0x30f   :  { %15642 = vmatmul.mubr.f32.vlgmr.msra.gmra.mrb[18].mxu1 %v18253_v10  ;;  %v12513_v47 = vsel %vm135_vm7, %v12510_v9, 0  ;;  %v12516_v0 = vsel %vm135_vm7, %v12511_v24, 0 }
 0x310   :  { %16298 = vmatpush3.bf16.msra.mxu1 %v16815_v11  ;;  %15648 = vmatprep.mubr.f32.mxu1 %v18251_v16  ;;  %v18309_v32 = vand.u32 4294901760, %v12513_v47  ;;  %v18311_v20 = vand.u32 4294901760, %v12516_v0 }
 0x311   :  { %16324 = vmatprep.subr.bf16.mxu1 %v16815_v11 }
 0x312   :  { %v12586_v27 = vsub.f32 %v12513_v47, %v18309_v32  ;;  %v18316_v30 = vsub.f32 %v12516_v0, %v18311_v20 }
 0x314   :  { %v12587_v62 = vand.u32 4294901760, %v12586_v27  ;;  %v12597_v22 = vand.u32 4294901760, %v18316_v30 }
 0x316   :  { %v12588_v35 = vsub.f32 %v12586_v27, %v12587_v62  ;;  %v12598_v28 = vsub.f32 %v18316_v30, %v12597_v22 }
 0x317   :  { %15649 = vmatmul.mubr.f32.vlgmr.msra.gmra.mrb[18].mxu1 %v18253_v10 }
 0x318   :  { %16326 = vmatpush3.bf16.msra.mxu1 %v16815_v11  ;;  %v12589_v16 = vand.u32 4294901760, %v12588_v35  ;;  %v12599_v25 = vand.u32 4294901760, %v12598_v28 }
 0x319   :  { %16328 = vmatprep.subr.bf16.mxu1 %v16845_v57 }
 0x31a   :  { %15697 = vmatprep.mubr.f32.mxu1 %v12589_v16 }
 0x31b   :  { %15698 = vmatmul.mubr.f32.vlgmr.msra.gmra.mrb[20].mxu1 %v12599_v25 }
 0x31c   :  { %16330 = vmatpush3.bf16.msra.mxu1 %v16845_v57  ;;  %15704 = vmatprep.mubr.f32.mxu1 %v18309_v32 }
 0x31d   :  { %16332 = vmatprep.subr.bf16.mxu1 %v16869_v26 }
 0x323   :  { %15705 = vmatmul.mubr.f32.vlgmr.msra.gmra.mrb[20].mxu1 %v18311_v20 }
 0x324   :  { %16334 = vmatpush3.bf16.msra.mxu1 %v16869_v26  ;;  %15711 = vmatprep.mubr.f32.mxu1 %v12586_v27 }
 0x325   :  { %16336 = vmatprep.subr.bf16.mxu1 %v16815_v11 }
 0x327   :  { %v15776_v10 = vpop.f32.mrb[22].mxu0 }
 0x328   :  { %v13602_v53 = vsel %vm17229_vm11, %v15776_v10, 0.0  ;;  %v13591_v5 = vpop.f32.mrb[23].mxu0  ;;  %v16684_v10 = vld [vmem:[#allocation2 + $0x28] sm:$0xff] }
 0x329   :  { %v13608_v44 = vrot.slane %v13602_v53, 6  ;;  %v13613_v63 = vrot.slane %v13602_v53, 5  ;;  %v13615_v21 = vrot.slane %v13602_v53, 4  ;;  %v13601_v52 = vsel %vm17235_vm12, %v13591_v5, 0.0  ;;  %v16685_v5 = vld [vmem:[#allocation5 + $0x28] sm:$0xff] }
 0x32a   :  { %v13604_v46 = vrot.slane %v13601_v52, 7  ;;  %v13607_v14 = vrot.slane %v13601_v52, 6  ;;  %v5944_v53 = vsub.f32 %v16684_v10, %v18300_v37 }
 0x32b   :  { %v13619_v2 = vsel %vm64_vm0, %v13608_v44, %v13613_v63  ;;  %15712 = vmatmul.mubr.f32.vlgmr.msra.gmra.mrb[20].mxu1 %v18316_v30 }
 0x32c   :  { %v13620_v4 = vsel %vm79_vm2, %v13619_v2, %v13615_v21  ;;  %v13609_v55 = vsel %vm64_vm0, %v13607_v14, %v13608_v44  ;;  %v13617_v8 = vsel %vm75_vm1, %v13601_v52, %v13604_v46  ;;  %16338 = vmatpush3.bf16.msra.mxu1 %v16815_v11  ;;  %15718 = vmatprep.mubr.f32.mxu1 %v12587_v62  ;;  %v16686_v52 = vld [vmem:[#allocation2 + $0x20] sm:$0xff] }
 0x32d   :  { %v13625_v43 = vmul.f32 0.25, %v13620_v4  ;;  %v13640_v18 = vmul.f32 0.4, %v13620_v4  ;;  %v13662_v34 = vmul.f32 0.05, %v13620_v4  ;;  %v13618_v36 = vsel %vm64_vm0, %v13617_v8, %v13607_v14  ;;  %16340 = vmatprep.subr.bf16.mxu1 %v16889_v58  ;;  %v16687_v14 = vld [vmem:[#allocation5 + $0x20] sm:$0xff] }
 0x32e   :  { %v13621_v49 = vmul.f32 0.05, %v13618_v36  ;;  %v13622_v31 = vmul.f32 0.05, %v13609_v55  ;;  %v13623_v60 = vmul.f32 0.25, %v13618_v36  ;;  %v13624_v56 = vmul.f32 0.25, %v13609_v55 }
 0x32f   :  { %v13632_v45 = vrot.slane %v13625_v43, 1  ;;  %v13647_v3 = vrot.slane %v13640_v18, 2  ;;  %v13656_v39 = vrot.slane %v13625_v43, 3  ;;  %v13669_v23 = vrot.slane %v13662_v34, 4 }
 0x330   :  { %v13629_v61 = vrot.slane %v13623_v60, 1  ;;  %v13630_v40 = vrot.slane %v13624_v56, 1  ;;  %v13638_v19 = vmul.f32 0.4, %v13618_v36  ;;  %v13639_v12 = vmul.f32 0.4, %v13609_v55 }
 0x331   :  { %v13653_v1 = vrot.slane %v13623_v60, 3  ;;  %v13654_v48 = vrot.slane %v13624_v56, 3  ;;  %v13666_v6 = vrot.slane %v13621_v49, 4  ;;  %v13667_v38 = vrot.slane %v13622_v31, 4 }
 0x332   :  { %v13631_v29 = vsel %vm85_vm3, %v13629_v61, %v13630_v40  ;;  %v13633_v15 = vsel %vm85_vm3, %v13630_v40, %v13632_v45  ;;  %v13644_v13 = vrot.slane %v13638_v19, 2  ;;  %v13645_v51 = vrot.slane %v13639_v12, 2  ;;  %v2414_v50 = vpop.xlane.xlu0 %2413 }
 0x333   :  { %v13636_v54 = vadd.f32 %v13631_v29, %v13621_v49  ;;  %v13637_v59 = vadd.f32 %v13633_v15, %v13622_v31  ;;  %v13655_v17 = vsel %vm111_vm5, %v13653_v1, %v13654_v48  ;;  %v13657_v33 = vsel %vm111_vm5, %v13654_v48, %v13656_v39  ;;  %15719 = vmatmul.mubr.f32.vlgmr.msra.gmra.mrb[20].mxu1 %v12597_v22 }
 0x334   :  { %v13646_v42 = vsel %vm101_vm4, %v13644_v13, %v13645_v51  ;;  %v13648_v7 = vsel %vm101_vm4, %v13645_v51, %v13647_v3  ;;  %v13670_v9 = vsel %vm125_vm6, %v13667_v38, %v13669_v23  ;;  %16342 = vmatpush3.bf16.msra.mxu1 %v16889_v58  ;;  %v2415_v24 = vrot.slane %v2414_v50, 4  ;;  %15725 = vmatprep.mubr.f32.mxu1 %v18309_v32 }
 0x335   :  { %v13651_v47 = vadd.f32 %v13646_v42, %v13636_v54  ;;  %v13652_v0 = vadd.f32 %v13648_v7, %v13637_v59  ;;  %16344 = vmatprep.subr.bf16.mxu1 %v16815_v11  ;;  %v13668_v27 = vsel %vm125_vm6, %v13666_v6, %v13667_v38  ;;  %v5943_v46 = vsub.f32 %v16686_v52, %v18302_v41 }
 0x336   :  { %v2416_v62 = vadd.f32 %v2415_v24, %v2414_v50  ;;  %v16688_v24 = vld [vmem:[#allocation2 + $0x38] sm:$0xff] }
 0x337   :  { %v13660_v30 = vadd.f32 %v13655_v17, %v13651_v47  ;;  %v13661_v22 = vadd.f32 %v13657_v33, %v13652_v0  ;;  %v16689_v0 = vld [vmem:[#allocation5 + $0x38] sm:$0xff] }
 0x338   :  { %v2417_v35 = vrot.slane %v2416_v62, 2 }
 0x339   :  { %v15314_v28 = vpop.f32.mrb[10].mxu1  ;;  %v13673_v16 = vadd.f32 %v13668_v27, %v13660_v30  ;;  %v13674_v25 = vadd.f32 %v13670_v9, %v13661_v22  ;;  %v16690_v30 = vld [vmem:[#allocation2 + $0x30] sm:$0xff] }
 0x33a   :  { %v7107_v44 = vsub.f32 %v16685_v5, %v15314_v28  ;;  %v7096_v63 = vpop.f32.mrb[11].mxu1  ;;  %v2418_v21 = vadd.f32 %v2417_v35, %v2416_v62  ;;  %v16691_v35 = vld [vmem:[#allocation5 + $0x30] sm:$0xff] }
 0x33b   :  { %v7106_v2 = vsub.f32 %v16687_v14, %v7096_v63  ;;  %15726 = vmatmul.mubr.f32.vlgmr.msra.gmra.mrb[20].mxu1 %v18311_v20  ;;  %v13676_v4 = vsel %vm135_vm7, %v13673_v16, 0  ;;  %v13679_v55 = vsel %vm135_vm7, %v13674_v25, 0 }
 0x33c   :  { %v7109_v8 = vsub.f32 %v5944_v53, %v7107_v44  ;;  %16346 = vmatpush3.bf16.msra.mxu1 %v16815_v11  ;;  %15732 = vmatprep.mubr.f32.mxu1 %v18309_v32  ;;  %v2419_v37 = vrot.slane %v2418_v21, 1  ;;  %v13748_v43 = vand.u32 4294901760, %v13676_v4  ;;  %v13758_v18 = vand.u32 4294901760, %v13679_v55 }
 0x33d   :  { %v7108_v34 = vsub.f32 %v5943_v46, %v7106_v2  ;;  %16372 = vmatprep.subr.bf16.mxu1 %v16815_v11 }
 0x33e   :  { %v7111_v41 = vmul.f32 %v7109_v8, %v7109_v8  ;;  %v2420_v36 = vadd.f32 %v2419_v37, %v2418_v21  ;;  %v13749_v49 = vsub.f32 %v13676_v4, %v13748_v43  ;;  %v13759_v31 = vsub.f32 %v13679_v55, %v13758_v18 }
 0x33f   :  { %v7110_v60 = vmul.f32 %v7108_v34, %v7108_v34 }
 0x340   :  { %v7113_v56 = vadd.f32 1e-06, %v7111_v41  ;;  %16635 = vpush %v2420_v36  ;;  %v13750_v45 = vand.u32 4294901760, %v13749_v49  ;;  %v13760_v3 = vand.u32 4294901760, %v13759_v31 }
 0x341   :  { %v7112_v39 = vadd.f32 1e-06, %v7110_v60 }
 0x342   :  { %v13751_v23 = vsub.f32 %v13749_v49, %v13750_v45  ;;  %v13761_v61 = vsub.f32 %v13759_v31, %v13760_v3  ;;  %16660 = vrsqrt.f32 %v7113_v56  ;;  %vm7123_vm0 = vcmp.eq.f32.partialorder %v7113_v56, inf }
 0x343   :  { %15733 = vmatmul.mubr.f32.vlgmr.msra.gmra.mrb[20].mxu1 %v18311_v20  ;;  %16662 = vrsqrt.f32 %v7112_v39  ;;  %v7126_v20 = vand.u32 2147483648, %v7113_v56  ;;  %vm7116_vm1 = vcmp.eq.f32.partialorder %v7112_v39, inf  ;;  %v7119_v6 = vand.u32 2147483648, %v7112_v39 }
 0x344   :  { %16374 = vmatpush3.bf16.msra.mxu1 %v16815_v11  ;;  %v13752_v32 = vand.u32 4294901760, %v13751_v23  ;;  %v13762_v40 = vand.u32 4294901760, %v13761_v61  ;;  %vm7125_vm2 = vcmp.eq.f32.partialorder %v7113_v56, 0.0  ;;  %vm7118_vm3 = vcmp.eq.f32.partialorder %v7112_v39, 0.0  ;;  %v16693_v61 = vld [vmem:[#allocation5 + $0x48] sm:$0xff] }
 0x345   :  { %16376 = vmatprep.subr.bf16.mxu1 %v16845_v57 }
 0x346   :  { %15781 = vmatprep.mubr.f32.mxu1 %v13752_v32 }
 0x347   :  { %15782 = vmatmul.mubr.f32.vlgmr.msra.gmra.mrb[22].mxu1 %v13762_v40 }
 0x348   :  { %16378 = vmatpush3.bf16.msra.mxu1 %v16845_v57  ;;  %15788 = vmatprep.mubr.f32.mxu1 %v13748_v43 }
 0x349   :  { %16380 = vmatprep.subr.bf16.mxu1 %v16869_v26 }
 0x34c   :  { %v16661_v19 = vpop.eup %16660 }
 0x34d   :  { %v16663_v12 = vpop.eup %16662  ;;  %v7122_v1 = vmul.f32 %v16661_v19, %v7113_v56 }
 0x34e   :  { %v7115_v48 = vmul.f32 %v16663_v12, %v7112_v39  ;;  %v16694_v12 = vld [vmem:[#allocation2 + $0x40] sm:$0xff] }
 0x34f   :  { %15789 = vmatmul.mubr.f32.vlgmr.msra.gmra.mrb[22].mxu1 %v13758_v18  ;;  %v7124_v38 = vsel %vm7123_vm0, %v7113_v56, %v7122_v1 }
 0x350   :  { %16382 = vmatpush3.bf16.msra.mxu1 %v16869_v26  ;;  %15795 = vmatprep.mubr.f32.mxu1 %v13749_v49  ;;  %v7117_v29 = vsel %vm7116_vm1, %v7112_v39, %v7115_v48  ;;  %v7127_v57 = vsel %vm7125_vm2, %v7126_v20, %v7124_v38  ;;  %v16692_v39 = vld [vmem:[#allocation2 + $0x48] sm:$0xff]  ;;  %v16695_v48 = vld [vmem:[#allocation5 + $0x40] sm:$0xff] }
 0x351   :  { %16384 = vmatprep.subr.bf16.mxu1 %v16815_v11  ;;  %v7120_v15 = vsel %vm7118_vm3, %v7119_v6, %v7117_v29  ;;  %v7129_v13 = vsel %vm135_vm7, %v7127_v57, 0.0 }
 0x352   :  { %v7128_v51 = vsel %vm135_vm7, %v7120_v15, 0.0 }
 0x353   :  { %v7130_v50 = vadd.f32 %v7129_v13, %v7128_v51 }
 0x355   :  { %7131 = vadd.xlane.f32.xlu1 %v7130_v50 }
 0x357   :  { %15796 = vmatmul.mubr.f32.vlgmr.msra.gmra.mrb[22].mxu1 %v13759_v31 }
 0x358   :  { %16386 = vmatpush3.bf16.msra.mxu1 %v16815_v11  ;;  %15802 = vmatprep.mubr.f32.mxu1 %v13750_v45 }
 0x359   :  { %16388 = vmatprep.subr.bf16.mxu1 %v16889_v58 }
 0x35f   :  { %15803 = vmatmul.mubr.f32.vlgmr.msra.gmra.mrb[22].mxu1 %v13760_v3 }
 0x360   :  { %16390 = vmatpush3.bf16.msra.mxu1 %v16889_v58  ;;  %15809 = vmatprep.mubr.f32.mxu1 %v13748_v43 }
 0x361   :  { %16392 = vmatprep.subr.bf16.mxu1 %v16815_v11 }
 0x365   :  { %v15398_v26 = vpop.f32.mrb[12].mxu1 }
 0x366   :  { %v8292_v54 = vpop.f32.mrb[13].mxu1  ;;  %v8303_v47 = vsub.f32 %v16688_v24, %v15398_v26 }
 0x367   :  { %15810 = vmatmul.mubr.f32.vlgmr.msra.gmra.mrb[22].mxu1 %v13758_v18  ;;  %v8302_v22 = vsub.f32 %v16690_v30, %v8292_v54 }
 0x368   :  { %16394 = vmatpush3.bf16.msra.mxu1 %v16815_v11  ;;  %15816 = vmatprep.mubr.f32.mxu1 %v13748_v43 }
 0x36f   :  { %15817 = vmatmul.mubr.f32.vlgmr.msra.gmra.mrb[22].mxu1 %v13758_v18 }
 0x371   :  { %s16636_s1 = spop %16635 }
 0x38a   :  { %v4773_v59 = vpop.xlane.xlu0 %4772 }
 0x38b   :  { %v4774_v17 = vrot.slane %v4773_v59, 4 }
 0x38d   :  { %v4775_v33 = vadd.f32 %v4774_v17, %v4773_v59 }
 0x38f   :  { %v4776_v42 = vrot.slane %v4775_v33, 2 }
 0x391   :  { %v4777_v7 = vadd.f32 %v4776_v42, %v4775_v33 }
 0x392   :  { %v15482_v9 = vpop.f32.mrb[14].mxu1 }
 0x393   :  { %v9466_v58 = vsub.f32 %v16689_v0, %v15482_v9  ;;  %v9455_v27 = vpop.f32.mrb[15].mxu1  ;;  %v4778_v62 = vrot.slane %v4777_v7, 1 }
 0x394   :  { %v9465_v28 = vsub.f32 %v16691_v35, %v9455_v27 }
 0x395   :  { %v9468_v16 = vsub.f32 %v8303_v47, %v9466_v58  ;;  %v4779_v11 = vadd.f32 %v4778_v62, %v4777_v7 }
 0x396   :  { %v9467_v25 = vsub.f32 %v8302_v22, %v9465_v28 }
 0x397   :  { %v9470_v10 = vmul.f32 %v9468_v16, %v9468_v16  ;;  %16637 = vpush %v4779_v11 }
 0x398   :  { %v9469_v53 = vmul.f32 %v9467_v25, %v9467_v25  ;;  %v16696_v25 = vld [vmem:[#allocation2 + $0x58] sm:$0xff] }
 0x399   :  { %v9472_v5 = vadd.f32 1e-06, %v9470_v10 }
 0x39a   :  { %v9471_v44 = vadd.f32 1e-06, %v9469_v53  ;;  %v16697_v53 = vld [vmem:[#allocation5 + $0x58] sm:$0xff] }
 0x39b   :  { %16664 = vrsqrt.f32 %v9472_v5  ;;  %vm9482_vm4 = vcmp.eq.f32.partialorder %v9472_v5, inf  ;;  %v9485_v14 = vand.u32 2147483648, %v9472_v5  ;;  %vm9484_vm6 = vcmp.eq.f32.partialorder %v9472_v5, 0.0 }
 0x39c   :  { %16666 = vrsqrt.f32 %v9471_v44  ;;  %vm9475_vm5 = vcmp.eq.f32.partialorder %v9471_v44, inf  ;;  %v9478_v2 = vand.u32 2147483648, %v9471_v44  ;;  %vm9477_vm11 = vcmp.eq.f32.partialorder %v9471_v44, 0.0 }
 0x3a5   :  { %v16665_v63 = vpop.eup %16664 }
 0x3a6   :  { %v16667_v21 = vpop.eup %16666  ;;  %v9481_v52 = vmul.f32 %v16665_v63, %v9472_v5  ;;  %v16698_v63 = vld [vmem:[#allocation2 + $0x50] sm:$0xff] }
 0x3a7   :  { %v9474_v46 = vmul.f32 %v16667_v21, %v9471_v44 }
 0x3a8   :  { %v9483_v4 = vsel %vm9482_vm4, %v9472_v5, %v9481_v52  ;;  %v16699_v52 = vld [vmem:[#allocation5 + $0x50] sm:$0xff] }
 0x3a9   :  { %v9476_v55 = vsel %vm9475_vm5, %v9471_v44, %v9474_v46  ;;  %v9486_v8 = vsel %vm9484_vm6, %v9485_v14, %v9483_v4 }
 0x3aa   :  { %v9479_v37 = vsel %vm9477_vm11, %v9478_v2, %v9476_v55  ;;  %v9488_v43 = vsel %vm135_vm7, %v9486_v8, 0.0 }
 0x3ab   :  { %v9487_v18 = vsel %vm135_vm7, %v9479_v37, 0.0 }
 0x3ac   :  { %v9489_v34 = vadd.f32 %v9488_v43, %v9487_v18 }
 0x3ae   :  { %9490 = vadd.xlane.f32.xlu1 %v9489_v34 }
 0x3be   :  { %v15566_v41 = vpop.f32.mrb[16].mxu1 }
 0x3bf   :  { %v10651_v36 = vpop.f32.mrb[17].mxu1  ;;  %v10662_v23 = vsub.f32 %v16692_v39, %v15566_v41 }
 0x3c0   :  { %v10661_v1 = vsub.f32 %v16694_v12, %v10651_v36 }
 0x3c8   :  { %s16638_s2 = spop %16637 }
 0x3c9   :  { %s4781_s15 = sadd.f32 %s16638_s2, %s16636_s1 }
 0x3e2   :  { %v7132_v49 = vpop.xlane.xlu1 %7131 }
 0x3e3   :  { %v7133_v31 = vrot.slane %v7132_v49, 4 }
 0x3e5   :  { %v7134_v60 = vadd.f32 %v7133_v31, %v7132_v49 }
 0x3e7   :  { %v7135_v56 = vrot.slane %v7134_v60, 2 }
 0x3e9   :  { %v7136_v45 = vadd.f32 %v7135_v56, %v7134_v60 }
 0x3ea   :  { %v15650_v3 = vpop.f32.mrb[18].mxu1 }
 0x3eb   :  { %v11825_v32 = vsub.f32 %v16693_v61, %v15650_v3  ;;  %v11814_v40 = vpop.f32.mrb[19].mxu1  ;;  %v7137_v19 = vrot.slane %v7136_v45, 1 }
 0x3ec   :  { %v11824_v20 = vsub.f32 %v16695_v48, %v11814_v40 }
 0x3ed   :  { %v11827_v6 = vsub.f32 %v10662_v23, %v11825_v32  ;;  %v7138_v38 = vadd.f32 %v7137_v19, %v7136_v45 }
 0x3ee   :  { %v11826_v29 = vsub.f32 %v10661_v1, %v11824_v20 }
 0x3ef   :  { %v11829_v57 = vmul.f32 %v11827_v6, %v11827_v6  ;;  %16639 = vpush %v7138_v38 }
 0x3f0   :  { %v11828_v15 = vmul.f32 %v11826_v29, %v11826_v29 }
 0x3f1   :  { %v11831_v13 = vadd.f32 1e-06, %v11829_v57 }
 0x3f2   :  { %v11830_v51 = vadd.f32 1e-06, %v11828_v15 }
 0x3f3   :  { %16668 = vrsqrt.f32 %v11831_v13  ;;  %vm11841_vm12 = vcmp.eq.f32.partialorder %v11831_v13, inf  ;;  %v11844_v17 = vand.u32 2147483648, %v11831_v13  ;;  %vm11843_vm8 = vcmp.eq.f32.partialorder %v11831_v13, 0.0 }
 0x3f4   :  { %16670 = vrsqrt.f32 %v11830_v51  ;;  %vm11834_vm15 = vcmp.eq.f32.partialorder %v11830_v51, inf  ;;  %v11837_v33 = vand.u32 2147483648, %v11830_v51  ;;  %vm11836_vm9 = vcmp.eq.f32.partialorder %v11830_v51, 0.0 }
 0x3fd   :  { %v16669_v50 = vpop.eup %16668 }
 0x3fe   :  { %v16671_v26 = vpop.eup %16670  ;;  %v11840_v54 = vmul.f32 %v16669_v50, %v11831_v13 }
 0x3ff   :  { %v11833_v59 = vmul.f32 %v16671_v26, %v11830_v51 }
 0x400   :  { %v11842_v42 = vsel %vm11841_vm12, %v11831_v13, %v11840_v54 }
 0x401   :  { %v11835_v7 = vsel %vm11834_vm15, %v11830_v51, %v11833_v59  ;;  %v11845_v9 = vsel %vm11843_vm8, %v11844_v17, %v11842_v42 }
 0x402   :  { %v11838_v24 = vsel %vm11836_vm9, %v11837_v33, %v11835_v7  ;;  %v11847_v47 = vsel %vm135_vm7, %v11845_v9, 0.0 }
 0x403   :  { %v11846_v0 = vsel %vm135_vm7, %v11838_v24, 0.0 }
 0x404   :  { %v11848_v58 = vadd.f32 %v11847_v47, %v11846_v0 }
 0x406   :  { %11849 = vadd.xlane.f32.xlu0 %v11848_v58 }
 0x416   :  { %v15734_v27 = vpop.f32.mrb[20].mxu1 }
 0x417   :  { %v13010_v62 = vpop.f32.mrb[21].mxu1  ;;  %v13021_v10 = vsub.f32 %v16696_v25, %v15734_v27 }
 0x418   :  { %v13020_v21 = vsub.f32 %v16698_v63, %v13010_v62 }
 0x420   :  { %s16640_s14 = spop %16639 }
 0x421   :  { %s7140_s17 = sadd.f32 %s16640_s14, %s4781_s15 }
 0x43b   :  { %v9491_v30 = vpop.xlane.xlu1 %9490 }
 0x43c   :  { %v9492_v22 = vrot.slane %v9491_v30, 4 }
 0x43e   :  { %v9493_v35 = vadd.f32 %v9492_v22, %v9491_v30 }
 0x440   :  { %v9494_v28 = vrot.slane %v9493_v35, 2 }
 0x442   :  { %v15818_v16 = vpop.f32.mrb[22].mxu1  ;;  %v9495_v11 = vadd.f32 %v9494_v28, %v9493_v35 }
 0x443   :  { %v14184_v5 = vsub.f32 %v16697_v53, %v15818_v16  ;;  %v14173_v44 = vpop.f32.mrb[23].mxu1 }
 0x444   :  { %v14183_v46 = vsub.f32 %v16699_v52, %v14173_v44  ;;  %v9496_v14 = vrot.slane %v9495_v11, 1 }
 0x445   :  { %v14186_v2 = vsub.f32 %v13021_v10, %v14184_v5 }
 0x446   :  { %v14185_v4 = vsub.f32 %v13020_v21, %v14183_v46  ;;  %v9497_v55 = vadd.f32 %v9496_v14, %v9495_v11 }
 0x447   :  { %v14188_v8 = vmul.f32 %v14186_v2, %v14186_v2 }
 0x448   :  { %v14187_v37 = vmul.f32 %v14185_v4, %v14185_v4  ;;  %16641 = vpush %v9497_v55 }
 0x449   :  { %v14190_v43 = vadd.f32 1e-06, %v14188_v8 }
 0x44a   :  { %v14189_v18 = vadd.f32 1e-06, %v14187_v37 }
 0x44b   :  { %16672 = vrsqrt.f32 %v14190_v43  ;;  %vm14200_vm10 = vcmp.eq.f32.partialorder %v14190_v43, inf  ;;  %v14203_v31 = vand.u32 2147483648, %v14190_v43  ;;  %vm14202_vm14 = vcmp.eq.f32.partialorder %v14190_v43, 0.0 }
 0x44c   :  { %16674 = vrsqrt.f32 %v14189_v18  ;;  %vm14193_vm13 = vcmp.eq.f32.partialorder %v14189_v18, inf  ;;  %v14196_v60 = vand.u32 2147483648, %v14189_v18  ;;  %vm14195_vm0 = vcmp.eq.f32.partialorder %v14189_v18, 0.0 }
 0x455   :  { %v16673_v34 = vpop.eup %16672 }
 0x456   :  { %v16675_v41 = vpop.eup %16674  ;;  %v14199_v36 = vmul.f32 %v16673_v34, %v14190_v43 }
 0x457   :  { %v14192_v49 = vmul.f32 %v16675_v41, %v14189_v18 }
 0x458   :  { %v14201_v56 = vsel %vm14200_vm10, %v14190_v43, %v14199_v36 }
 0x459   :  { %v14194_v45 = vsel %vm14193_vm13, %v14189_v18, %v14192_v49  ;;  %v14204_v3 = vsel %vm14202_vm14, %v14203_v31, %v14201_v56 }
 0x45a   :  { %v14197_v39 = vsel %vm14195_vm0, %v14196_v60, %v14194_v45  ;;  %v14206_v23 = vsel %vm135_vm7, %v14204_v3, 0.0 }
 0x45b   :  { %v14205_v61 = vsel %vm135_vm7, %v14197_v39, 0.0 }
 0x45c   :  { %v14207_v32 = vadd.f32 %v14206_v23, %v14205_v61 }
 0x45e   :  { %14208 = vadd.xlane.f32.xlu1 %v14207_v32 }
 0x479   :  { %s16642_s16 = spop %16641 }
 0x47a   :  { %s9499_s19 = sadd.f32 %s16642_s16, %s7140_s17 }
 0x493   :  { %v11850_v40 = vpop.xlane.xlu0 %11849 }
 0x494   :  { %v11851_v19 = vrot.slane %v11850_v40, 4 }
 0x496   :  { %v11852_v12 = vadd.f32 %v11851_v19, %v11850_v40 }
 0x498   :  { %v11853_v1 = vrot.slane %v11852_v12, 2 }
 0x49a   :  { %v11854_v48 = vadd.f32 %v11853_v1, %v11852_v12 }
 0x49c   :  { %v11855_v20 = vrot.slane %v11854_v48, 1 }
 0x49e   :  { %v11856_v6 = vadd.f32 %v11855_v20, %v11854_v48 }
 0x4a0   :  { %16643 = vpush %v11856_v6 }
 0x4d1   :  { %s16644_s18 = spop %16643 }
 0x4d2   :  { %s11858_s20 = sadd.f32 %s16644_s18, %s9499_s19 }
 0x4eb   :  { %v14209_v38 = vpop.xlane.xlu1 %14208 }
 0x4ec   :  { %v14210_v29 = vrot.slane %v14209_v38, 4 }
 0x4ee   :  { %v14211_v57 = vadd.f32 %v14210_v29, %v14209_v38 }
 0x4f0   :  { %v14212_v15 = vrot.slane %v14211_v57, 2 }
 0x4f2   :  { %v14213_v13 = vadd.f32 %v14212_v15, %v14211_v57 }
 0x4f4   :  { %v14214_v51 = vrot.slane %v14213_v13, 1 }
 0x4f6   :  { %v14215_v50 = vadd.f32 %v14214_v51, %v14213_v13 }
 0x4f8   :  { %16645 = vpush %v14215_v50 }
 0x529   :  { %s16646_s21 = spop %16645 }
 0x52a   :  { %s14217_s22 = sadd.f32 %s16646_s21, %s11858_s20 }
 0x52c   :  { %14219 = sst [smem:[#allocation7]] %s14217_s22 }
 0x52d   :  { %16753 = shalt.err (!%p16750_p4)
}
 0x52e   :  { %s16764_s30 = smov [#allocation7]  }
 0x52f   :  { %14227 = dma.smem_to_hbm %s16764_s30, 16, %s18399_s3, [#allocation4]  }
 0x530   :  { %16758 = dma.done.wait [#allocation4], 16  }
 0x531   :  { %16759 = vsyncadd [#allocation4], 4294967280 }
 0x532   :  { %14231 = sfence }
 0x533   :  { %14232 = vsyncpa [#allocation3], 1 }
 0x534   :  { %14233 = vsyncpa [#allocation6], 1 }
 0x535   :  { %14234 = vsyncpa [#allocation4], 1 }

</bundles_post_ra>
